<compile_context>
chip_gen: v7x
topology: tpu7x:2x2x1
jax: 0.10.0
libtpu: 0.0.40
codegen_flags: <defaults>
</compile_context>

<pallas_src>
import functools

import jax
import jax.numpy as jnp
from jax import lax
from jax.experimental import pallas as pl
from jax.experimental.pallas import tpu as pltpu

_LANE = 128


# ----------------------------------------------------------------------------
# pltpu.roll direction probe (tiny kernel, run once, cached).  Returns +1 / -1
# (sign so that roll(x, sign*s) moves data toward higher lane indices) or None
# (fall back to concat/slice shifts).
# ----------------------------------------------------------------------------
@functools.lru_cache(maxsize=None)
def _roll_shift_sign():
    def probe(x_ref, o_ref):
        o_ref[...] = pltpu.roll(x_ref[...], shift=1, axis=1)

    x = jnp.arange(8 * _LANE, dtype=jnp.float32).reshape(8, _LANE)
    try:
        y = pl.pallas_call(
            probe, out_shape=jax.ShapeDtypeStruct((8, _LANE), jnp.float32))(x)
        y = jax.block_until_ready(y)
    except Exception:
        return None
    if bool(jnp.array_equal(y, jnp.roll(x, 1, axis=1))):
        return 1
    if bool(jnp.array_equal(y, jnp.roll(x, -1, axis=1))):
        return -1
    return None


def _shift_right(y, s, lane_iota, roll_sign):
    """Causal right shift by static s along the last (lane/time) axis, zero fill."""
    if s == 0:
        return y
    T = y.shape[-1]
    if s >= T:
        return jnp.zeros_like(y)
    if roll_sign is None:
        # Known-correct fallback (materializes a small VMEM copy).
        return jnp.concatenate(
            [jnp.zeros((y.shape[0], s), y.dtype), y[:, :T - s]], axis=1)
    rolled = pltpu.roll(y, shift=(roll_sign * s) % T, axis=1)   # XLU rotation
    return jnp.where(lane_iota >= s, rolled, jnp.zeros_like(rolled))


# ----------------------------------------------------------------------------
# Fused kernel (one grid step == one (batch, layer) pair)
# ----------------------------------------------------------------------------
def _make_kernel(*, L, kd1, cd1, dilations, T, mm_dtype, roll_sign, eps=1e-5):
    n_dil = len(dilations)

    def mm(w, x):
        # Weights are pre-cast to mm_dtype in the wrapper; accumulate in f32.
        return jnp.dot(w, x.astype(mm_dtype), preferred_element_type=jnp.float32)

    def kernel(en_ref, x1_ref, inwe_ref, inwp_ref, inb_ref,
               tin_ref, w2_ref, tow_ref, pv_ref,
               rrw_ref, rrb_ref, riw_ref, rib_ref,
               o_ref, acc_ref, ystack_ref):
        l = pl.program_id(1)
        lane = lax.broadcasted_iota(jnp.int32, (1, T), 1)
        # NOTE: all three cLNs in a SqueezedTCM normalize cd1-channel tensors,
        # so a single per-time 1/entry_count vector is shared by all of them.
        inv_entry = 1.0 / ((lane.astype(jnp.float32) + 1.0) * float(cd1))

        def shift(y, s):
            return _shift_right(y, s, lane, roll_sign)

        def scan_time(x):
            # Inclusive prefix sum along lanes (Hillis-Steele, log2(T) steps).
            d = 1
            while d < T:
                x = x + shift(x, d)
                d *= 2
            return x

        def cln(y, cum_s, cum_q, gain, bias):
            cm = cum_s * inv_entry
            cv = (cum_q - 2.0 * cm * cum_s) * inv_entry + cm * cm
            return (y - cm) * lax.rsqrt(cv + eps) * gain + bias

        # ---- first layer step: input 1x1 conv (en_x channels || pre_x channels)
        @pl.when(l == 0)
        def _():
            acc_ref[...] = (mm(inwe_ref[...], en_ref[0])
                            + mm(inwp_ref[...], x1_ref[0])
                            + inb_ref[...])

        x = acc_ref[...]                                  # (d_feat, T) f32, resident
        h = mm(tin_ref[0], x)                             # (cd1, T)

        pv = pv_ref[0]                                    # (cd1, 9) f32
        aL, gL, bL = pv[:, 0:1], pv[:, 1:2], pv[:, 2:3]
        aR, gR, bR = pv[:, 3:4], pv[:, 4:5], pv[:, 5:6]
        aO, gO, bO = pv[:, 6:7], pv[:, 7:8], pv[:, 8:9]

        yL = jnp.where(h >= 0, h, aL * h)                 # PReLU (L branch)
        yR = jnp.where(h >= 0, h, aR * h)                 # PReLU (R branch)

        # One fused prefix-sum scan for both branches' cLN statistics.
        stats = jnp.concatenate(
            [jnp.sum(yL, 0, keepdims=True), jnp.sum(yL * yL, 0, keepdims=True),
             jnp.sum(yR, 0, keepdims=True), jnp.sum(yR * yR, 0, keepdims=True)],
            axis=0)                                        # (4, T)
        cs = scan_time(stats)
        yLR = jnp.concatenate(
            [cln(yL, cs[0:1], cs[1:2], gL, bL),
             cln(yR, cs[2:3], cs[3:4], gR, bR)], axis=0)   # (2*cd1, T)

        # Dilation-dependent causal tap stack (one static branch per dilation).
        def make_taps(dil):
            def body():
                taps = [shift(yLR, (kd1 - 1 - k) * dil) for k in range(kd1)]
                ystack_ref[...] = jnp.concatenate(taps, axis=0).astype(ystack_ref.dtype)
            return body

        for bi, dil in enumerate(dilations):
            pl.when(l % n_dil == bi)(make_taps(dil))

        # Both dilated convs in ONE block-diagonal matmul: z = [zL; zR].
        z = mm(w2_ref[0], ystack_ref[...])                 # (2*cd1, T)
        g = z[:cd1] * jax.nn.sigmoid(z[cd1:])

        yO = jnp.where(g >= 0, g, aO * g)                  # PReLU (out branch)
        statsO = jnp.concatenate(
            [jnp.sum(yO, 0, keepdims=True), jnp.sum(yO * yO, 0, keepdims=True)],
            axis=0)                                        # (2, T)
        csO = scan_time(statsO)
        yOn = cln(yO, csO[0:1], csO[1:2], gO, bO)

        acc_ref[...] = x + mm(tow_ref[0], yOn)             # residual update

        # ---- last layer step: real / imag residual 1x1 heads
        @pl.when(l == L - 1)
        def _():
            xf = acc_ref[...]
            o_ref[0, 0] = (mm(rrw_ref[...], xf) + rrb_ref[...]).astype(o_ref.dtype)
            o_ref[0, 1] = (mm(riw_ref[...], xf) + rib_ref[...]).astype(o_ref.dtype)

    return kernel


# ----------------------------------------------------------------------------
# Full HighOrderBlock forward (weight re-packing / glue in plain JAX)
# ----------------------------------------------------------------------------
def pallas_forward(en_x, pre_x, params, dilations, p, use_bf16=True):
    B, two, T, F = pre_x.shape
    assert two == 2
    C_en = en_x.shape[1]
    d_feat, in_feat = params['in_w'].shape
    assert in_feat == C_en + 2 * F
    cd1 = params['tcm'][0][0]['in_w'].shape[0]
    kd1 = params['tcm'][0][0]['wL'].shape[0]
    n_dil = len(dilations)
    L = p * n_dil

    mm_dtype = jnp.bfloat16 if use_bf16 else jnp.float32
    roll_sign = _roll_shift_sign()

    # Lane-dense time: pad T to a multiple of 128.  Every op in the block is
    # causal, so padded (trailing) columns never influence real columns.
    T_pad = max(_LANE, pl.cdiv(T, _LANE) * _LANE)

    # (B, 2, T, F) -> (B, 2F, T); en_x and x1 stay separate (no concat pass).
    x1 = jnp.transpose(pre_x, (0, 1, 3, 2)).reshape(B, 2 * F, T)
    if T_pad != T:
        pad = ((0, 0), (0, 0), (0, T_pad - T))
        en_p, x1_p = jnp.pad(en_x, pad), jnp.pad(x1, pad)
    else:
        en_p, x1_p = en_x, x1

    # ---- pack / fold weights once (XLA, outside the kernel) ----
    f32 = jnp.float32
    inw = params['in_w'].astype(f32)
    inw_en = inw[:, :C_en].astype(mm_dtype)
    inw_pre = inw[:, C_en:].astype(mm_dtype)
    in_b = params['in_b'].reshape(d_feat, 1).astype(f32)

    tin, w2, tow, pvec = [], [], [], []
    zero = jnp.zeros((cd1, cd1), f32)
    for pi in range(p):
        for di in range(n_dil):
            prm = params['tcm'][pi][di]
            tin.append(prm['in_w'].astype(f32))
            wLf = jnp.transpose(prm['wL'].astype(f32), (1, 0, 2))   # (O, K, I)
            wRf = jnp.transpose(prm['wR'].astype(f32), (1, 0, 2))
            blocks = []
            for k in range(kd1):
                top = jnp.concatenate([wLf[:, k, :], zero], axis=1)
                bot = jnp.concatenate([zero, wRf[:, k, :]], axis=1)
                blocks.append(jnp.concatenate([top, bot], axis=0))  # (2cd1, 2cd1)
            w2.append(jnp.concatenate(blocks, axis=1))               # (2cd1, kd1*2cd1)
            tow.append(prm['out_w'].astype(f32))
            pvec.append(jnp.concatenate(
                [prm['aL'], prm['gL'], prm['bL'],
                 prm['aR'], prm['gR'], prm['bR'],
                 prm['aO'], prm['gO'], prm['bO']], axis=1))          # (cd1, 9)
    tin = jnp.stack(tin).astype(mm_dtype)     # (L, cd1, d_feat)
    w2 = jnp.stack(w2).astype(mm_dtype)       # (L, 2cd1, kd1*2cd1)
    tow = jnp.stack(tow).astype(mm_dtype)     # (L, d_feat, cd1)
    pvec = jnp.stack(pvec).astype(f32)        # (L, cd1, 9)  lane-efficient layout
    rr_w = params['rr_w'].astype(mm_dtype)
    ri_w = params['ri_w'].astype(mm_dtype)
    rr_b = params['rr_b'].reshape(F, 1).astype(f32)
    ri_b = params['ri_b'].reshape(F, 1).astype(f32)

    kernel = _make_kernel(L=L, kd1=kd1, cd1=cd1,
                          dilations=tuple(int(d) for d in dilations),
                          T=T_pad, mm_dtype=mm_dtype, roll_sign=roll_sign)

    def const_spec(shape):
        return pl.BlockSpec(shape, lambda b, l: (0,) * len(shape))

    def layer_spec(shape):
        return pl.BlockSpec((1,) + shape, lambda b, l: (l, 0, 0))

    out = pl.pallas_call(
        kernel,
        out_shape=jax.ShapeDtypeStruct((B, 2, F, T_pad), en_x.dtype),
        grid=(B, L),
        in_specs=[
            pl.BlockSpec((1, C_en, T_pad), lambda b, l: (b, 0, 0)),
            pl.BlockSpec((1, 2 * F, T_pad), lambda b, l: (b, 0, 0)),
            const_spec((d_feat, C_en)),
            const_spec((d_feat, 2 * F)),
            const_spec((d_feat, 1)),
            layer_spec((cd1, d_feat)),
            layer_spec((2 * cd1, kd1 * 2 * cd1)),
            layer_spec((d_feat, cd1)),
            layer_spec((cd1, 9)),
            const_spec((F, d_feat)),
            const_spec((F, 1)),
            const_spec((F, d_feat)),
            const_spec((F, 1)),
        ],
        out_specs=pl.BlockSpec((1, 2, F, T_pad), lambda b, l: (b, 0, 0, 0)),
        scratch_shapes=[
            pltpu.VMEM((d_feat, T_pad), jnp.float32),       # resident activation
            pltpu.VMEM((kd1 * 2 * cd1, T_pad), mm_dtype),   # dilated tap stack
        ],
        compiler_params=pltpu.CompilerParams(
            dimension_semantics=("parallel", "arbitrary"),
            vmem_limit_bytes=64 * 1024 * 1024,
        ),
    )(en_p, x1_p, inw_en, inw_pre, in_b, tin, w2, tow, pvec,
      rr_w, rr_b, ri_w, ri_b)

    out = out[..., :T]
    # TODO(synk): this (B,2,F,T)->(B,2,T,F) transpose could be pushed into the
    #             consumer to save one more HBM pass; kept for module-API parity.
    return jnp.transpose(out, (0, 1, 3, 2))


# ----------------------------------------------------------------------------
# Pure-JAX reference (mirrors the PyTorch module) for correctness checking
# ----------------------------------------------------------------------------
def _ref_conv1x1(x, w, b=None):
    y = jnp.einsum('oc,bct->bot', w, x, precision=lax.Precision.HIGHEST)
    if b is not None:
        y = y + b[None, :, None]
    return y


def _ref_prelu(x, a):
    return jnp.where(x >= 0, x, a[None] * x)


def _ref_cln(x, gain, bias, eps=1e-5):
    B, C, T = x.shape
    cum_sum = jnp.cumsum(jnp.sum(x, axis=1), axis=1)
    cum_pow = jnp.cumsum(jnp.sum(x * x, axis=1), axis=1)
    entry = jnp.arange(1, T + 1, dtype=x.dtype) * C
    cum_mean = cum_sum / entry
    cum_var = (cum_pow - 2.0 * cum_mean * cum_sum) / entry + cum_mean ** 2
    cum_std = jnp.sqrt(cum_var + eps)
    xn = (x - cum_mean[:, None, :]) / cum_std[:, None, :]
    return xn * gain[None] + bias[None]


def _ref_dilconv(x, w, dilation):
    kd1 = w.shape[0]
    pad = (kd1 - 1) * dilation
    w_oih = jnp.transpose(w, (1, 2, 0))
    return lax.conv_general_dilated(
        x, w_oih, window_strides=(1,), padding=[(pad, 0)],
        rhs_dilation=(dilation,), dimension_numbers=('NCH', 'OIH', 'NCH'),
        precision=lax.Precision.HIGHEST)


def ref_forward(en_x, pre_x, params, dilations, p):
    B, _, T, F = pre_x.shape
    x1 = jnp.transpose(pre_x, (0, 1, 3, 2)).reshape(B, 2 * F, T)
    x = jnp.concatenate([en_x, x1], axis=1)
    x = _ref_conv1x1(x, params['in_w'], params['in_b'])
    for pi in range(p):
        for di, dil in enumerate(dilations):
            prm = params['tcm'][pi][di]
            resi = x
            h = _ref_conv1x1(x, prm['in_w'])
            l = _ref_dilconv(_ref_cln(_ref_prelu(h, prm['aL']), prm['gL'], prm['bL']),
                             prm['wL'], dil)
            r = jax.nn.sigmoid(
                _ref_dilconv(_ref_cln(_ref_prelu(h, prm['aR']), prm['gR'], prm['bR']),
                             prm['wR'], dil))
            g = l * r
            o = _ref_conv1x1(_ref_cln(_ref_prelu(g, prm['aO']), prm['gO'], prm['bO']),
                             prm['out_w'])
            x = o + resi
    xr = jnp.transpose(_ref_conv1x1(x, params['rr_w'], params['rr_b']), (0, 2, 1))
    xi = jnp.transpose(_ref_conv1x1(x, params['ri_w'], params['ri_b']), (0, 2, 1))
    return jnp.stack([xr, xi], axis=1)


# ----------------------------------------------------------------------------
if __name__ == "__main__":
    # Small but structurally faithful configuration (full dilation set).
    # T = 128 keeps the time axis lane-dense (no padding needed).
    B, T = 2, 128
    kd1, cd1, d_feat = 3, 16, 64
    fft_num = 32
    F = fft_num // 2 + 1            # 17
    dilations = [1, 2, 5, 9]
    p = 2
    in_feat = 2 * F + d_feat        # 98

    keys = iter(jax.random.split(jax.random.PRNGKey(0), 512))

    def rnd(shape, scale=0.1):
        return jax.random.normal(next(keys), shape, dtype=jnp.float32) * scale

    params = {
        'in_w': rnd((d_feat, in_feat)), 'in_b': rnd((d_feat,)),
        'rr_w': rnd((F, d_feat)), 'rr_b': rnd((F,)),
        'ri_w': rnd((F, d_feat)), 'ri_b': rnd((F,)),
        'tcm': [],
    }
    for _ in range(p):
        lst = []
        for _ in dilations:
            lst.append({
                'in_w': rnd((cd1, d_feat)),
                'aL': jnp.full((cd1, 1), 0.25, jnp.float32) + rnd((cd1, 1), 0.05),
                'gL': jnp.ones((cd1, 1), jnp.float32) + rnd((cd1, 1), 0.05),
                'bL': rnd((cd1, 1), 0.05),
                'wL': rnd((kd1, cd1, cd1)),
                'aR': jnp.full((cd1, 1), 0.25, jnp.float32) + rnd((cd1, 1), 0.05),
                'gR': jnp.ones((cd1, 1), jnp.float32) + rnd((cd1, 1), 0.05),
                'bR': rnd((cd1, 1), 0.05),
                'wR': rnd((kd1, cd1, cd1)),
                'aO': jnp.full((cd1, 1), 0.25, jnp.float32) + rnd((cd1, 1), 0.05),
                'gO': jnp.ones((cd1, 1), jnp.float32) + rnd((cd1, 1), 0.05),
                'bO': rnd((cd1, 1), 0.05),
                'out_w': rnd((d_feat, cd1)),
            })
        params['tcm'].append(lst)

    en_x = jax.random.normal(next(keys), (B, d_feat, T), dtype=jnp.float32)
    pre_x = jax.random.normal(next(keys), (B, 2, T, F), dtype=jnp.float32)

    ref = jax.block_until_ready(ref_forward(en_x, pre_x, params, dilations, p))
    scale = float(jnp.max(jnp.abs(ref)))

    # Exact-math path (f32 matmul operands) - tight check of kernel math.
    out_f32 = pallas_forward(en_x, pre_x, params, dilations, p, use_bf16=False)
    out_f32 = jax.block_until_ready(out_f32)
    assert out_f32.shape == (B, 2, T, F), out_f32.shape
    err_f32 = float(jnp.max(jnp.abs(out_f32 - ref)))
    assert err_f32 < 5e-3, f"f32 path max abs error {err_f32}"

    # Fast path (bf16 MXU operands, f32 accumulation) - sanity check.
    out_bf16 = pallas_forward(en_x, pre_x, params, dilations, p, use_bf16=True)
    out_bf16 = jax.block_until_ready(out_bf16)
    err_bf16 = float(jnp.max(jnp.abs(out_bf16 - ref)))
    assert err_bf16 < max(5e-2 * scale, 5e-2), (
        f"bf16 path max abs error {err_bf16} (ref scale {scale})")

    print("KERNEL_OK")
</pallas_src>

<mosaic_0001>
module attributes {stable_mosaic.version = 11 : i64} {
  func.func @probe(%arg0: memref<8x128xf32, #tpu.memory_space<vmem>>, %arg1: memref<8x128xf32, #tpu.memory_space<vmem>>) attributes {dimension_semantics = [], scalar_prefetch = 0 : i64, scratch_operands = 0 : i64, tpu.core_type = #tpu.core_type<tc>} {
    %c0 = arith.constant 0 : index
    %c0_0 = arith.constant 0 : index
    %0 = vector.load %arg0[%c0, %c0_0] : memref<8x128xf32, #tpu.memory_space<vmem>>, vector<8x128xf32>
    %c1_i32 = arith.constant 1 : i32
    %1 = tpu.dynamic_rotate %0 by %c1_i32 dim 1 : vector<8x128xf32>, i32 -> vector<8x128xf32>
    %c0_1 = arith.constant 0 : index
    %c0_2 = arith.constant 0 : index
    %2 = vector.load %arg1[%c0_1, %c0_2] : memref<8x128xf32, #tpu.memory_space<vmem>>, vector<8x128xf32>
    tpu.vector_store %arg1[%c0_1, %c0_2], %1 {strides = array<i32>} : memref<8x128xf32, #tpu.memory_space<vmem>>, vector<8x128xf32>,
    return
  }
}

module attributes {stable_mosaic.version = 11 : i64} {
  func.func @kernel(%arg0: i32, %arg1: i32, %arg2: memref<1x64x128xf32, #tpu.memory_space<vmem>>, %arg3: memref<1x34x128xf32, #tpu.memory_space<vmem>>, %arg4: memref<64x64xf32, #tpu.memory_space<vmem>>, %arg5: memref<64x34xf32, #tpu.memory_space<vmem>>, %arg6: memref<64x1xf32, #tpu.memory_space<vmem>>, %arg7: memref<1x16x64xf32, #tpu.memory_space<vmem>>, %arg8: memref<1x32x96xf32, #tpu.memory_space<vmem>>, %arg9: memref<1x64x16xf32, #tpu.memory_space<vmem>>, %arg10: memref<1x16x9xf32, #tpu.memory_space<vmem>>, %arg11: memref<17x64xf32, #tpu.memory_space<vmem>>, %arg12: memref<17x1xf32, #tpu.memory_space<vmem>>, %arg13: memref<17x64xf32, #tpu.memory_space<vmem>>, %arg14: memref<17x1xf32, #tpu.memory_space<vmem>>, %arg15: memref<1x2x17x128xf32, #tpu.memory_space<vmem>>, %arg16: memref<64x128xf32, #tpu.memory_space<vmem>>, %arg17: memref<96x128xf32, #tpu.memory_space<vmem>>) attributes {dimension_semantics = [#tpu.dimension_semantics<parallel>, #tpu.dimension_semantics<arbitrary>], iteration_bounds = array<i64: 2, 8>, scalar_prefetch = 0 : i64, scratch_operands = 2 : i64, tpu.core_type = #tpu.core_type<tc>, window_params = [{transform_indices = @transform_0, window_bounds = array<i64: 1, 64, 128>}, {transform_indices = @transform_1, window_bounds = array<i64: 1, 34, 128>}, {pipeline_mode = #tpu.pipeline_mode<synchronous>, transform_indices = @transform_2, window_bounds = array<i64: 64, 64>}, {pipeline_mode = #tpu.pipeline_mode<synchronous>, transform_indices = @transform_3, window_bounds = array<i64: 64, 34>}, {pipeline_mode = #tpu.pipeline_mode<synchronous>, transform_indices = @transform_4, window_bounds = array<i64: 64, 1>}, {transform_indices = @transform_5, window_bounds = array<i64: 1, 16, 64>}, {transform_indices = @transform_6, window_bounds = array<i64: 1, 32, 96>}, {transform_indices = @transform_7, window_bounds = array<i64: 1, 64, 16>}, {transform_indices = @transform_8, window_bounds = array<i64: 1, 16, 9>}, {pipeline_mode = #tpu.pipeline_mode<synchronous>, transform_indices = @transform_9, window_bounds = array<i64: 17, 64>}, {pipeline_mode = #tpu.pipeline_mode<synchronous>, transform_indices = @transform_10, window_bounds = array<i64: 17, 1>}, {pipeline_mode = #tpu.pipeline_mode<synchronous>, transform_indices = @transform_11, window_bounds = array<i64: 17, 64>}, {pipeline_mode = #tpu.pipeline_mode<synchronous>, transform_indices = @transform_12, window_bounds = array<i64: 17, 1>}, {transform_indices = @transform_13, window_bounds = array<i64: 1, 2, 17, 128>}]} {
    %0 = tpu.iota {dimensions = array<i32: 1>} : vector<1x128xi32>
    %1 = arith.sitofp %0 : vector<1x128xi32> to vector<1x128xf32>
    %cst = arith.constant 1.000000e+00 : f32
    %2 = vector.broadcast %cst : f32 to vector<1x128xf32>
    %3 = arith.addf %1, %2 : vector<1x128xf32>
    %cst_0 = arith.constant 1.600000e+01 : f32
    %4 = vector.broadcast %cst_0 : f32 to vector<1x128xf32>
    %5 = arith.mulf %3, %4 : vector<1x128xf32>
    %cst_1 = arith.constant 1.000000e+00 : f32
    %6 = vector.broadcast %cst_1 : f32 to vector<1x128xf32>
    %7 = arith.divf %6, %5 : vector<1x128xf32>
    %c0_i32 = arith.constant 0 : i32
    %8 = arith.cmpi eq, %arg1, %c0_i32 : i32
    %9 = arith.extui %8 : i1 to i32
    %c0_i32_2 = arith.constant 0 : i32
    %10 = arith.cmpi ne, %9, %c0_i32_2 : i32
    scf.if %10 {
      %c0_82 = arith.constant 0 : index
      %c0_83 = arith.constant 0 : index
      %250 = vector.load %arg4[%c0_82, %c0_83] : memref<64x64xf32, #tpu.memory_space<vmem>>, vector<64x64xf32>
      %c0_84 = arith.constant 0 : index
      %c0_85 = arith.constant 0 : index
      %c0_86 = arith.constant 0 : index
      %251 = vector.load %arg2[%c0_84, %c0_85, %c0_86] : memref<1x64x128xf32, #tpu.memory_space<vmem>>, vector<1x64x128xf32>
      %252 = vector.shape_cast %251 : vector<1x64x128xf32> to vector<64x128xf32>
      %cst_87 = arith.constant dense<0.000000e+00> : vector<64x128xf32>
      %253 = tpu.matmul %250, %252, %cst_87 {dimension_numbers = #tpu.dot_dimension_numbers<[1], [0], [0], [1], [0, 0, 1, 1], [], []>} : vector<64x64xf32>, vector<64x128xf32>, vector<64x128xf32> -> vector<64x128xf32>
      %c0_88 = arith.constant 0 : index
      %c0_89 = arith.constant 0 : index
      %254 = vector.load %arg5[%c0_88, %c0_89] : memref<64x34xf32, #tpu.memory_space<vmem>>, vector<64x34xf32>
      %c0_90 = arith.constant 0 : index
      %c0_91 = arith.constant 0 : index
      %c0_92 = arith.constant 0 : index
      %255 = vector.load %arg3[%c0_90, %c0_91, %c0_92] : memref<1x34x128xf32, #tpu.memory_space<vmem>>, vector<1x34x128xf32>
      %256 = vector.shape_cast %255 : vector<1x34x128xf32> to vector<34x128xf32>
      %cst_93 = arith.constant dense<0.000000e+00> : vector<64x128xf32>
      %257 = tpu.matmul %254, %256, %cst_93 {dimension_numbers = #tpu.dot_dimension_numbers<[1], [0], [0], [1], [0, 0, 1, 1], [], []>} : vector<64x34xf32>, vector<34x128xf32>, vector<64x128xf32> -> vector<64x128xf32>
      %258 = arith.addf %253, %257 : vector<64x128xf32>
      %c0_94 = arith.constant 0 : index
      %c0_95 = arith.constant 0 : index
      %259 = vector.load %arg6[%c0_94, %c0_95] : memref<64x1xf32, #tpu.memory_space<vmem>>, vector<64x1xf32>
      %260 = vector.broadcast %259 : vector<64x1xf32> to vector<64x128xf32>
      %261 = arith.addf %258, %260 : vector<64x128xf32>
      %c0_96 = arith.constant 0 : index
      %c0_97 = arith.constant 0 : index
      %262 = vector.load %arg16[%c0_96, %c0_97] : memref<64x128xf32, #tpu.memory_space<vmem>>, vector<64x128xf32>
      tpu.vector_store %arg16[%c0_96, %c0_97], %261 {strides = array<i32>} : memref<64x128xf32, #tpu.memory_space<vmem>>, vector<64x128xf32>,
    } else {
    }
    %c0 = arith.constant 0 : index
    %c0_3 = arith.constant 0 : index
    %11 = vector.load %arg16[%c0, %c0_3] : memref<64x128xf32, #tpu.memory_space<vmem>>, vector<64x128xf32>
    %c0_4 = arith.constant 0 : index
    %c0_5 = arith.constant 0 : index
    %c0_6 = arith.constant 0 : index
    %12 = vector.load %arg7[%c0_4, %c0_5, %c0_6] : memref<1x16x64xf32, #tpu.memory_space<vmem>>, vector<1x16x64xf32>
    %13 = vector.shape_cast %12 : vector<1x16x64xf32> to vector<16x64xf32>
    %cst_7 = arith.constant dense<0.000000e+00> : vector<16x128xf32>
    %14 = tpu.matmul %13, %11, %cst_7 {dimension_numbers = #tpu.dot_dimension_numbers<[1], [0], [0], [1], [0, 0, 1, 1], [], []>} : vector<16x64xf32>, vector<64x128xf32>, vector<16x128xf32> -> vector<16x128xf32>
    %c0_8 = arith.constant 0 : index
    %c0_9 = arith.constant 0 : index
    %c0_10 = arith.constant 0 : index
    %15 = vector.load %arg10[%c0_8, %c0_9, %c0_10] : memref<1x16x9xf32, #tpu.memory_space<vmem>>, vector<1x16x9xf32>
    %16 = vector.shape_cast %15 : vector<1x16x9xf32> to vector<16x9xf32>
    %17 = vector.extract_strided_slice %16 {offsets = [0, 0], sizes = [16, 1], strides = [1, 1]} : vector<16x9xf32> to vector<16x1xf32>
    %18 = vector.extract_strided_slice %16 {offsets = [0, 1], sizes = [16, 1], strides = [1, 1]} : vector<16x9xf32> to vector<16x1xf32>
    %19 = vector.extract_strided_slice %16 {offsets = [0, 2], sizes = [16, 1], strides = [1, 1]} : vector<16x9xf32> to vector<16x1xf32>
    %20 = vector.extract_strided_slice %16 {offsets = [0, 3], sizes = [16, 1], strides = [1, 1]} : vector<16x9xf32> to vector<16x1xf32>
    %21 = vector.extract_strided_slice %16 {offsets = [0, 4], sizes = [16, 1], strides = [1, 1]} : vector<16x9xf32> to vector<16x1xf32>
    %22 = vector.extract_strided_slice %16 {offsets = [0, 5], sizes = [16, 1], strides = [1, 1]} : vector<16x9xf32> to vector<16x1xf32>
    %23 = vector.extract_strided_slice %16 {offsets = [0, 6], sizes = [16, 1], strides = [1, 1]} : vector<16x9xf32> to vector<16x1xf32>
    %24 = vector.extract_strided_slice %16 {offsets = [0, 7], sizes = [16, 1], strides = [1, 1]} : vector<16x9xf32> to vector<16x1xf32>
    %25 = vector.extract_strided_slice %16 {offsets = [0, 8], sizes = [16, 1], strides = [1, 1]} : vector<16x9xf32> to vector<16x1xf32>
    %cst_11 = arith.constant 0.000000e+00 : f32
    %26 = vector.broadcast %cst_11 : f32 to vector<16x128xf32>
    %27 = arith.cmpf oge, %14, %26 : vector<16x128xf32>
    %28 = vector.broadcast %17 : vector<16x1xf32> to vector<16x128xf32>
    %29 = arith.mulf %28, %14 : vector<16x128xf32>
    %30 = arith.select %27, %14, %29 : vector<16x128xi1>, vector<16x128xf32>
    %cst_12 = arith.constant 0.000000e+00 : f32
    %31 = vector.broadcast %cst_12 : f32 to vector<16x128xf32>
    %32 = arith.cmpf oge, %14, %31 : vector<16x128xf32>
    %33 = vector.broadcast %20 : vector<16x1xf32> to vector<16x128xf32>
    %34 = arith.mulf %33, %14 : vector<16x128xf32>
    %35 = arith.select %32, %14, %34 : vector<16x128xi1>, vector<16x128xf32>
    %cst_13 = arith.constant dense<0.000000e+00> : vector<128xf32>
    %36 = vector.multi_reduction <add>, %30, %cst_13 [0] : vector<16x128xf32> to vector<128xf32>
    %37 = vector.shape_cast %36 : vector<128xf32> to vector<1x128xf32>
    %38 = arith.mulf %30, %30 : vector<16x128xf32>
    %cst_14 = arith.constant dense<0.000000e+00> : vector<128xf32>
    %39 = vector.multi_reduction <add>, %38, %cst_14 [0] : vector<16x128xf32> to vector<128xf32>
    %40 = vector.shape_cast %39 : vector<128xf32> to vector<1x128xf32>
    %cst_15 = arith.constant dense<0.000000e+00> : vector<128xf32>
    %41 = vector.multi_reduction <add>, %35, %cst_15 [0] : vector<16x128xf32> to vector<128xf32>
    %42 = vector.shape_cast %41 : vector<128xf32> to vector<1x128xf32>
    %43 = arith.mulf %35, %35 : vector<16x128xf32>
    %cst_16 = arith.constant dense<0.000000e+00> : vector<128xf32>
    %44 = vector.multi_reduction <add>, %43, %cst_16 [0] : vector<16x128xf32> to vector<128xf32>
    %45 = vector.shape_cast %44 : vector<128xf32> to vector<1x128xf32>
    %46 = tpu.concatenate %37, %40, %42, %45 in 0 : vector<1x128xf32>, vector<1x128xf32>, vector<1x128xf32>, vector<1x128xf32> -> vector<4x128xf32>
    %cst_17 = arith.constant 0.000000e+00 : f32
    %47 = vector.broadcast %cst_17 : f32 to vector<4x1xf32>
    %48 = vector.extract_strided_slice %46 {offsets = [0, 0], sizes = [4, 127], strides = [1, 1]} : vector<4x128xf32> to vector<4x127xf32>
    %49 = tpu.concatenate %47, %48 in 1 : vector<4x1xf32>, vector<4x127xf32> -> vector<4x128xf32>
    %50 = arith.addf %46, %49 : vector<4x128xf32>
    %cst_18 = arith.constant 0.000000e+00 : f32
    %51 = vector.broadcast %cst_18 : f32 to vector<4x2xf32>
    %52 = vector.extract_strided_slice %50 {offsets = [0, 0], sizes = [4, 126], strides = [1, 1]} : vector<4x128xf32> to vector<4x126xf32>
    %53 = tpu.concatenate %51, %52 in 1 : vector<4x2xf32>, vector<4x126xf32> -> vector<4x128xf32>
    %54 = arith.addf %50, %53 : vector<4x128xf32>
    %cst_19 = arith.constant 0.000000e+00 : f32
    %55 = vector.broadcast %cst_19 : f32 to vector<4x4xf32>
    %56 = vector.extract_strided_slice %54 {offsets = [0, 0], sizes = [4, 124], strides = [1, 1]} : vector<4x128xf32> to vector<4x124xf32>
    %57 = tpu.concatenate %55, %56 in 1 : vector<4x4xf32>, vector<4x124xf32> -> vector<4x128xf32>
    %58 = arith.addf %54, %57 : vector<4x128xf32>
    %cst_20 = arith.constant 0.000000e+00 : f32
    %59 = vector.broadcast %cst_20 : f32 to vector<4x8xf32>
    %60 = vector.extract_strided_slice %58 {offsets = [0, 0], sizes = [4, 120], strides = [1, 1]} : vector<4x128xf32> to vector<4x120xf32>
    %61 = tpu.concatenate %59, %60 in 1 : vector<4x8xf32>, vector<4x120xf32> -> vector<4x128xf32>
    %62 = arith.addf %58, %61 : vector<4x128xf32>
    %cst_21 = arith.constant 0.000000e+00 : f32
    %63 = vector.broadcast %cst_21 : f32 to vector<4x16xf32>
    %64 = vector.extract_strided_slice %62 {offsets = [0, 0], sizes = [4, 112], strides = [1, 1]} : vector<4x128xf32> to vector<4x112xf32>
    %65 = tpu.concatenate %63, %64 in 1 : vector<4x16xf32>, vector<4x112xf32> -> vector<4x128xf32>
    %66 = arith.addf %62, %65 : vector<4x128xf32>
    %cst_22 = arith.constant 0.000000e+00 : f32
    %67 = vector.broadcast %cst_22 : f32 to vector<4x32xf32>
    %68 = vector.extract_strided_slice %66 {offsets = [0, 0], sizes = [4, 96], strides = [1, 1]} : vector<4x128xf32> to vector<4x96xf32>
    %69 = tpu.concatenate %67, %68 in 1 : vector<4x32xf32>, vector<4x96xf32> -> vector<4x128xf32>
    %70 = arith.addf %66, %69 : vector<4x128xf32>
    %cst_23 = arith.constant 0.000000e+00 : f32
    %71 = vector.broadcast %cst_23 : f32 to vector<4x64xf32>
    %72 = vector.extract_strided_slice %70 {offsets = [0, 0], sizes = [4, 64], strides = [1, 1]} : vector<4x128xf32> to vector<4x64xf32>
    %73 = tpu.concatenate %71, %72 in 1 : vector<4x64xf32>, vector<4x64xf32> -> vector<4x128xf32>
    %74 = arith.addf %70, %73 : vector<4x128xf32>
    %75 = vector.extract_strided_slice %74 {offsets = [0, 0], sizes = [1, 128], strides = [1, 1]} : vector<4x128xf32> to vector<1x128xf32>
    %76 = vector.extract_strided_slice %74 {offsets = [1, 0], sizes = [1, 128], strides = [1, 1]} : vector<4x128xf32> to vector<1x128xf32>
    %77 = arith.mulf %75, %7 : vector<1x128xf32>
    %cst_24 = arith.constant 2.000000e+00 : f32
    %78 = vector.broadcast %cst_24 : f32 to vector<1x128xf32>
    %79 = arith.mulf %78, %77 : vector<1x128xf32>
    %80 = arith.mulf %79, %75 : vector<1x128xf32>
    %81 = arith.subf %76, %80 : vector<1x128xf32>
    %82 = arith.mulf %81, %7 : vector<1x128xf32>
    %83 = arith.mulf %77, %77 : vector<1x128xf32>
    %84 = arith.addf %82, %83 : vector<1x128xf32>
    %85 = vector.broadcast %77 : vector<1x128xf32> to vector<16x128xf32>
    %86 = arith.subf %30, %85 : vector<16x128xf32>
    %cst_25 = arith.constant 9.99999974E-6 : f32
    %87 = vector.broadcast %cst_25 : f32 to vector<1x128xf32>
    %88 = arith.addf %84, %87 : vector<1x128xf32>
    %89 = math.rsqrt %88 : vector<1x128xf32>
    %90 = vector.broadcast %89 : vector<1x128xf32> to vector<16x128xf32>
    %91 = arith.mulf %86, %90 : vector<16x128xf32>
    %92 = vector.broadcast %18 : vector<16x1xf32> to vector<16x128xf32>
    %93 = arith.mulf %91, %92 : vector<16x128xf32>
    %94 = vector.broadcast %19 : vector<16x1xf32> to vector<16x128xf32>
    %95 = arith.addf %93, %94 : vector<16x128xf32>
    %96 = vector.extract_strided_slice %74 {offsets = [2, 0], sizes = [1, 128], strides = [1, 1]} : vector<4x128xf32> to vector<1x128xf32>
    %97 = vector.extract_strided_slice %74 {offsets = [3, 0], sizes = [1, 128], strides = [1, 1]} : vector<4x128xf32> to vector<1x128xf32>
    %98 = arith.mulf %96, %7 : vector<1x128xf32>
    %cst_26 = arith.constant 2.000000e+00 : f32
    %99 = vector.broadcast %cst_26 : f32 to vector<1x128xf32>
    %100 = arith.mulf %99, %98 : vector<1x128xf32>
    %101 = arith.mulf %100, %96 : vector<1x128xf32>
    %102 = arith.subf %97, %101 : vector<1x128xf32>
    %103 = arith.mulf %102, %7 : vector<1x128xf32>
    %104 = arith.mulf %98, %98 : vector<1x128xf32>
    %105 = arith.addf %103, %104 : vector<1x128xf32>
    %106 = vector.broadcast %98 : vector<1x128xf32> to vector<16x128xf32>
    %107 = arith.subf %35, %106 : vector<16x128xf32>
    %cst_27 = arith.constant 9.99999974E-6 : f32
    %108 = vector.broadcast %cst_27 : f32 to vector<1x128xf32>
    %109 = arith.addf %105, %108 : vector<1x128xf32>
    %110 = math.rsqrt %109 : vector<1x128xf32>
    %111 = vector.broadcast %110 : vector<1x128xf32> to vector<16x128xf32>
    %112 = arith.mulf %107, %111 : vector<16x128xf32>
    %113 = vector.broadcast %21 : vector<16x1xf32> to vector<16x128xf32>
    %114 = arith.mulf %112, %113 : vector<16x128xf32>
    %115 = vector.broadcast %22 : vector<16x1xf32> to vector<16x128xf32>
    %116 = arith.addf %114, %115 : vector<16x128xf32>
    %117 = tpu.concatenate %95, %116 in 0 : vector<16x128xf32>, vector<16x128xf32> -> vector<32x128xf32>
    %c4_i32 = arith.constant 4 : i32
    %c0_i32_28 = arith.constant 0 : i32
    %118 = arith.cmpi eq, %c4_i32, %c0_i32_28 : i32
    %c1_i32 = arith.constant 1 : i32
    %119 = arith.select %118, %c1_i32, %c4_i32 : i32
    %120 = arith.remsi %arg1, %119 : i32
    %c0_i32_29 = arith.constant 0 : i32
    %121 = arith.cmpi ne, %120, %c0_i32_29 : i32
    %c0_i32_30 = arith.constant 0 : i32
    %122 = arith.cmpi slt, %120, %c0_i32_30 : i32
    %c0_i32_31 = arith.constant 0 : i32
    %123 = arith.cmpi slt, %119, %c0_i32_31 : i32
    %124 = arith.xori %122, %123 : i1
    %125 = arith.andi %124, %121 : i1
    %126 = arith.addi %120, %119 : i32
    %127 = arith.select %125, %126, %120 : i32
    %c0_i32_32 = arith.constant 0 : i32
    %128 = arith.cmpi eq, %127, %c0_i32_32 : i32
    %129 = arith.extui %128 : i1 to i32
    %c0_i32_33 = arith.constant 0 : i32
    %130 = arith.cmpi ne, %129, %c0_i32_33 : i32
    scf.if %130 {
      %cst_82 = arith.constant 0.000000e+00 : f32
      %250 = vector.broadcast %cst_82 : f32 to vector<32x2xf32>
      %251 = vector.extract_strided_slice %117 {offsets = [0, 0], sizes = [32, 126], strides = [1, 1]} : vector<32x128xf32> to vector<32x126xf32>
      %252 = tpu.concatenate %250, %251 in 1 : vector<32x2xf32>, vector<32x126xf32> -> vector<32x128xf32>
      %cst_83 = arith.constant 0.000000e+00 : f32
      %253 = vector.broadcast %cst_83 : f32 to vector<32x1xf32>
      %254 = vector.extract_strided_slice %117 {offsets = [0, 0], sizes = [32, 127], strides = [1, 1]} : vector<32x128xf32> to vector<32x127xf32>
      %255 = tpu.concatenate %253, %254 in 1 : vector<32x1xf32>, vector<32x127xf32> -> vector<32x128xf32>
      %256 = tpu.concatenate %252, %255, %117 in 0 : vector<32x128xf32>, vector<32x128xf32>, vector<32x128xf32> -> vector<96x128xf32>
      %c0_84 = arith.constant 0 : index
      %c0_85 = arith.constant 0 : index
      %257 = vector.load %arg17[%c0_84, %c0_85] : memref<96x128xf32, #tpu.memory_space<vmem>>, vector<96x128xf32>
      tpu.vector_store %arg17[%c0_84, %c0_85], %256 {strides = array<i32>} : memref<96x128xf32, #tpu.memory_space<vmem>>, vector<96x128xf32>,
    } else {
    }
    %c4_i32_34 = arith.constant 4 : i32
    %c0_i32_35 = arith.constant 0 : i32
    %131 = arith.cmpi eq, %c4_i32_34, %c0_i32_35 : i32
    %c1_i32_36 = arith.constant 1 : i32
    %132 = arith.select %131, %c1_i32_36, %c4_i32_34 : i32
    %133 = arith.remsi %arg1, %132 : i32
    %c0_i32_37 = arith.constant 0 : i32
    %134 = arith.cmpi ne, %133, %c0_i32_37 : i32
    %c0_i32_38 = arith.constant 0 : i32
    %135 = arith.cmpi slt, %133, %c0_i32_38 : i32
    %c0_i32_39 = arith.constant 0 : i32
    %136 = arith.cmpi slt, %132, %c0_i32_39 : i32
    %137 = arith.xori %135, %136 : i1
    %138 = arith.andi %137, %134 : i1
    %139 = arith.addi %133, %132 : i32
    %140 = arith.select %138, %139, %133 : i32
    %c1_i32_40 = arith.constant 1 : i32
    %141 = arith.cmpi eq, %140, %c1_i32_40 : i32
    %142 = arith.extui %141 : i1 to i32
    %c0_i32_41 = arith.constant 0 : i32
    %143 = arith.cmpi ne, %142, %c0_i32_41 : i32
    scf.if %143 {
      %cst_82 = arith.constant 0.000000e+00 : f32
      %250 = vector.broadcast %cst_82 : f32 to vector<32x4xf32>
      %251 = vector.extract_strided_slice %117 {offsets = [0, 0], sizes = [32, 124], strides = [1, 1]} : vector<32x128xf32> to vector<32x124xf32>
      %252 = tpu.concatenate %250, %251 in 1 : vector<32x4xf32>, vector<32x124xf32> -> vector<32x128xf32>
      %cst_83 = arith.constant 0.000000e+00 : f32
      %253 = vector.broadcast %cst_83 : f32 to vector<32x2xf32>
      %254 = vector.extract_strided_slice %117 {offsets = [0, 0], sizes = [32, 126], strides = [1, 1]} : vector<32x128xf32> to vector<32x126xf32>
      %255 = tpu.concatenate %253, %254 in 1 : vector<32x2xf32>, vector<32x126xf32> -> vector<32x128xf32>
      %256 = tpu.concatenate %252, %255, %117 in 0 : vector<32x128xf32>, vector<32x128xf32>, vector<32x128xf32> -> vector<96x128xf32>
      %c0_84 = arith.constant 0 : index
      %c0_85 = arith.constant 0 : index
      %257 = vector.load %arg17[%c0_84, %c0_85] : memref<96x128xf32, #tpu.memory_space<vmem>>, vector<96x128xf32>
      tpu.vector_store %arg17[%c0_84, %c0_85], %256 {strides = array<i32>} : memref<96x128xf32, #tpu.memory_space<vmem>>, vector<96x128xf32>,
    } else {
    }
    %c4_i32_42 = arith.constant 4 : i32
    %c0_i32_43 = arith.constant 0 : i32
    %144 = arith.cmpi eq, %c4_i32_42, %c0_i32_43 : i32
    %c1_i32_44 = arith.constant 1 : i32
    %145 = arith.select %144, %c1_i32_44, %c4_i32_42 : i32
    %146 = arith.remsi %arg1, %145 : i32
    %c0_i32_45 = arith.constant 0 : i32
    %147 = arith.cmpi ne, %146, %c0_i32_45 : i32
    %c0_i32_46 = arith.constant 0 : i32
    %148 = arith.cmpi slt, %146, %c0_i32_46 : i32
    %c0_i32_47 = arith.constant 0 : i32
    %149 = arith.cmpi slt, %145, %c0_i32_47 : i32
    %150 = arith.xori %148, %149 : i1
    %151 = arith.andi %150, %147 : i1
    %152 = arith.addi %146, %145 : i32
    %153 = arith.select %151, %152, %146 : i32
    %c2_i32 = arith.constant 2 : i32
    %154 = arith.cmpi eq, %153, %c2_i32 : i32
    %155 = arith.extui %154 : i1 to i32
    %c0_i32_48 = arith.constant 0 : i32
    %156 = arith.cmpi ne, %155, %c0_i32_48 : i32
    scf.if %156 {
      %cst_82 = arith.constant 0.000000e+00 : f32
      %250 = vector.broadcast %cst_82 : f32 to vector<32x10xf32>
      %251 = vector.extract_strided_slice %117 {offsets = [0, 0], sizes = [32, 118], strides = [1, 1]} : vector<32x128xf32> to vector<32x118xf32>
      %252 = tpu.concatenate %250, %251 in 1 : vector<32x10xf32>, vector<32x118xf32> -> vector<32x128xf32>
      %cst_83 = arith.constant 0.000000e+00 : f32
      %253 = vector.broadcast %cst_83 : f32 to vector<32x5xf32>
      %254 = vector.extract_strided_slice %117 {offsets = [0, 0], sizes = [32, 123], strides = [1, 1]} : vector<32x128xf32> to vector<32x123xf32>
      %255 = tpu.concatenate %253, %254 in 1 : vector<32x5xf32>, vector<32x123xf32> -> vector<32x128xf32>
      %256 = tpu.concatenate %252, %255, %117 in 0 : vector<32x128xf32>, vector<32x128xf32>, vector<32x128xf32> -> vector<96x128xf32>
      %c0_84 = arith.constant 0 : index
      %c0_85 = arith.constant 0 : index
      %257 = vector.load %arg17[%c0_84, %c0_85] : memref<96x128xf32, #tpu.memory_space<vmem>>, vector<96x128xf32>
      tpu.vector_store %arg17[%c0_84, %c0_85], %256 {strides = array<i32>} : memref<96x128xf32, #tpu.memory_space<vmem>>, vector<96x128xf32>,
    } else {
    }
    %c4_i32_49 = arith.constant 4 : i32
    %c0_i32_50 = arith.constant 0 : i32
    %157 = arith.cmpi eq, %c4_i32_49, %c0_i32_50 : i32
    %c1_i32_51 = arith.constant 1 : i32
    %158 = arith.select %157, %c1_i32_51, %c4_i32_49 : i32
    %159 = arith.remsi %arg1, %158 : i32
    %c0_i32_52 = arith.constant 0 : i32
    %160 = arith.cmpi ne, %159, %c0_i32_52 : i32
    %c0_i32_53 = arith.constant 0 : i32
    %161 = arith.cmpi slt, %159, %c0_i32_53 : i32
    %c0_i32_54 = arith.constant 0 : i32
    %162 = arith.cmpi slt, %158, %c0_i32_54 : i32
    %163 = arith.xori %161, %162 : i1
    %164 = arith.andi %163, %160 : i1
    %165 = arith.addi %159, %158 : i32
    %166 = arith.select %164, %165, %159 : i32
    %c3_i32 = arith.constant 3 : i32
    %167 = arith.cmpi eq, %166, %c3_i32 : i32
    %168 = arith.extui %167 : i1 to i32
    %c0_i32_55 = arith.constant 0 : i32
    %169 = arith.cmpi ne, %168, %c0_i32_55 : i32
    scf.if %169 {
      %cst_82 = arith.constant 0.000000e+00 : f32
      %250 = vector.broadcast %cst_82 : f32 to vector<32x18xf32>
      %251 = vector.extract_strided_slice %117 {offsets = [0, 0], sizes = [32, 110], strides = [1, 1]} : vector<32x128xf32> to vector<32x110xf32>
      %252 = tpu.concatenate %250, %251 in 1 : vector<32x18xf32>, vector<32x110xf32> -> vector<32x128xf32>
      %cst_83 = arith.constant 0.000000e+00 : f32
      %253 = vector.broadcast %cst_83 : f32 to vector<32x9xf32>
      %254 = vector.extract_strided_slice %117 {offsets = [0, 0], sizes = [32, 119], strides = [1, 1]} : vector<32x128xf32> to vector<32x119xf32>
      %255 = tpu.concatenate %253, %254 in 1 : vector<32x9xf32>, vector<32x119xf32> -> vector<32x128xf32>
      %256 = tpu.concatenate %252, %255, %117 in 0 : vector<32x128xf32>, vector<32x128xf32>, vector<32x128xf32> -> vector<96x128xf32>
      %c0_84 = arith.constant 0 : index
      %c0_85 = arith.constant 0 : index
      %257 = vector.load %arg17[%c0_84, %c0_85] : memref<96x128xf32, #tpu.memory_space<vmem>>, vector<96x128xf32>
      tpu.vector_store %arg17[%c0_84, %c0_85], %256 {strides = array<i32>} : memref<96x128xf32, #tpu.memory_space<vmem>>, vector<96x128xf32>,
    } else {
    }
    %c0_56 = arith.constant 0 : index
    %c0_57 = arith.constant 0 : index
    %c0_58 = arith.constant 0 : index
    %170 = vector.load %arg8[%c0_56, %c0_57, %c0_58] : memref<1x32x96xf32, #tpu.memory_space<vmem>>, vector<1x32x96xf32>
    %171 = vector.shape_cast %170 : vector<1x32x96xf32> to vector<32x96xf32>
    %c0_59 = arith.constant 0 : index
    %c0_60 = arith.constant 0 : index
    %172 = vector.load %arg17[%c0_59, %c0_60] : memref<96x128xf32, #tpu.memory_space<vmem>>, vector<96x128xf32>
    %cst_61 = arith.constant dense<0.000000e+00> : vector<32x128xf32>
    %173 = tpu.matmul %171, %172, %cst_61 {dimension_numbers = #tpu.dot_dimension_numbers<[1], [0], [0], [1], [0, 0, 1, 1], [], []>} : vector<32x96xf32>, vector<96x128xf32>, vector<32x128xf32> -> vector<32x128xf32>
    %174 = vector.extract_strided_slice %173 {offsets = [0, 0], sizes = [16, 128], strides = [1, 1]} : vector<32x128xf32> to vector<16x128xf32>
    %175 = vector.extract_strided_slice %173 {offsets = [16, 0], sizes = [16, 128], strides = [1, 1]} : vector<32x128xf32> to vector<16x128xf32>
    %176 = arith.negf %175 : vector<16x128xf32>
    %177 = math.exp %176 : vector<16x128xf32>
    %cst_62 = arith.constant 1.000000e+00 : f32
    %178 = vector.broadcast %cst_62 : f32 to vector<16x128xf32>
    %179 = arith.addf %178, %177 : vector<16x128xf32>
    %180 = arith.divf %178, %179 : vector<16x128xf32>
    %181 = arith.mulf %174, %180 : vector<16x128xf32>
    %cst_63 = arith.constant 0.000000e+00 : f32
    %182 = vector.broadcast %cst_63 : f32 to vector<16x128xf32>
    %183 = arith.cmpf oge, %181, %182 : vector<16x128xf32>
    %184 = vector.broadcast %23 : vector<16x1xf32> to vector<16x128xf32>
    %185 = arith.mulf %184, %181 : vector<16x128xf32>
    %186 = arith.select %183, %181, %185 : vector<16x128xi1>, vector<16x128xf32>
    %cst_64 = arith.constant dense<0.000000e+00> : vector<128xf32>
    %187 = vector.multi_reduction <add>, %186, %cst_64 [0] : vector<16x128xf32> to vector<128xf32>
    %188 = vector.shape_cast %187 : vector<128xf32> to vector<1x128xf32>
    %189 = arith.mulf %186, %186 : vector<16x128xf32>
    %cst_65 = arith.constant dense<0.000000e+00> : vector<128xf32>
    %190 = vector.multi_reduction <add>, %189, %cst_65 [0] : vector<16x128xf32> to vector<128xf32>
    %191 = vector.shape_cast %190 : vector<128xf32> to vector<1x128xf32>
    %192 = tpu.concatenate %188, %191 in 0 : vector<1x128xf32>, vector<1x128xf32> -> vector<2x128xf32>
    %cst_66 = arith.constant 0.000000e+00 : f32
    %193 = vector.broadcast %cst_66 : f32 to vector<2x1xf32>
    %194 = vector.extract_strided_slice %192 {offsets = [0, 0], sizes = [2, 127], strides = [1, 1]} : vector<2x128xf32> to vector<2x127xf32>
    %195 = tpu.concatenate %193, %194 in 1 : vector<2x1xf32>, vector<2x127xf32> -> vector<2x128xf32>
    %196 = arith.addf %192, %195 : vector<2x128xf32>
    %cst_67 = arith.constant 0.000000e+00 : f32
    %197 = vector.broadcast %cst_67 : f32 to vector<2x2xf32>
    %198 = vector.extract_strided_slice %196 {offsets = [0, 0], sizes = [2, 126], strides = [1, 1]} : vector<2x128xf32> to vector<2x126xf32>
    %199 = tpu.concatenate %197, %198 in 1 : vector<2x2xf32>, vector<2x126xf32> -> vector<2x128xf32>
    %200 = arith.addf %196, %199 : vector<2x128xf32>
    %cst_68 = arith.constant 0.000000e+00 : f32
    %201 = vector.broadcast %cst_68 : f32 to vector<2x4xf32>
    %202 = vector.extract_strided_slice %200 {offsets = [0, 0], sizes = [2, 124], strides = [1, 1]} : vector<2x128xf32> to vector<2x124xf32>
    %203 = tpu.concatenate %201, %202 in 1 : vector<2x4xf32>, vector<2x124xf32> -> vector<2x128xf32>
    %204 = arith.addf %200, %203 : vector<2x128xf32>
    %cst_69 = arith.constant 0.000000e+00 : f32
    %205 = vector.broadcast %cst_69 : f32 to vector<2x8xf32>
    %206 = vector.extract_strided_slice %204 {offsets = [0, 0], sizes = [2, 120], strides = [1, 1]} : vector<2x128xf32> to vector<2x120xf32>
    %207 = tpu.concatenate %205, %206 in 1 : vector<2x8xf32>, vector<2x120xf32> -> vector<2x128xf32>
    %208 = arith.addf %204, %207 : vector<2x128xf32>
    %cst_70 = arith.constant 0.000000e+00 : f32
    %209 = vector.broadcast %cst_70 : f32 to vector<2x16xf32>
    %210 = vector.extract_strided_slice %208 {offsets = [0, 0], sizes = [2, 112], strides = [1, 1]} : vector<2x128xf32> to vector<2x112xf32>
    %211 = tpu.concatenate %209, %210 in 1 : vector<2x16xf32>, vector<2x112xf32> -> vector<2x128xf32>
    %212 = arith.addf %208, %211 : vector<2x128xf32>
    %cst_71 = arith.constant 0.000000e+00 : f32
    %213 = vector.broadcast %cst_71 : f32 to vector<2x32xf32>
    %214 = vector.extract_strided_slice %212 {offsets = [0, 0], sizes = [2, 96], strides = [1, 1]} : vector<2x128xf32> to vector<2x96xf32>
    %215 = tpu.concatenate %213, %214 in 1 : vector<2x32xf32>, vector<2x96xf32> -> vector<2x128xf32>
    %216 = arith.addf %212, %215 : vector<2x128xf32>
    %cst_72 = arith.constant 0.000000e+00 : f32
    %217 = vector.broadcast %cst_72 : f32 to vector<2x64xf32>
    %218 = vector.extract_strided_slice %216 {offsets = [0, 0], sizes = [2, 64], strides = [1, 1]} : vector<2x128xf32> to vector<2x64xf32>
    %219 = tpu.concatenate %217, %218 in 1 : vector<2x64xf32>, vector<2x64xf32> -> vector<2x128xf32>
    %220 = arith.addf %216, %219 : vector<2x128xf32>
    %221 = vector.extract_strided_slice %220 {offsets = [0, 0], sizes = [1, 128], strides = [1, 1]} : vector<2x128xf32> to vector<1x128xf32>
    %222 = vector.extract_strided_slice %220 {offsets = [1, 0], sizes = [1, 128], strides = [1, 1]} : vector<2x128xf32> to vector<1x128xf32>
    %223 = arith.mulf %221, %7 : vector<1x128xf32>
    %cst_73 = arith.constant 2.000000e+00 : f32
    %224 = vector.broadcast %cst_73 : f32 to vector<1x128xf32>
    %225 = arith.mulf %224, %223 : vector<1x128xf32>
    %226 = arith.mulf %225, %221 : vector<1x128xf32>
    %227 = arith.subf %222, %226 : vector<1x128xf32>
    %228 = arith.mulf %227, %7 : vector<1x128xf32>
    %229 = arith.mulf %223, %223 : vector<1x128xf32>
    %230 = arith.addf %228, %229 : vector<1x128xf32>
    %231 = vector.broadcast %223 : vector<1x128xf32> to vector<16x128xf32>
    %232 = arith.subf %186, %231 : vector<16x128xf32>
    %cst_74 = arith.constant 9.99999974E-6 : f32
    %233 = vector.broadcast %cst_74 : f32 to vector<1x128xf32>
    %234 = arith.addf %230, %233 : vector<1x128xf32>
    %235 = math.rsqrt %234 : vector<1x128xf32>
    %236 = vector.broadcast %235 : vector<1x128xf32> to vector<16x128xf32>
    %237 = arith.mulf %232, %236 : vector<16x128xf32>
    %238 = vector.broadcast %24 : vector<16x1xf32> to vector<16x128xf32>
    %239 = arith.mulf %237, %238 : vector<16x128xf32>
    %240 = vector.broadcast %25 : vector<16x1xf32> to vector<16x128xf32>
    %241 = arith.addf %239, %240 : vector<16x128xf32>
    %c0_75 = arith.constant 0 : index
    %c0_76 = arith.constant 0 : index
    %c0_77 = arith.constant 0 : index
    %242 = vector.load %arg9[%c0_75, %c0_76, %c0_77] : memref<1x64x16xf32, #tpu.memory_space<vmem>>, vector<1x64x16xf32>
    %243 = vector.shape_cast %242 : vector<1x64x16xf32> to vector<64x16xf32>
    %cst_78 = arith.constant dense<0.000000e+00> : vector<64x128xf32>
    %244 = tpu.matmul %243, %241, %cst_78 {dimension_numbers = #tpu.dot_dimension_numbers<[1], [0], [0], [1], [0, 0, 1, 1], [], []>} : vector<64x16xf32>, vector<16x128xf32>, vector<64x128xf32> -> vector<64x128xf32>
    %245 = arith.addf %11, %244 : vector<64x128xf32>
    %c0_79 = arith.constant 0 : index
    %c0_80 = arith.constant 0 : index
    %246 = vector.load %arg16[%c0_79, %c0_80] : memref<64x128xf32, #tpu.memory_space<vmem>>, vector<64x128xf32>
    tpu.vector_store %arg16[%c0_79, %c0_80], %245 {strides = array<i32>} : memref<64x128xf32, #tpu.memory_space<vmem>>, vector<64x128xf32>,
    %c7_i32 = arith.constant 7 : i32
    %247 = arith.cmpi eq, %arg1, %c7_i32 : i32
    %248 = arith.extui %247 : i1 to i32
    %c0_i32_81 = arith.constant 0 : i32
    %249 = arith.cmpi ne, %248, %c0_i32_81 : i32
    scf.if %249 {
      %c0_82 = arith.constant 0 : index
      %c0_83 = arith.constant 0 : index
      %250 = vector.load %arg16[%c0_82, %c0_83] : memref<64x128xf32, #tpu.memory_space<vmem>>, vector<64x128xf32>
      %c0_84 = arith.constant 0 : index
      %c0_85 = arith.constant 0 : index
      %251 = vector.load %arg11[%c0_84, %c0_85] : memref<17x64xf32, #tpu.memory_space<vmem>>, vector<17x64xf32>
      %cst_86 = arith.constant dense<0.000000e+00> : vector<17x128xf32>
      %252 = tpu.matmul %251, %250, %cst_86 {dimension_numbers = #tpu.dot_dimension_numbers<[1], [0], [0], [1], [0, 0, 1, 1], [], []>} : vector<17x64xf32>, vector<64x128xf32>, vector<17x128xf32> -> vector<17x128xf32>
      %c0_87 = arith.constant 0 : index
      %c0_88 = arith.constant 0 : index
      %253 = vector.load %arg12[%c0_87, %c0_88] : memref<17x1xf32, #tpu.memory_space<vmem>>, vector<17x1xf32>
      %254 = vector.broadcast %253 : vector<17x1xf32> to vector<17x128xf32>
      %255 = arith.addf %252, %254 : vector<17x128xf32>
      %c0_89 = arith.constant 0 : index
      %c0_90 = arith.constant 0 : index
      %c0_91 = arith.constant 0 : index
      %c0_92 = arith.constant 0 : index
      %256 = vector.load %arg15[%c0_89, %c0_90, %c0_91, %c0_92] : memref<1x2x17x128xf32, #tpu.memory_space<vmem>>, vector<1x1x17x128xf32>
      %257 = vector.shape_cast %256 : vector<1x1x17x128xf32> to vector<17x128xf32>
      %258 = vector.shape_cast %255 : vector<17x128xf32> to vector<1x1x17x128xf32>
      tpu.vector_store %arg15[%c0_89, %c0_90, %c0_91, %c0_92], %258 {strides = array<i32>} : memref<1x2x17x128xf32, #tpu.memory_space<vmem>>, vector<1x1x17x128xf32>,
      %c0_93 = arith.constant 0 : index
      %c0_94 = arith.constant 0 : index
      %259 = vector.load %arg13[%c0_93, %c0_94] : memref<17x64xf32, #tpu.memory_space<vmem>>, vector<17x64xf32>
      %cst_95 = arith.constant dense<0.000000e+00> : vector<17x128xf32>
      %260 = tpu.matmul %259, %250, %cst_95 {dimension_numbers = #tpu.dot_dimension_numbers<[1], [0], [0], [1], [0, 0, 1, 1], [], []>} : vector<17x64xf32>, vector<64x128xf32>, vector<17x128xf32> -> vector<17x128xf32>
      %c0_96 = arith.constant 0 : index
      %c0_97 = arith.constant 0 : index
      %261 = vector.load %arg14[%c0_96, %c0_97] : memref<17x1xf32, #tpu.memory_space<vmem>>, vector<17x1xf32>
      %262 = vector.broadcast %261 : vector<17x1xf32> to vector<17x128xf32>
      %263 = arith.addf %260, %262 : vector<17x128xf32>
      %c0_98 = arith.constant 0 : index
      %c1 = arith.constant 1 : index
      %c0_99 = arith.constant 0 : index
      %c0_100 = arith.constant 0 : index
      %264 = vector.load %arg15[%c0_98, %c1, %c0_99, %c0_100] : memref<1x2x17x128xf32, #tpu.memory_space<vmem>>, vector<1x1x17x128xf32>
      %265 = vector.shape_cast %264 : vector<1x1x17x128xf32> to vector<17x128xf32>
      %266 = vector.shape_cast %263 : vector<17x128xf32> to vector<1x1x17x128xf32>
      tpu.vector_store %arg15[%c0_98, %c1, %c0_99, %c0_100], %266 {strides = array<i32>} : memref<1x2x17x128xf32, #tpu.memory_space<vmem>>, vector<1x1x17x128xf32>,
    } else {
    }
    return
  }
  func.func @transform_0(%arg0: i32, %arg1: i32) -> (i32, i32, i32) {
    %c0_i32 = arith.constant 0 : i32
    %c0_i32_0 = arith.constant 0 : i32
    %c0_i32_1 = arith.constant 0 : i32
    return %arg0, %c0_i32, %c0_i32_0 : i32, i32, i32
  }
  func.func @transform_1(%arg0: i32, %arg1: i32) -> (i32, i32, i32) {
    %c0_i32 = arith.constant 0 : i32
    %c0_i32_0 = arith.constant 0 : i32
    %c0_i32_1 = arith.constant 0 : i32
    return %arg0, %c0_i32, %c0_i32_0 : i32, i32, i32
  }
  func.func @transform_2(%arg0: i32, %arg1: i32) -> (i32, i32) {
    %c0_i32 = arith.constant 0 : i32
    %c0_i32_0 = arith.constant 0 : i32
    %c0_i32_1 = arith.constant 0 : i32
    return %c0_i32, %c0_i32_0 : i32, i32
  }
  func.func @transform_3(%arg0: i32, %arg1: i32) -> (i32, i32) {
    %c0_i32 = arith.constant 0 : i32
    %c0_i32_0 = arith.constant 0 : i32
    %c0_i32_1 = arith.constant 0 : i32
    return %c0_i32, %c0_i32_0 : i32, i32
  }
  func.func @transform_4(%arg0: i32, %arg1: i32) -> (i32, i32) {
    %c0_i32 = arith.constant 0 : i32
    %c0_i32_0 = arith.constant 0 : i32
    %c0_i32_1 = arith.constant 0 : i32
    return %c0_i32, %c0_i32_0 : i32, i32
  }
  func.func @transform_5(%arg0: i32, %arg1: i32) -> (i32, i32, i32) {
    %c0_i32 = arith.constant 0 : i32
    %c0_i32_0 = arith.constant 0 : i32
    %c0_i32_1 = arith.constant 0 : i32
    return %arg1, %c0_i32, %c0_i32_0 : i32, i32, i32
  }
  func.func @transform_6(%arg0: i32, %arg1: i32) -> (i32, i32, i32) {
    %c0_i32 = arith.constant 0 : i32
    %c0_i32_0 = arith.constant 0 : i32
    %c0_i32_1 = arith.constant 0 : i32
    return %arg1, %c0_i32, %c0_i32_0 : i32, i32, i32
  }
  func.func @transform_7(%arg0: i32, %arg1: i32) -> (i32, i32, i32) {
    %c0_i32 = arith.constant 0 : i32
    %c0_i32_0 = arith.constant 0 : i32
    %c0_i32_1 = arith.constant 0 : i32
    return %arg1, %c0_i32, %c0_i32_0 : i32, i32, i32
  }
  func.func @transform_8(%arg0: i32, %arg1: i32) -> (i32, i32, i32) {
    %c0_i32 = arith.constant 0 : i32
    %c0_i32_0 = arith.constant 0 : i32
    %c0_i32_1 = arith.constant 0 : i32
    return %arg1, %c0_i32, %c0_i32_0 : i32, i32, i32
  }
  func.func @transform_9(%arg0: i32, %arg1: i32) -> (i32, i32) {
    %c0_i32 = arith.constant 0 : i32
    %c0_i32_0 = arith.constant 0 : i32
    %c0_i32_1 = arith.constant 0 : i32
    return %c0_i32, %c0_i32_0 : i32, i32
  }
  func.func @transform_10(%arg0: i32, %arg1: i32) -> (i32, i32) {
    %c0_i32 = arith.constant 0 : i32
    %c0_i32_0 = arith.constant 0 : i32
    %c0_i32_1 = arith.constant 0 : i32
    return %c0_i32, %c0_i32_0 : i32, i32
  }
  func.func @transform_11(%arg0: i32, %arg1: i32) -> (i32, i32) {
    %c0_i32 = arith.constant 0 : i32
    %c0_i32_0 = arith.constant 0 : i32
    %c0_i32_1 = arith.constant 0 : i32
    return %c0_i32, %c0_i32_0 : i32, i32
  }
  func.func @transform_12(%arg0: i32, %arg1: i32) -> (i32, i32) {
    %c0_i32 = arith.constant 0 : i32
    %c0_i32_0 = arith.constant 0 : i32
    %c0_i32_1 = arith.constant 0 : i32
    return %c0_i32, %c0_i32_0 : i32, i32
  }
  func.func @transform_13(%arg0: i32, %arg1: i32) -> (i32, i32, i32, i32) {
    %c0_i32 = arith.constant 0 : i32
    %c0_i32_0 = arith.constant 0 : i32
    %c0_i32_1 = arith.constant 0 : i32
    %c0_i32_2 = arith.constant 0 : i32
    return %arg0, %c0_i32, %c0_i32_0, %c0_i32_1 : i32, i32, i32, i32
  }
}

</mosaic_0001>

<bundles_post_ra>
// kernel: tpu_custom_call.1
= control target key start
LH: loop header
LB: loop body
LE: loop exit
PB: predicated region body
PF: predicated region fallthrough
CT: control target
= control target key end

     0   :  { %6 = vsyncpa [#allocation3], 0  ;;  %s128_s0 = inlined_call_operand.hbm [shape: f32[8,128], index: 0, kind: input, shape index: {}]   ;;  %s129_s1 = inlined_call_operand.hbm [shape: f32[8,128], index: 1, kind: output, shape index: {}]  }
   0x1   :  { %7 = vsyncpa [#allocation4], 0  ;;  %s91_s6 = smov [#allocation2]   ;;  %s43_s10 = scalar_lea.hbm %s128_s0, 128 }
   0x2   :  { %s14_s7 = sshll.u32 %s91_s6, 4  ;;  %p44_p0 = scmp.ne.s32.totalorder %s128_s0, %s43_s10  ;;  %s15_s7 = int_to_ptr.vmem [resolvable:$true] %s14_s7 }
   0x3   :  { %p47_p1 = scmp.lt.u32.totalorder %s43_s10, %s128_s0 }
   0x5   :  { %p49_p2 = pnand %p47_p1, %p44_p0 }
   0x7   :  { %52 = shalt.err (!%p49_p2)
}
   0x8   :  { %s53_s15 = scalar_lea.vmem %s15_s7, 128  ;;  %p58_p4 = scmp.lt.s32.totalorder %s15_s7, %s15_s7 }
   0x9   :  { %p54_p3 = scmp.ne.s32.totalorder %s15_s7, %s53_s15  ;;  %p59_p5 = scmp.lt.s32.totalorder %s53_s15, %s53_s15 }
   0xb   :  { %p60_p6 = por %p59_p5, %p58_p4 }
   0xd   :  { %p61_p7 = pnand %p60_p6, %p54_p3 }
   0xf   :  { %64 = shalt.err (!%p61_p7)
}
  0x10   :  { %17 = dma.hbm_to_vmem [thread:$0]  %s128_s0, 128, %s15_s7, [#allocation3]  }
  0x11   :  { %87 = dma.done.wait [#allocation3], 128  }
  0x12   :  { %88 = vsyncadd [#allocation3], 4294967168  ;;  %v21_v0 = vld [vmem:[#allocation2] sm:$0xff]  ;;  %s92_s18 = smov 1   ;;  %s93_s19 = smov [#allocation5]  }
  0x13   :  { %22 = vrot.lane.b32.xlu0 %v21_v0, %s92_s18  ;;  %s31_s20 = sshll.u32 %s93_s19, 4  ;;  %s32_s20 = int_to_ptr.vmem [resolvable:$true] %s31_s20 }
  0x14   :  { %s65_s21 = scalar_lea.vmem %s32_s20, 128  ;;  %p70_p9 = scmp.lt.s32.totalorder %s32_s20, %s32_s20 }
  0x15   :  { %p66_p8 = scmp.ne.s32.totalorder %s32_s20, %s65_s21  ;;  %p71_p10 = scmp.lt.s32.totalorder %s65_s21, %s65_s21 }
  0x17   :  { %p72_p11 = por %p71_p10, %p70_p9 }
  0x19   :  { %p73_p12 = pnand %p72_p11, %p66_p8 }
  0x85   :  { %v23_v1 = vpop.permute.xlu0 %22 }
  0x86   :  { %24 = vst [vmem:[#allocation5] sm:$0xff] %v23_v1 }
  0x87   :  { %76 = shalt.err (!%p73_p12)
}
  0x88   :  { %s77_s0 = scalar_lea.hbm %s129_s1, 128 }
  0x89   :  { %p78_p13 = scmp.ne.s32.totalorder %s129_s1, %s77_s0  ;;  %p81_p0 = scmp.lt.u32.totalorder %s77_s0, %s129_s1 }
  0x8b   :  { %p83_p1 = pnand %p81_p0, %p78_p13 }
  0x8d   :  { %86 = shalt.err (!%p83_p1)
}
  0x8e   :  { %34 = dma.vmem_to_hbm [thread:$0]  %s32_s20, 128, %s129_s1, [#allocation4]  }
  0x8f   :  { %89 = dma.done.wait [#allocation4], 128  }
  0x90   :  { %90 = vsyncadd [#allocation4], 4294967168 }
  0x91   :  { %38 = vsyncpa [#allocation3], 1 }
  0x92   :  { %39 = vsyncpa [#allocation4], 1 }

// kernel: tpu_custom_call.1
= control target key start
LH: loop header
LB: loop body
LE: loop exit
PB: predicated region body
PF: predicated region fallthrough
CT: control target
= control target key end

     0   :  { %s4931_s0 = inlined_call_operand.hbm [shape: f32[2,64,128], index: 0, kind: input, shape index: {}]   ;;  %s4932_s1 = inlined_call_operand.hbm [shape: f32[2,34,128], index: 1, kind: input, shape index: {}]   ;;  %s4933_s2 = inlined_call_operand.hbm [shape: f32[64,64], index: 2, kind: input, shape index: {}]   ;;  %s4934_s3 = inlined_call_operand.hbm [shape: f32[64,34], index: 3, kind: input, shape index: {}]   ;;  %s4935_s4 = inlined_call_operand.hbm [shape: f32[64,1], index: 4, kind: input, shape index: {}]   ;;  %s4936_s5 = inlined_call_operand.hbm [shape: f32[8,16,64], index: 5, kind: input, shape index: {}]   ;;  %s4937_s6 = inlined_call_operand.hbm [shape: f32[8,32,96], index: 6, kind: input, shape index: {}]   ;;  %s4938_s7 = inlined_call_operand.hbm [shape: f32[8,64,16], index: 7, kind: input, shape index: {}]   ;;  %s4939_s8 = inlined_call_operand.hbm [shape: f32[8,16,9], index: 8, kind: input, shape index: {}]   ;;  %s4940_s9 = inlined_call_operand.hbm [shape: f32[17,64], index: 9, kind: input, shape index: {}]   ;;  %s4941_s10 = inlined_call_operand.hbm [shape: f32[17,1], index: 10, kind: input, shape index: {}]   ;;  %s4942_s11 = inlined_call_operand.hbm [shape: f32[17,64], index: 11, kind: input, shape index: {}]   ;;  %s4943_s12 = inlined_call_operand.hbm [shape: f32[17,1], index: 12, kind: input, shape index: {}]   ;;  %s4944_s13 = inlined_call_operand.hbm [shape: f32[2,2,17,128], index: 13, kind: output, shape index: {}]  }
   0x1   :  { %4987 = sst [smem:[#allocation50_spill]] %s4931_s0 }
   0x2   :  { %4988 = sst [smem:[#allocation51_spill]] %s4932_s1 }
   0x3   :  { %4989 = sst [smem:[#allocation52_spill]] %s4933_s2 }
   0x4   :  { %4990 = sst [smem:[#allocation53_spill]] %s4934_s3 }
   0x5   :  { %4991 = sst [smem:[#allocation54_spill]] %s4935_s4 }
   0x6   :  { %4992 = sst [smem:[#allocation55_spill]] %s4936_s5 }
   0x7   :  { %4993 = sst [smem:[#allocation56_spill]] %s4937_s6 }
   0x8   :  { %4994 = sst [smem:[#allocation57_spill]] %s4938_s7 }
   0x9   :  { %4995 = sst [smem:[#allocation58_spill]] %s4940_s9 }
   0xa   :  { %4996 = sst [smem:[#allocation59_spill]] %s4941_s10 }
   0xb   :  { %4997 = sst [smem:[#allocation60_spill]] %s4942_s11 }
   0xc   :  { %4998 = sst [smem:[#allocation61_spill]] %s4943_s12 }
   0xd   :  { %4999 = sst [smem:[#allocation62_spill]] %s4944_s13 }
   0xe   :  { %18 = vsyncpa [#allocation5], 0 }
   0xf   :  { %20 = vsyncpa [#allocation5 + $0x1], 0 }
  0x10   :  { %21 = vsyncpa [#allocation8], 0 }
  0x11   :  { %23 = vsyncpa [#allocation8 + $0x1], 0 }
  0x12   :  { %24 = vsyncpa [#allocation11], 0 }
  0x13   :  { %25 = vsyncpa [#allocation14], 0 }
  0x14   :  { %27 = vsyncpa [#allocation14 + $0x1], 0 }
  0x15   :  { %28 = vsyncpa [#allocation17], 0 }
  0x16   :  { %30 = vsyncpa [#allocation17 + $0x1], 0 }
  0x17   :  { %31 = vsyncpa [#allocation20], 0 }
  0x18   :  { %32 = vsyncpa [#allocation23], 0 }
  0x19   :  { %33 = vsyncpa [#allocation6], 0 }
  0x1a   :  { %35 = vsyncpa [#allocation6 + $0x1], 0  ;;  %s3928_s25 = smov 0   ;;  %s3930_s26 = smov 0  }
  0x1b   :  { %s3932_s27 = smov 0   ;;  %s3934_s28 = smov 0  }
  0x1c   :  { %s3936_s29 = smov 0   ;;  %s3938_s30 = smov 0  }
  0x1d   :  { %s3940_s14 = smov 0   ;;  %s3942_s15 = smov 0  }
  0x1e   :  { %s3944_s16 = smov 0   ;;  %s3946_s17 = smov 0  }
  0x1f   :  { %s3948_s18 = smov 0  }
  0x20 LB: > { %5000 = sst [smem:[#allocation35_spill]] %s3774_s26  ;;  %s3984_s19 = sadd.s32 4294967295, %s3810_s18   ;;  %s3810_s18 = sphi %s3948_s18, %s41_s18   ;;  %s3806_s17 = sphi %s3946_s17, %s5092_s17   ;;  %s3802_s16 = sphi %s3944_s16, %s5094_s16   ;;  %s3798_s15 = sphi %s3942_s15, %s5090_s15   ;;  %s3794_s14 = sphi %s3940_s14, %s5093_s14   ;;  %s3790_s30 = sphi %s3938_s30, %s5089_s30   ;;  %s3786_s29 = sphi %s3936_s29, %s5088_s29   ;;  %s3782_s28 = sphi %s3934_s28, %s5087_s28   ;;  %s3778_s27 = sphi %s3932_s27, %s5086_s27   ;;  %s3774_s26 = sphi %s3930_s26, %s5085_s26   ;;  %s3770_s25 = sphi %s3928_s25, %s5084_s25  }
  0x21   : > { %5001 = sst [smem:[#allocation36_spill]] %s3778_s27  ;;  %p2560_p0 = scmp.ge.s32.totalorder %s3810_s18, 1 }
  0x22   : > { %5002 = sst [smem:[#allocation37_spill]] %s3782_s28  ;;  %p4955_p1 = scmp.eq.s32.totalorder %s3984_s19, 0 }
  0x23   : > { %5003 = sst [smem:[#allocation38_spill]] %s3786_s29  ;;  %p387_p2 = scmp.lt.s32.totalorder %s3810_s18, 17 }
  0x24   : > { %5004 = sst [smem:[#allocation39_spill]] %s3790_s30  ;;  %s3812_s21 = smov [#allocation9]  }
  0x25   : > { %5005 = sst [smem:[#allocation40_spill]] %s3794_s14  ;;  %p3989_p3 = pnand %p2560_p0, %p387_p2 }
  0x26   : > { %5006 = sst [smem:[#allocation41_spill]] %s3798_s15  ;;  %s399_s22 = sshll.u32 %s3812_s21, 4  ;;  %s3993_s22 = int_to_ptr.vmem [resolvable:$true] %s399_s22 }
  0x27   : > { %5007 = sst [smem:[#allocation42_spill]] %s3806_s17  ;;  %p3064_p4 = pneg %p3989_p3 }
  0x28   : > { %s5008_s20 = scalar_select %p3989_p3, 1, 0 }
  0x29   : > { %p3999_p5 = pnand %p3064_p4, %p4955_p1  ;;  %s3813_s24 = smov [#allocation10]  }
  0x2a   : > { %5009 = sst [smem:[#allocation43_spill]] %s5008_s20  ;;  %s412_s13 = sshll.u32 %s3813_s24, 4  ;;  %s4003_s13 = int_to_ptr.vmem [resolvable:$true] %s412_s13 }
  0x2b   : > { %s5010_s23 = scalar_select %p3999_p5, 1, 0 }
  0x2c   : > { %s3814_s15 = smov [#allocation19]   ;;  %s5011_s2 = sld [smem:[#allocation52_spill]] }
  0x2d   : > { %s4005_s14 = sshll.u32 %s3814_s15, 4  ;;  %p4015_p7 = pneg %p3999_p5  ;;  %s439_s14 = int_to_ptr.vmem [resolvable:$true] %s4005_s14 }
  0x2f   : > { %s5012_s28 = scalar_select %p4015_p7, 1, 0 }
  0x32   : > { %s3284_s21 = scalar_lea.hbm %s5011_s2, 1024 }
  0x33   : > { %p3285_p6 = scmp.ne.s32.totalorder %s5011_s2, %s3284_s21  ;;  %p3291_p10 = scmp.lt.u32.totalorder %s3284_s21, %s5011_s2 }
  0x35   : > { %p3287_p8 = pnand %p4015_p7, %p3285_p6 }
  0x37   : > { %p3288_p9 = pneg %p3287_p8 }
  0x39   : > { %p3293_p11 = pnand %p3291_p10, %p3288_p9 }
  0x3b   : > { %3296 = shalt.err (!%p3293_p11)
}
  0x3c   : > { %s3297_s0 = scalar_lea.vmem %s3993_s22, 1024  ;;  %p3305_p2 = scmp.lt.s32.totalorder %s3993_s22, %s3993_s22 }
  0x3d   : > { %p3298_p12 = scmp.ne.s32.totalorder %s3993_s22, %s3297_s0  ;;  %p3306_p4 = scmp.lt.s32.totalorder %s3297_s0, %s3297_s0 }
  0x3f   : > { %p3300_p13 = pnand %p3298_p12, %p4015_p7  ;;  %p3307_p6 = por %p3306_p4, %p3305_p2 }
  0x41   : > { %p3301_p0 = pneg %p3300_p13 }
  0x43   : > { %p3308_p8 = pnand %p3307_p6, %p3301_p0 }
  0x45   : > { %3311 = shalt.err (!%p3308_p8)
}
  0x46   : > { %s4957_s1 = smov 128   ;;  %s4959_s6 = smov 8  }
  0x47   : > { %3067 = dma.hbm_to_vmem [thread:$0]  (!%p3999_p5), %s5011_s2, 1024, %s3993_s22, [#allocation8], %s4957_s1, %s4957_s1, %s4959_s6  }
  0x48   : > { %s5013_s3 = sld [smem:[#allocation53_spill]] }
  0x4e   : > { %s3312_s0 = scalar_lea.hbm %s5013_s3, 1024 }
  0x4f   : > { %p3313_p9 = scmp.ne.s32.totalorder %s5013_s3, %s3312_s0  ;;  %p3319_p12 = scmp.lt.u32.totalorder %s3312_s0, %s5013_s3 }
  0x51   : > { %p3315_p10 = pnand %p3313_p9, %p4015_p7 }
  0x53   : > { %p3316_p11 = pneg %p3315_p10 }
  0x55   : > { %p3321_p13 = pnand %p3319_p12, %p3316_p11 }
  0x57   : > { %3324 = shalt.err (!%p3321_p13)
}
  0x58   : > { %s3325_s22 = scalar_lea.vmem %s4003_s13, 1024  ;;  %p3333_p6 = scmp.lt.s32.totalorder %s4003_s13, %s4003_s13 }
  0x59   : > { %p3326_p0 = scmp.ne.s32.totalorder %s4003_s13, %s3325_s22  ;;  %p3334_p8 = scmp.lt.s32.totalorder %s3325_s22, %s3325_s22 }
  0x5b   : > { %p3328_p2 = pnand %p3326_p0, %p4015_p7  ;;  %p3335_p9 = por %p3334_p8, %p3333_p6 }
  0x5d   : > { %p3329_p4 = pneg %p3328_p2 }
  0x5f   : > { %p3336_p10 = pnand %p3335_p9, %p3329_p4 }
  0x61   : > { %3339 = shalt.err (!%p3336_p10)
}
  0x62   : > { %3070 = dma.hbm_to_vmem [thread:$0]  (!%p3999_p5), %s5013_s3, 1024, %s4003_s13, [#allocation11], %s4957_s1, %s4957_s1, %s4959_s6  }
  0x63   : > { %s5014_s9 = sld [smem:[#allocation58_spill]] }
  0x69   : > { %s3340_s20 = scalar_lea.hbm %s5014_s9, 384 }
  0x6a   : > { %p3341_p11 = scmp.ne.s32.totalorder %s5014_s9, %s3340_s20  ;;  %p3347_p0 = scmp.lt.u32.totalorder %s3340_s20, %s5014_s9 }
  0x6c   : > { %p3343_p12 = pnand %p3341_p11, %p4015_p7 }
  0x6e   : > { %p3344_p13 = pneg %p3343_p12 }
  0x70   : > { %p3349_p2 = pnand %p3347_p0, %p3344_p13 }
  0x72   : > { %3352 = shalt.err (!%p3349_p2)
}
  0x73   : > { %s3353_s22 = scalar_lea.vmem %s439_s14, 384  ;;  %p3361_p9 = scmp.lt.s32.totalorder %s439_s14, %s439_s14 }
  0x74   : > { %p3354_p4 = scmp.ne.s32.totalorder %s439_s14, %s3353_s22  ;;  %p3362_p10 = scmp.lt.s32.totalorder %s3353_s22, %s3353_s22 }
  0x76   : > { %p3356_p6 = pnand %p3354_p4, %p4015_p7  ;;  %p3363_p1 = por %p3362_p10, %p3361_p9 }
  0x78   : > { %p3357_p8 = pneg %p3356_p6 }
  0x7a   : > { %p3364_p3 = pnand %p3363_p1, %p3357_p8 }
  0x7c   : > { %3367 = shalt.err (!%p3364_p3)
}
  0x7d   : > { %3076 = dma.hbm_to_vmem [thread:$0]  (!%p3999_p5), %s5014_s9, 384, %s439_s14, [#allocation20], %s4957_s1, %s4957_s1, %s4959_s6  }
  0x7e   : > { %s3817_s29 = smov [#allocation22]   ;;  %s5015_s11 = sld [smem:[#allocation60_spill]] }
  0x7f   : > { %s464_s30 = sshll.u32 %s3817_s29, 4  ;;  %s465_s30 = int_to_ptr.vmem [resolvable:$true] %s464_s30 }
  0x84   : > { %s3368_s21 = scalar_lea.hbm %s5015_s11, 384 }
  0x85   : > { %p3369_p1 = scmp.ne.s32.totalorder %s5015_s11, %s3368_s21  ;;  %p3375_p12 = scmp.lt.u32.totalorder %s3368_s21, %s5015_s11 }
  0x87   : > { %p3371_p3 = pnand %p3369_p1, %p4015_p7 }
  0x89   : > { %p3372_p11 = pneg %p3371_p3 }
  0x8b   : > { %p3377_p13 = pnand %p3375_p12, %p3372_p11 }
  0x8d   : > { %3380 = shalt.err (!%p3377_p13)
}
  0x8e   : > { %s3381_s14 = scalar_lea.vmem %s465_s30, 384  ;;  %p3389_p6 = scmp.lt.s32.totalorder %s465_s30, %s465_s30 }
  0x8f   : > { %p3382_p0 = scmp.ne.s32.totalorder %s465_s30, %s3381_s14  ;;  %p3390_p8 = scmp.lt.s32.totalorder %s3381_s14, %s3381_s14 }
  0x91   : > { %p3384_p2 = pnand %p3382_p0, %p4015_p7  ;;  %p3391_p9 = por %p3390_p8, %p3389_p6 }
  0x93   : > { %p3385_p4 = pneg %p3384_p2 }
  0x95   : > { %p3392_p10 = pnand %p3391_p9, %p3385_p4 }
  0x97   : > { %3395 = shalt.err (!%p3392_p10)
}
  0x98   : > { %3082 = dma.hbm_to_vmem [thread:$0]  (!%p3999_p5), %s5015_s11, 384, %s465_s30, [#allocation23], %s4957_s1, %s4957_s1, %s4959_s6  }
  0x99   : > { %s50_s29 = sadd.s32 1, %s3802_s16  ;;  %p4964_p1 = scmp.eq.s32.totalorder %s3810_s18, 0 }
  0x9a   : > { %p4110_p3 = scmp.ge.s32.totalorder %s50_s29, 8  ;;  %s175_s20 = sadd.s32 1, %s3778_s27 }
  0x9b   : > { %p182_p11 = scmp.ne.s32.totalorder %s3778_s27, %s3774_s26  ;;  %p188_p12 = scmp.ne.s32.totalorder %s3774_s26, %s3770_s25 }
  0x9c   : > { %s5016_s17 = scalar_select %p4110_p3, 1, 0 }
  0x9d   : > { %s5096_s29 = smov (%p4110_p3, %s50_s29), 0  ;;  %p4125_p13 = por %p182_p11, %p4964_p1 }
  0x9e   : > { %5017 = sst [smem:[#allocation44_spill]] %s5096_s29  ;;  %p5019_p0 = scmp.eq.s32.totalorder %s3984_s19, 0 }
  0x9f   : > { %s172_s24 = ssub.s32 %s3802_s16, %s5096_s29  ;;  %p4963_p4 = scmp.lt.s32.totalorder %s3810_s18, 16 }
  0xa0   : > { %p4131_p2 = por %p188_p12, %p5019_p0  ;;  %p173_p6 = scmp.eq.s32.totalorder %s172_s24, 0 }
  0xa1   : > { %s4139_s15 = sand.u32 1, %s3810_s18   ;;  %s4142_s25 = sand.u32 1, %s3778_s27  }
  0xa2   : > { %s5020_s30 = scalar_select %p4131_p2, 1, 0 }
  0xa3   : > { %s4145_s0 = scalar_select %p173_p6, %s3778_s27, %s175_s20  }
  0xa4   : > { %5021 = sst [smem:[#allocation45_spill]] %s5020_s30  ;;  %s4961_s22 = sshll.u32 %s4142_s25, 4 }
  0xa5   : > { %5022 = sst [smem:[#allocation46_spill]] %s4145_s0  ;;  %s2653_s14 = sshll.u32 %s3802_s16, 8 }
  0xa6   : > { %s5023_s5 = sld [smem:[#allocation55_spill]]  ;;  %s537_s24 = scalar_lea.vmem [#allocation13], %s4961_s22 }
  0xa7   : > { %s544_s6 = sshll.u32 %s537_s24, 4  ;;  %p4160_p8 = pnand %p4963_p4, %p4125_p13  ;;  %s4164_s6 = int_to_ptr.vmem [resolvable:$true] %s544_s6 }
  0xa8   : > { %s4169_s12 = scalar_lea.hbm %s4939_s8, %s2653_s14  ;;  %s4974_s3 = scalar_lea.sflag [#allocation14], %s4139_s15 }
  0xa9   : > { %s5024_s2 = scalar_select %p4160_p8, 1, 0 }
  0xaa   : > { %p4176_p10 = pneg %p4160_p8 }
  0xac   : > { %s4152_s1 = scalar_lea.hbm %s5023_s5, %s2653_s14  ;;  %s3401_s11 = scalar_lea.hbm %s5023_s5, 2048 }
  0xad   : > { %s3396_s9 = scalar_lea.hbm %s4152_s1, 256  ;;  %p3402_p13 = scmp.lt.u32.totalorder %s4152_s1, %s5023_s5 }
  0xae   : > { %p3397_p9 = scmp.ne.s32.totalorder %s4152_s1, %s3396_s9  ;;  %p3403_p0 = scmp.lt.u32.totalorder %s3401_s11, %s3396_s9 }
  0xaf   : > { %s5025_s24 = scalar_select %p4176_p10, 1, 0 }
  0xb0   : > { %p3399_p11 = pnand %p4176_p10, %p3397_p9  ;;  %p3404_p6 = por %p3403_p0, %p3402_p13 }
  0xb1   : > { %p3405_p4 = scmp.lt.u32.totalorder %s3396_s9, %s4152_s1 }
  0xb2   : > { %p3400_p12 = pneg %p3399_p11 }
  0xb3   : > { %p3406_p1 = por %p3405_p4, %p3404_p6 }
  0xb5   : > { %p3407_p2 = pnand %p3406_p1, %p3400_p12 }
  0xb7   : > { %3410 = shalt.err (!%p3407_p2)
}
  0xb8   : > { %s3411_s14 = scalar_lea.vmem %s4164_s6, 256  ;;  %s3818_s22 = smov [#allocation13]  }
  0xb9   : > { %p3412_p9 = scmp.ne.s32.totalorder %s4164_s6, %s3411_s14  ;;  %s3416_s13 = sshll.u32 %s3818_s22, 4  ;;  %s3417_s13 = int_to_ptr.vmem [resolvable:$false] %s3416_s13 }
  0xba   : > { %s3418_s29 = scalar_lea.vmem %s3417_s13, 512  ;;  %p3419_p5 = scmp.lt.s32.totalorder %s4164_s6, %s3417_s13 }
  0xbb   : > { %p3414_p11 = pnand %p3412_p9, %p4176_p10  ;;  %p3420_p7 = scmp.lt.s32.totalorder %s3418_s29, %s3411_s14 }
  0xbd   : > { %p3415_p3 = pneg %p3414_p11  ;;  %p3421_p13 = por %p3420_p7, %p3419_p5 }
  0xbf   : > { %p3422_p0 = pnand %p3421_p13, %p3415_p3 }
  0xc1   : > { %3425 = shalt.err (!%p3422_p0)
}
  0xc2   : > { %s5026_s9 = smov 8   ;;  %s5027_s11 = smov 128  }
  0xc3   : > { %3095 = dma.hbm_to_vmem [thread:$0]  (!%p4160_p8), %s4152_s1, 256, %s4164_s6, %s4974_s3, %s5027_s11, %s5027_s11, %s5026_s9  }
  0xc4   : > { %s5028_s21 = sshll.u32 %s4142_s25, 4  ;;  %s2579_s22 = sshll.u32 %s4142_s25, 6 }
  0xc5   : > { %s600_s20 = scalar_lea.vmem [#allocation18], %s5028_s21  ;;  %s2655_s13 = sshll.u32 %s3802_s16, 10 }
  0xc6   : > { %s607_s14 = sshll.u32 %s600_s20, 4  ;;  %s5029_s7 = sld [smem:[#allocation57_spill]]  ;;  %s4206_s14 = int_to_ptr.vmem [resolvable:$true] %s607_s14 }
  0xc7   : > { %s579_s27 = scalar_lea.vmem [#allocation16], %s2579_s22  ;;  %s4980_s1 = scalar_lea.sflag [#allocation17], %s4139_s15 }
  0xc8   : > { %s586_s30 = sshll.u32 %s579_s27, 4  ;;  %s4215_s30 = int_to_ptr.vmem [resolvable:$true] %s586_s30 }
  0xcc   : > { %s4213_s0 = scalar_lea.hbm %s5029_s7, %s2655_s13  ;;  %s3431_s5 = scalar_lea.hbm %s5029_s7, 8192 }
  0xcd   : > { %s3426_s6 = scalar_lea.hbm %s4213_s0, 1024  ;;  %p3432_p3 = scmp.lt.u32.totalorder %s4213_s0, %s5029_s7 }
  0xce   : > { %p3427_p5 = scmp.ne.s32.totalorder %s4213_s0, %s3426_s6  ;;  %p3433_p2 = scmp.lt.u32.totalorder %s3431_s5, %s3426_s6 }
  0xcf   : > { %p3435_p12 = scmp.lt.u32.totalorder %s3426_s6, %s4213_s0 }
  0xd0   : > { %p3429_p7 = pnand %p3427_p5, %p4176_p10  ;;  %p3434_p4 = por %p3433_p2, %p3432_p3 }
  0xd2   : > { %p3430_p1 = pneg %p3429_p7  ;;  %p3436_p6 = por %p3435_p12, %p3434_p4 }
  0xd4   : > { %p3437_p9 = pnand %p3436_p6, %p3430_p1 }
  0xd6   : > { %3440 = shalt.err (!%p3437_p9)
}
  0xd7   : > { %s3441_s27 = scalar_lea.vmem %s4215_s30, 1024  ;;  %s3819_s22 = smov [#allocation16]  }
  0xd8   : > { %p3442_p11 = scmp.ne.s32.totalorder %s4215_s30, %s3441_s27  ;;  %s3446_s21 = sshll.u32 %s3819_s22, 4  ;;  %s3447_s21 = int_to_ptr.vmem [resolvable:$false] %s3446_s21 }
  0xd9   : > { %s3448_s20 = scalar_lea.vmem %s3447_s21, 2048  ;;  %p3449_p5 = scmp.lt.s32.totalorder %s4215_s30, %s3447_s21 }
  0xda   : > { %p3444_p13 = pnand %p3442_p11, %p4176_p10  ;;  %p3450_p7 = scmp.lt.s32.totalorder %s3448_s20, %s3441_s27 }
  0xdc   : > { %p3445_p0 = pneg %p3444_p13  ;;  %p3451_p3 = por %p3450_p7, %p3449_p5 }
  0xde   : > { %p3452_p2 = pnand %p3451_p3, %p3445_p0 }
  0xe0   : > { %3455 = shalt.err (!%p3452_p2)
}
  0xe1   : > { %3101 = dma.hbm_to_vmem [thread:$0]  (!%p4160_p8), %s4213_s0, 1024, %s4215_s30, %s4980_s1, %s5027_s11, %s5027_s11, %s5026_s9  }
  0xe2   : > { %s3820_s6 = smov [#allocation12]   ;;  %s3821_s13 = smov [#allocation21]  }
  0xe3   : > { %s425_s5 = sshll.u32 %s3820_s6, 4  ;;  %s451_s29 = sshll.u32 %s3821_s13, 4  ;;  %s426_s5 = int_to_ptr.vmem [resolvable:$true] %s425_s5  ;;  %s452_s29 = int_to_ptr.vmem [resolvable:$true] %s451_s29 }
  0xe4   : > { %s5030_s4 = sld [smem:[#allocation54_spill]]  ;;  %p5031_p4 = scmp.ne.s32.totalorder %s5012_s28, 0 }
  0xea   : > { %s3456_s21 = scalar_lea.hbm %s5030_s4, 1024 }
  0xeb   : > { %p3457_p1 = scmp.ne.s32.totalorder %s5030_s4, %s3456_s21  ;;  %p3463_p9 = scmp.lt.u32.totalorder %s3456_s21, %s5030_s4 }
  0xed   : > { %p3459_p12 = pnand %p3457_p1, %p5031_p4 }
  0xef   : > { %p3460_p6 = pneg %p3459_p12 }
  0xf1   : > { %p3465_p11 = pnand %p3463_p9, %p3460_p6 }
  0xf3   : > { %3468 = shalt.err (!%p3465_p11)
}
  0xf4   : > { %s3469_s30 = scalar_lea.vmem %s426_s5, 1024  ;;  %p3477_p7 = scmp.lt.s32.totalorder %s426_s5, %s426_s5 }
  0xf5   : > { %p3470_p13 = scmp.ne.s32.totalorder %s426_s5, %s3469_s30  ;;  %p3478_p3 = scmp.lt.s32.totalorder %s3469_s30, %s3469_s30 }
  0xf7   : > { %p3472_p0 = pnand %p3470_p13, %p5031_p4  ;;  %p3479_p2 = por %p3478_p3, %p3477_p7 }
  0xf9   : > { %p3473_p5 = pneg %p3472_p0 }
  0xfb   : > { %p3480_p8 = pnand %p3479_p2, %p3473_p5 }
  0xfd   : > { %3483 = shalt.err (!%p3480_p8)
}
  0xfe   : > { %p5032_p1 = scmp.ne.s32.totalorder %s5010_s23, 0  ;;  %s5033_s10 = sld [smem:[#allocation59_spill]] }
 0x100   : > { %3073 = dma.hbm_to_vmem [thread:$0]  (!%p5032_p1), %s5030_s4, 1024, %s426_s5, [#allocation11], %s5027_s11, %s5027_s11, %s5026_s9  }
 0x104   : > { %s3484_s6 = scalar_lea.hbm %s5033_s10, 384 }
 0x105   : > { %p3485_p12 = scmp.ne.s32.totalorder %s5033_s10, %s3484_s6  ;;  %p3491_p9 = scmp.lt.u32.totalorder %s3484_s6, %s5033_s10 }
 0x107   : > { %p3487_p8 = pnand %p3485_p12, %p5031_p4 }
 0x109   : > { %p3488_p6 = pneg %p3487_p8 }
 0x10b   : > { %p3493_p11 = pnand %p3491_p9, %p3488_p6 }
 0x10d   : > { %3496 = shalt.err (!%p3493_p11)
}
 0x10e   : > { %s3497_s20 = scalar_lea.vmem %s452_s29, 384  ;;  %p3505_p7 = scmp.lt.s32.totalorder %s452_s29, %s452_s29 }
 0x10f   : > { %p3498_p13 = scmp.ne.s32.totalorder %s452_s29, %s3497_s20  ;;  %p3506_p3 = scmp.lt.s32.totalorder %s3497_s20, %s3497_s20 }
 0x111   : > { %p3500_p0 = pnand %p3498_p13, %p5031_p4  ;;  %p3507_p2 = por %p3506_p3, %p3505_p7 }
 0x113   : > { %p3501_p5 = pneg %p3500_p0 }
 0x115   : > { %p3508_p10 = pnand %p3507_p2, %p3501_p5 }
 0x117   : > { %3511 = shalt.err (!%p3508_p10)
}
 0x118   : > { %3079 = dma.hbm_to_vmem [thread:$0]  (!%p5032_p1), %s5033_s10, 384, %s452_s29, [#allocation20], %s5027_s11, %s5027_s11, %s5026_s9  }
 0x119   : > { %s3822_s3 = smov [#allocation24]   ;;  %s5034_s6 = sld [smem:[#allocation61_spill]] }
 0x11a   : > { %s477_s7 = sshll.u32 %s3822_s3, 4  ;;  %s478_s7 = int_to_ptr.vmem [resolvable:$true] %s477_s7 }
 0x11f   : > { %s3512_s13 = scalar_lea.hbm %s5034_s6, 384 }
 0x120   : > { %p3513_p10 = scmp.ne.s32.totalorder %s5034_s6, %s3512_s13  ;;  %p3519_p6 = scmp.lt.u32.totalorder %s3512_s13, %s5034_s6 }
 0x122   : > { %p3515_p12 = pnand %p3513_p10, %p5031_p4 }
 0x124   : > { %p3516_p8 = pneg %p3515_p12 }
 0x126   : > { %p3521_p9 = pnand %p3519_p6, %p3516_p8 }
 0x128   : > { %3524 = shalt.err (!%p3521_p9)
}
 0x129   : > { %s3525_s29 = scalar_lea.vmem %s478_s7, 384  ;;  %p3533_p5 = scmp.lt.s32.totalorder %s478_s7, %s478_s7 }
 0x12a   : > { %p3526_p11 = scmp.ne.s32.totalorder %s478_s7, %s3525_s29  ;;  %p3534_p7 = scmp.lt.s32.totalorder %s3525_s29, %s3525_s29 }
 0x12c   : > { %p3528_p13 = pnand %p3526_p11, %p5031_p4  ;;  %p3535_p3 = por %p3534_p7, %p3533_p5 }
 0x12e   : > { %p3529_p0 = pneg %p3528_p13 }
 0x130   : > { %p3536_p2 = pnand %p3535_p3, %p3529_p0 }
 0x132   : > { %3539 = shalt.err (!%p3536_p2)
}
 0x133   : > { %s5035_s3 = sld [smem:[#allocation42_spill]]  ;;  %s5036_s28 = sld [smem:[#allocation39_spill]] }
 0x134   : > { %s5037_s26 = sld [smem:[#allocation38_spill]]  ;;  %s5038_s0 = sld [smem:[#allocation37_spill]] }
 0x135   : > { %3085 = dma.hbm_to_vmem [thread:$0]  (!%p5032_p1), %s5034_s6, 384, %s478_s7, [#allocation23], %s5027_s11, %s5027_s11, %s5026_s9  }
 0x136   : > { %s2559_s23 = sadd.s32 4294967294, %s3810_s18   ;;  %p5039_p4 = scmp.ne.s32.totalorder %s5016_s17, 0 }
 0x137   : > { %p5040_p6 = scmp.eq.s32.totalorder %s3810_s18, 0  ;;  %p374_p11 = scmp.eq.s32.totalorder %s3984_s19, 15 }
 0x138   : > { %p5043_p1 = scmp.eq.s32.totalorder %s3984_s19, 0  ;;  %p380_p5 = scmp.eq.s32.totalorder %s2559_s23, 15 }
 0x139   : > { %s53_s13 = sadd.s32 1, %s5035_s3  ;;  %s60_s27 = sadd.s32 1, %s5036_s28 }
 0x13a   : > { %s5098_s13 = smov (!%p5039_p4, %s53_s13), %s5035_s3  ;;  %p67_p10 = scmp.ne.s32.totalorder %s5036_s28, %s5037_s26 }
 0x13b   : > { %p55_p12 = scmp.ge.s32.totalorder %s5098_s13, 2  ;;  %p73_p8 = scmp.ne.s32.totalorder %s5037_s26, %s5038_s0 }
 0x13c   : > { %p4319_p9 = por %p5040_p6, %p67_p10  ;;  %p4332_p0 = por %p374_p11, %p67_p10 }
 0x13d   : > { %s5100_s13 = smov (%p55_p12, %s5098_s13), 0  ;;  %p4328_p13 = por %p5043_p1, %p73_p8 }
 0x13e   : > { %5042 = sst [smem:[#allocation47_spill]] %s5100_s13  ;;  %s57_s21 = ssub.s32 %s5035_s3, %s5100_s13 }
 0x13f   : > { %s5044_s17 = scalar_select %p4328_p13, 1, 0 }
 0x140   : > { %s5045_s7 = scalar_select %p4332_p0, 1, 0 }
 0x141   : > { %p58_p7 = scmp.eq.s32.totalorder %s57_s21, 0  ;;  %s4339_s20 = sand.u32 1, %s5036_s28  }
 0x142   : > { %p4341_p3 = por %p380_p5, %p73_p8  ;;  %s2569_s5 = sshll.u32 %s4339_s20, 6 }
 0x143   : > { %s5102_s28 = smov (!%p58_p7, %s5036_s28), %s60_s27  ;;  %s2652_s30 = sshll.u32 %s5035_s3, 10 }
 0x144   : > { %s5046_s29 = scalar_select %p4341_p3, 1, 0 }
 0x145   : > { %5048 = sst [smem:[#allocation49_spill]] %s5102_s28  ;;  %s5049_s1 = sld [smem:[#allocation50_spill]] }
 0x146   : > { %5047 = sst [smem:[#allocation48_spill]] %s5046_s29  ;;  %s495_s23 = scalar_lea.vmem [#allocation4], %s2569_s5 }
 0x147   : > { %s502_s21 = sshll.u32 %s495_s23, 4  ;;  %p5050_p2 = scmp.lt.s32.totalorder %s3810_s18, 16  ;;  %s4363_s21 = int_to_ptr.vmem [resolvable:$true] %s502_s21 }
 0x148   : > { %s492_s26 = scalar_lea.sflag [#allocation5], %s4339_s20 }
 0x149   : > { %p4359_p4 = pnand %p5050_p2, %p4319_p9 }
 0x14b   : > { %s4353_s4 = scalar_lea.hbm %s5049_s1, %s2652_s30  ;;  %p3542_p12 = pneg %p4359_p4 }
 0x14c   : > { %s3540_s30 = scalar_lea.hbm %s4353_s4, 1024  ;;  %s3545_s0 = scalar_lea.hbm %s5049_s1, 2048 }
 0x14d   : > { %p3541_p10 = scmp.ne.s32.totalorder %s4353_s4, %s3540_s30  ;;  %p3546_p9 = scmp.lt.u32.totalorder %s4353_s4, %s5049_s1 }
 0x14e   : > { %p3547_p11 = scmp.lt.u32.totalorder %s3545_s0, %s3540_s30  ;;  %p3549_p5 = scmp.lt.u32.totalorder %s3540_s30, %s4353_s4 }
 0x14f   : > { %p3543_p8 = pnand %p3542_p12, %p3541_p10 }
 0x150   : > { %p3548_p1 = por %p3547_p11, %p3546_p9 }
 0x151   : > { %p3544_p6 = pneg %p3543_p8 }
 0x152   : > { %p3550_p7 = por %p3549_p5, %p3548_p1 }
 0x154   : > { %p3551_p2 = pnand %p3550_p7, %p3544_p6 }
 0x156   : > { %3554 = shalt.err (!%p3551_p2)
}
 0x157   : > { %s3555_s27 = scalar_lea.vmem %s4363_s21, 1024  ;;  %s3823_s22 = smov [#allocation4]  }
 0x158   : > { %p3556_p10 = scmp.ne.s32.totalorder %s4363_s21, %s3555_s27  ;;  %s3560_s5 = sshll.u32 %s3823_s22, 4  ;;  %s3561_s5 = int_to_ptr.vmem [resolvable:$false] %s3560_s5 }
 0x159   : > { %s3562_s10 = scalar_lea.vmem %s3561_s5, 2048  ;;  %p3563_p0 = scmp.lt.s32.totalorder %s4363_s21, %s3561_s5 }
 0x15a   : > { %p3558_p8 = pnand %p3556_p10, %p3542_p12  ;;  %p3564_p9 = scmp.lt.s32.totalorder %s3562_s10, %s3555_s27 }
 0x15c   : > { %p3559_p3 = pneg %p3558_p8  ;;  %p3565_p11 = por %p3564_p9, %p3563_p0 }
 0x15e   : > { %p3566_p1 = pnand %p3565_p11, %p3559_p3 }
 0x160   : > { %3569 = shalt.err (!%p3566_p1)
}
 0x161   : > { %3089 = dma.hbm_to_vmem [thread:$0]  (!%p4359_p4), %s4353_s4, 1024, %s4363_s21, %s492_s26, %s5027_s11, %s5027_s11, %s5026_s9  }
 0x162   : > { %s3018_s30 = smul.u32 640, %s5035_s3  ;;  %s2576_s22 = sshll.u32 %s4142_s25, 5 }
 0x163   : > { %s5052_s27 = smul.u32 40, %s4339_s20  ;;  %s5053_s1 = sld [smem:[#allocation51_spill]] }
 0x164   : > { %s513_s28 = scalar_lea.sflag [#allocation8], %s4139_s15 }
 0x165   : > { %s516_s0 = scalar_lea.vmem [#allocation7], %s5052_s27 }
 0x166   : > { %s523_s23 = sshll.u32 %s516_s0, 4  ;;  %s4406_s23 = int_to_ptr.vmem [resolvable:$true] %s523_s23 }
 0x169   : > { %s4404_s13 = scalar_lea.hbm %s5053_s1, %s3018_s30  ;;  %s3575_s20 = scalar_lea.hbm %s5053_s1, 1280 }
 0x16a   : > { %s3570_s29 = scalar_lea.hbm %s4404_s13, 640  ;;  %p3576_p5 = scmp.lt.u32.totalorder %s4404_s13, %s5053_s1 }
 0x16b   : > { %p3571_p0 = scmp.ne.s32.totalorder %s4404_s13, %s3570_s29  ;;  %p3577_p7 = scmp.lt.u32.totalorder %s3575_s20, %s3570_s29 }
 0x16c   : > { %p3579_p10 = scmp.lt.u32.totalorder %s3570_s29, %s4404_s13 }
 0x16d   : > { %p3573_p3 = pnand %p3571_p0, %p3542_p12  ;;  %p3578_p2 = por %p3577_p7, %p3576_p5 }
 0x16f   : > { %p3574_p6 = pneg %p3573_p3  ;;  %p3580_p8 = por %p3579_p10, %p3578_p2 }
 0x171   : > { %p3581_p9 = pnand %p3580_p8, %p3574_p6 }
 0x173   : > { %3584 = shalt.err (!%p3581_p9)
}
 0x174   : > { %s3585_s30 = scalar_lea.vmem %s4406_s23, 640  ;;  %s3824_s27 = smov [#allocation7]  }
 0x175   : > { %p3586_p11 = scmp.ne.s32.totalorder %s4406_s23, %s3585_s30  ;;  %s3590_s0 = sshll.u32 %s3824_s27, 4  ;;  %s3591_s0 = int_to_ptr.vmem [resolvable:$false] %s3590_s0 }
 0x176   : > { %s3592_s5 = scalar_lea.vmem %s3591_s0, 1280  ;;  %p3593_p3 = scmp.lt.s32.totalorder %s4406_s23, %s3591_s0 }
 0x177   : > { %p3588_p1 = pnand %p3586_p11, %p3542_p12  ;;  %p3594_p5 = scmp.lt.s32.totalorder %s3592_s5, %s3585_s30 }
 0x179   : > { %p3589_p0 = pneg %p3588_p1  ;;  %p3595_p7 = por %p3594_p5, %p3593_p3 }
 0x17b   : > { %p3596_p2 = pnand %p3595_p7, %p3589_p0 }
 0x17d   : > { %3599 = shalt.err (!%p3596_p2)
}
 0x17e   : > { %3092 = dma.hbm_to_vmem [thread:$0]  (!%p4359_p4), %s4404_s13, 640, %s4406_s23, %s513_s28, %s5027_s11, %s5027_s11, %s5026_s9  }
 0x17f   : > { %s2654_s29 = sshll.u32 %s3802_s16, 9  ;;  %s5054_s3 = sld [smem:[#allocation56_spill]] }
 0x180   : > { %s558_s6 = scalar_lea.vmem [#allocation15], %s2576_s22  ;;  %p5055_p6 = scmp.ne.s32.totalorder %s5025_s24, 0 }
 0x181   : > { %s565_s21 = sshll.u32 %s558_s6, 4  ;;  %s4445_s21 = int_to_ptr.vmem [resolvable:$true] %s565_s21 }
 0x185   : > { %s4441_s20 = scalar_lea.hbm %s5054_s3, %s2654_s29  ;;  %s3605_s23 = scalar_lea.hbm %s5054_s3, 4096 }
 0x186   : > { %s3600_s26 = scalar_lea.hbm %s4441_s20, 512  ;;  %p3606_p8 = scmp.lt.u32.totalorder %s4441_s20, %s5054_s3 }
 0x187   : > { %p3601_p12 = scmp.ne.s32.totalorder %s4441_s20, %s3600_s26  ;;  %p3607_p9 = scmp.lt.u32.totalorder %s3605_s23, %s3600_s26 }
 0x188   : > { %p3609_p1 = scmp.lt.u32.totalorder %s3600_s26, %s4441_s20 }
 0x189   : > { %p3603_p10 = pnand %p3601_p12, %p5055_p6  ;;  %p3608_p11 = por %p3607_p9, %p3606_p8 }
 0x18b   : > { %p3604_p4 = pneg %p3603_p10  ;;  %p3610_p0 = por %p3609_p1, %p3608_p11 }
 0x18d   : > { %p3611_p3 = pnand %p3610_p0, %p3604_p4 }
 0x18f   : > { %3614 = shalt.err (!%p3611_p3)
}
 0x190   : > { %s3615_s25 = scalar_lea.vmem %s4445_s21, 512  ;;  %s3825_s22 = smov [#allocation15]  }
 0x191   : > { %p3616_p5 = scmp.ne.s32.totalorder %s4445_s21, %s3615_s25  ;;  %s3620_s0 = sshll.u32 %s3825_s22, 4  ;;  %s3621_s0 = int_to_ptr.vmem [resolvable:$false] %s3620_s0 }
 0x192   : > { %s3622_s5 = scalar_lea.vmem %s3621_s0, 1024  ;;  %p3623_p12 = scmp.lt.s32.totalorder %s4445_s21, %s3621_s0 }
 0x193   : > { %p3618_p7 = pnand %p3616_p5, %p5055_p6  ;;  %p3624_p10 = scmp.lt.s32.totalorder %s3622_s5, %s3615_s25 }
 0x195   : > { %p3619_p2 = pneg %p3618_p7  ;;  %p3625_p8 = por %p3624_p10, %p3623_p12 }
 0x197   : > { %p3626_p9 = pnand %p3625_p8, %p3619_p2 }
 0x199   : > { %3629 = shalt.err (!%p3626_p9)
}
 0x19a   : > { %p5056_p4 = scmp.ne.s32.totalorder %s5024_s2, 0  ;;  %s5057_s29 = scalar_lea.sflag [#allocation14], %s4139_s15 }
 0x19b   : > { %s3630_s10 = scalar_lea.hbm %s4169_s12, 256  ;;  %s3635_s26 = scalar_lea.hbm %s4939_s8, 2048 }
 0x19c   : > { %3098 = dma.hbm_to_vmem [thread:$0]  (!%p5056_p4), %s4441_s20, 512, %s4445_s21, %s5057_s29, %s5027_s11, %s5027_s11, %s5026_s9  }
 0x19d   : > { %p3631_p11 = scmp.ne.s32.totalorder %s4169_s12, %s3630_s10  ;;  %p3636_p3 = scmp.lt.u32.totalorder %s4169_s12, %s4939_s8 }
 0x19e   : > { %p3637_p5 = scmp.lt.u32.totalorder %s3635_s26, %s3630_s10  ;;  %p3639_p2 = scmp.lt.u32.totalorder %s3630_s10, %s4169_s12 }
 0x19f   : > { %p3633_p1 = pnand %p3631_p11, %p5055_p6 }
 0x1a0   : > { %p3638_p7 = por %p3637_p5, %p3636_p3 }
 0x1a1   : > { %p3634_p0 = pneg %p3633_p1 }
 0x1a2   : > { %p3640_p12 = por %p3639_p2, %p3638_p7 }
 0x1a4   : > { %p3641_p10 = pnand %p3640_p12, %p3634_p0 }
 0x1a6   : > { %3644 = shalt.err (!%p3641_p10)
}
 0x1a7   : > { %s3645_s20 = scalar_lea.vmem %s4206_s14, 256  ;;  %s3826_s21 = smov [#allocation18]  }
 0x1a8   : > { %p3646_p8 = scmp.ne.s32.totalorder %s4206_s14, %s3645_s20  ;;  %s3650_s23 = sshll.u32 %s3826_s21, 4  ;;  %s3651_s23 = int_to_ptr.vmem [resolvable:$false] %s3650_s23 }
 0x1a9   : > { %s3652_s30 = scalar_lea.vmem %s3651_s23, 512  ;;  %p3653_p1 = scmp.lt.s32.totalorder %s4206_s14, %s3651_s23 }
 0x1aa   : > { %p3648_p9 = pnand %p3646_p8, %p5055_p6  ;;  %p3654_p13 = scmp.lt.s32.totalorder %s3652_s30, %s3645_s20 }
 0x1ac   : > { %p3649_p11 = pneg %p3648_p9  ;;  %p3655_p3 = por %p3654_p13, %p3653_p1 }
 0x1ae   : > { %p3656_p5 = pnand %p3655_p3, %p3649_p11 }
 0x1b0   : > { %3659 = shalt.err (!%p3656_p5)
}
 0x1b1   : > { %s5058_s27 = scalar_lea.sflag [#allocation17], %s4139_s15  ;;  %s5059_s24 = sld [smem:[#allocation43_spill]] }
 0x1b2   : > { %3104 = dma.hbm_to_vmem [thread:$0]  (!%p5056_p4), %s4169_s12, 256, %s4206_s14, %s5058_s27, %s5027_s11, %s5027_s11, %s5026_s9  }
 0x1b7   : > { %p5060_p6 = scmp.ne.s32.totalorder %s5059_s24, 0 }
 0x1b8   : > { %s5061_s25 = sld [smem:[#allocation38_spill]] (!%p5060_p6)  ;;  %p5062_p13 = scmp.ne.s32.totalorder (!%p5060_p6), %s5044_s17, 0 }
 0x1b9   : > { %619 = sbr.rel (%p5060_p6) target bundleno = 4027 (0xfbb), region = 72 }
 0x1be   : > { %s4502_s22 = sand.u32 (!%p5060_p6), 1, %s5061_s25  }
 0x1bf   : > { %s2586_s0 = sshll.u32 (!%p5060_p6), %s4502_s22, 6  ;;  %s622_s5 = scalar_lea.sflag (!%p5060_p6), [#allocation5], %s4502_s22 }
 0x1c0   : > { %s4506_s2 = scalar_lea.vmem [#allocation4], %s2586_s0 }
 0x1c1   : > { %3733 = dma.done.wait (%p5062_p13), %s622_s5, 1024  }
 0x1c2   : > { %3735 = vsyncadd (%p5062_p13), %s622_s5, 4294966272  ;;  %s630_s15 = sand.u32 1, %s3984_s19   ;;  %s3019_s12 = smul.u32 40, %s4502_s22 }
 0x1c3   : > { %s631_s9 = scalar_lea.sflag [#allocation8], %s630_s15 }
 0x1c4   : > { %s4514_s11 = scalar_lea.vmem [#allocation7], %s3019_s12 }
 0x1c5   : > { %3737 = dma.done.wait (%p5062_p13), %s631_s9, 640  }
 0x1c6   : > { %3739 = vsyncadd (%p5062_p13), %s631_s9, 4294966656  ;;  %p5063_p4 = scmp.eq.s32.totalorder %s3984_s19, 0 }
 0x1c8   : > { %3741 = dma.done.wait (%p5063_p4), [#allocation8], 1024   ;;  %p5064_p0 = pmov %p5063_p4 }
 0x1ca   : > { %3743 = vsyncadd (%p5064_p0), [#allocation8], 4294966272  ;;  %p5065_p7 = pmov %p5064_p0 }
 0x1cb   : > { %p5066_p2 = pmov %p5064_p0 }
 0x1cc   : > { %3745 = dma.done.wait (%p5065_p7), [#allocation11], 2048  }
 0x1cd   : > { %3747 = vsyncadd (%p5066_p2), [#allocation11], 4294965248  ;;  %s5067_s14 = sld [smem:[#allocation35_spill]]  ;;  %s5068_s29 = sld [smem:[#allocation45_spill]] }
 0x1ce   : > { %s652_s6 = scalar_lea.sflag [#allocation14], %s630_s15 }
 0x1d3   : > { %s653_s10 = sand.u32 1, %s5067_s14   ;;  %p5069_p12 = scmp.ne.s32.totalorder %s5068_s29, 0 }
 0x1d4   : > { %s2590_s4 = sshll.u32 %s653_s10, 4 }
 0x1d5   : > { %s4529_s26 = scalar_lea.vmem [#allocation13], %s2590_s4 }
 0x1d6   : > { %3749 = dma.done.wait (%p5069_p12), %s652_s6, 768  }
 0x1d7   : > { %3751 = vsyncadd (%p5069_p12), %s652_s6, 4294966528  ;;  %s2591_s17 = sshll.u32 %s653_s10, 5  ;;  %s2592_s28 = sshll.u32 %s653_s10, 6 }
 0x1d8   : > { %s4535_s13 = scalar_lea.vmem [#allocation15], %s2591_s17  ;;  %s670_s20 = scalar_lea.sflag [#allocation17], %s630_s15 }
 0x1d9   : > { %s4537_s21 = scalar_lea.vmem [#allocation16], %s2592_s28 }
 0x1da   : > { %3753 = dma.done.wait (%p5069_p12), %s670_s20, 1280  }
 0x1db   : > { %3755 = vsyncadd (%p5069_p12), %s670_s20, 4294966016  ;;  %s4543_s23 = scalar_lea.vmem [#allocation18], %s2590_s4  ;;  %p5070_p10 = pmov %p5064_p0 }
 0x1dc   : > { %p5071_p8 = pmov %p5064_p0 }
 0x1dd   : > { %3757 = dma.done.wait (%p5070_p10), [#allocation20], 768  }
 0x1de   : > { %3759 = vsyncadd (%p5071_p8), [#allocation20], 4294966528  ;;  %p5072_p9 = pmov %p5064_p0 }
 0x1df   : > { %p5073_p11 = pmov %p5064_p0 }
 0x1e0   : > { %3761 = dma.done.wait (%p5072_p9), [#allocation23], 768  }
 0x1e1   : > { %3763 = vsyncadd (%p5073_p11), [#allocation23], 4294966528  ;;  %s3020_s30 = smul.u32 48, %s4502_s22  ;;  %v766_v0 = vlaneseq  ;;  %s5074_s24 = sld [smem:[#allocation40_spill]] }
 0x1e3   : > { %v767_v1 = vand.u32 127, %v766_v0  ;;  %s4557_s27 = scalar_lea.vmem [#allocation25], %s3020_s30 }
 0x1e5   : > { %v768_v2 = vcvt.s32.f32 %v767_v1 }
 0x1e7   : > { %v769_v3 = vadd.f32 1.0, %v768_v2  ;;  %p2598_p1 = scmp.ne.s32.totalorder %s5074_s24, 0 }
 0x1e8   : > { %v801_v6 = vld [vmem:[%s4514_s11] sm:$0xff] (!%p2598_p1)  ;;  %v802_v7 = vld [vmem:[%s4514_s11 + $0x8] sm:$0xff] (!%p2598_p1)  ;;  %v803_v11 = vld [vmem:[%s4514_s11 + $0x10] sm:$0xff] (!%p2598_p1)  ;;  %v3827_v17 = vmov (!%p2598_p1), 0   ;;  %vm806_vm0 = vcmask (!%p2598_p1), 277504   ;;  %vm940_vm1 = vcmask (!%p2598_p1), 523264  }
 0x1e9   : > { %v770_v4 = vmul.f32 16.0, %v769_v3  ;;  %v785_v8 = vld [vmem:[%s4506_s2] sm:$0xff] (!%p2598_p1)  ;;  %v2909_v9 = vpack.c.bf16 (!%p2598_p1), %v802_v7, %v801_v6  ;;  %v786_v10 = vld [vmem:[%s4506_s2 + $0x8] sm:$0xff] (!%p2598_p1)  ;;  %v787_v15 = vld [vmem:[%s4506_s2 + $0x10] sm:$0xff] (!%p2598_p1)  ;;  %3255 = vset.pattern.permute.xlu1 (!%p2598_p1), %v3827_v17  ;;  %3254 = vset.pattern.permute.xlu0 (!%p2598_p1), %v3827_v17  ;;  %vm831_vm2 = vcmask (!%p2598_p1), 1041408  }
 0x1ea   : > { %v804_v12 = vld [vmem:[%s4514_s11 + $0x18] sm:$0xff] (!%p2598_p1)  ;;  %v2917_v13 = vpack.c.bf16 (!%p2598_p1), %v786_v10, %v785_v8  ;;  %v790_v20 = vld [vmem:[%s4506_s2 + $0x28] sm:$0xff] (!%p2598_p1)  ;;  %v793_v21 = vld [vmem:[#allocation10] sm:$0xff] (!%p2598_p1) }
 0x1eb   : > { %3252 = vrcp.f32 %v770_v4  ;;  %v2913_v14 = vpack.c.bf16 (!%p2598_p1), %v804_v12, %v803_v11  ;;  %v788_v16 = vld [vmem:[%s4506_s2 + $0x18] sm:$0xff] (!%p2598_p1)  ;;  %2910 = vmatprep.subr.bf16.mxu0 (!%p2598_p1), %v2909_v9  ;;  %v789_v19 = vld [vmem:[%s4506_s2 + $0x20] sm:$0xff] (!%p2598_p1)  ;;  %2754 = vmatprep.mubr.msk.f32.mxu0 (!%p2598_p1), %vm806_vm0, %v793_v21  ;;  %v791_v25 = vld [vmem:[%s4506_s2 + $0x30] sm:$0xff] (!%p2598_p1) }
 0x1ec   : > { %v2921_v18 = vpack.c.bf16 (!%p2598_p1), %v788_v16, %v787_v15  ;;  %3001 = vmatprep.subr.bf16.mxu1 (!%p2598_p1), %v2917_v13  ;;  %2912 = vmatpush3.bf16.msra.mxu0 (!%p2598_p1), %v2909_v9  ;;  %v779_v22 = vld [vmem:[#allocation9 + $0x10] sm:$0xff] (!%p2598_p1)  ;;  %v2925_v24 = vpack.c.bf16 (!%p2598_p1), %v790_v20, %v789_v19  ;;  %v792_v26 = vld [vmem:[%s4506_s2 + $0x38] sm:$0xff] (!%p2598_p1)  ;;  %v1070_v30 = vld [vmem:[#allocation12] sm:$0xff] (!%p2598_p1) }
 0x1ed   : > { %3005 = vmatpush3.bf16.msra.mxu1 (!%p2598_p1), %v2917_v13  ;;  %2914 = vmatprep.subr.bf16.mxu0 (!%p2598_p1), %v2913_v14  ;;  %v805_v23 = vld [vmem:[%s4514_s11 + $0x20] sm:$0x3] (!%p2598_p1)  ;;  %v794_v28 = vld [vmem:[#allocation10 + $0x8] sm:$0xff] (!%p2598_p1)  ;;  %v2929_v29 = vpack.c.bf16 (!%p2598_p1), %v792_v26, %v791_v25  ;;  %v797_v34 = vld [vmem:[#allocation10 + $0x20] sm:$0xff] (!%p2598_p1) }
 0x1ee   : > { %3002 = vmatprep.subr.bf16.mxu1 (!%p2598_p1), %v2921_v18  ;;  %2785 = vmatprep.mubr.msk.f32.mxu1 (!%p2598_p1), %vm940_vm1, %v779_v22  ;;  %v1072_v27 = vld [vmem:[#allocation12 + $0x10] sm:$0xff] (!%p2598_p1)  ;;  %v1073_v32 = vld [vmem:[#allocation12 + $0x18] sm:$0xff] (!%p2598_p1)  ;;  %v1071_v35 = vld [vmem:[#allocation12 + $0x8] sm:$0xff] (!%p2598_p1) }
 0x1ef   : > { %776 = sbr.rel (%p2598_p1) target bundleno = 734 (0x2de), region = 128  ;;  %1090 = vperm.xlu1 (!%p2598_p1), %3255, %v1072_v27   ;;  %1080 = vperm.xlu0 (!%p2598_p1), %3254, %v1070_v30   ;;  %v795_v31 = vld [vmem:[#allocation10 + $0x10] sm:$0xff] (!%p2598_p1)  ;;  %v796_v33 = vld [vmem:[#allocation10 + $0x18] sm:$0xff] (!%p2598_p1)  ;;  %v798_v37 = vld [vmem:[#allocation10 + $0x28] sm:$0xff] (!%p2598_p1) }
 0x1f0   : > { %2916 = vmatpush3.bf16.msra.mxu0 (!%p2598_p1), %v2913_v14  ;;  %v780_v36 = vld [vmem:[#allocation9 + $0x18] sm:$0xff] (!%p2598_p1)  ;;  %v781_v38 = vld [vmem:[#allocation9 + $0x20] sm:$0xff] (!%p2598_p1)  ;;  %v799_v39 = vld [vmem:[#allocation10 + $0x30] sm:$0xff] (!%p2598_p1) }
 0x1f1   : > { %3006 = vmatpush3.bf16.msra.mxu1 (!%p2598_p1), %v2921_v18  ;;  %2752 = vmatprep.subr.msk.mxu0 (!%p2598_p1), %vm831_vm2, %v805_v23  ;;  %v1075_v40 = vld [vmem:[#allocation12 + $0x28] sm:$0xff] (!%p2598_p1)  ;;  %v1074_v41 = vld [vmem:[#allocation12 + $0x20] sm:$0xff] (!%p2598_p1)  ;;  %v800_v43 = vld [vmem:[#allocation10 + $0x38] sm:$0xff] (!%p2598_p1) }
 0x1f2   : > { %3003 = vmatprep.subr.bf16.mxu1 (!%p2598_p1), %v2925_v24  ;;  %v782_v42 = vld [vmem:[#allocation9 + $0x28] sm:$0xff] (!%p2598_p1)  ;;  %v783_v44 = vld [vmem:[#allocation9 + $0x30] sm:$0xff] (!%p2598_p1)  ;;  %v777_v45 = vld [vmem:[#allocation9] sm:$0xff] (!%p2598_p1) }
 0x1f3   : > { %1095 = vperm.xlu1 (!%p2598_p1), %3255, %v1073_v32   ;;  %1085 = vperm.xlu0 (!%p2598_p1), %3254, %v1071_v35   ;;  %v1077_v46 = vld [vmem:[#allocation12 + $0x38] sm:$0xff] (!%p2598_p1)  ;;  %v1076_v47 = vld [vmem:[#allocation12 + $0x30] sm:$0xff] (!%p2598_p1)  ;;  %v778_v49 = vld [vmem:[#allocation9 + $0x8] sm:$0xff] (!%p2598_p1) }
 0x1f4   : > { %2753 = vmatpush3.msk.msra.mxu0 (!%p2598_p1), %vm831_vm2, %v805_v23  ;;  %v784_v48 = vld [vmem:[#allocation9 + $0x38] sm:$0xff] (!%p2598_p1) }
 0x1f5   : > { %v4555_v5 = vpop.eup %3252  ;;  %3007 = vmatpush3.bf16.msra.mxu1 (!%p2598_p1), %v2925_v24  ;;  %2755 = vmatmul.mubr.msk.f32.vlgmr.msra.gmra.mrb[0].mxu0 (!%p2598_p1), %vm806_vm0, %v794_v28 }
 0x1f6   : > { %2918 = vmatprep.subr.bf16.mxu0 %v2917_v13  ;;  %3004 = vmatprep.subr.bf16.mxu1 %v2929_v29 }
 0x1f7   : > { %2920 = vmatpush3.bf16.msra.mxu0 %v2917_v13  ;;  %2757 = vmatprep.mubr.msk.f32.mxu0 %vm806_vm0, %v795_v31 }
 0x1f8   : > { %2922 = vmatprep.subr.bf16.mxu0 %v2921_v18  ;;  %1105 = vperm.xlu1 %3255, %v1075_v40  }
 0x1f9   : > { %3008 = vmatpush3.bf16.msra.mxu1 %v2929_v29  ;;  %2758 = vmatmul.mubr.msk.f32.gmra.mrb[2].mxu0 %vm806_vm0, %v796_v33 }
 0x1fa   : > { %2760 = vmatprep.mubr.msk.f32.mxu0 %vm806_vm0, %v797_v34  ;;  %1100 = vperm.xlu0 %3254, %v1074_v41  }
 0x1fb   : > { %2924 = vmatpush3.bf16.msra.mxu0 %v2921_v18 }
 0x1fc   : > { %2786 = vmatmul.mubr.msk.f32.vlgmr.msra.gmra.mrb[0].mxu1 %vm940_vm1, %v780_v36  ;;  %2926 = vmatprep.subr.bf16.mxu0 %v2925_v24 }
 0x1fd   : > { %2761 = vmatmul.mubr.msk.f32.gmra.mrb[4].mxu0 %vm806_vm0, %v798_v37  ;;  %2788 = vmatprep.mubr.msk.f32.mxu1 %vm940_vm1, %v781_v38 }
 0x1fe   : > { %2763 = vmatprep.mubr.msk.f32.mxu0 %vm806_vm0, %v799_v39  ;;  %1115 = vperm.xlu1 %3255, %v1077_v46  }
 0x1ff   : > { %2928 = vmatpush3.bf16.msra.mxu0 %v2925_v24  ;;  %1110 = vperm.xlu0 %3254, %v1076_v47  }
 0x200   : > { %2789 = vmatmul.mubr.msk.f32.gmra.mrb[2].mxu1 %vm940_vm1, %v782_v42  ;;  %2930 = vmatprep.subr.bf16.mxu0 %v2929_v29 }
 0x201   : > { %2764 = vmatmul.mubr.msk.f32.gmra.mrb[6].mxu0 %vm806_vm0, %v800_v43  ;;  %2791 = vmatprep.mubr.msk.f32.mxu1 %vm940_vm1, %v783_v44 }
 0x202   : > { %2782 = vmatprep.mubr.msk.f32.mxu0 %vm940_vm1, %v777_v45 }
 0x203   : > { %2932 = vmatpush3.bf16.msra.mxu0 %v2929_v29 }
 0x204   : > { %2792 = vmatmul.mubr.msk.f32.gmra.mrb[4].mxu1 %vm940_vm1, %v784_v48 }
 0x206   : > { %2783 = vmatmul.mubr.msk.f32.vlgmr.msra.gmra.mrb[0].mxu0 %vm940_vm1, %v778_v49 }
 0x26e   : > { %v1091_v50 = vpop.permute.xlu1 %1090  ;;  %v1081_v51 = vpop.permute.xlu0 %1080 }
 0x272   : > { %v1096_v52 = vpop.permute.xlu1 %1095  ;;  %v1086_v54 = vpop.permute.xlu0 %1085 }
 0x277   : > { %v1106_v62 = vpop.permute.xlu1 %1105 }
 0x279   : > { %v1101_v1 = vpop.permute.xlu0 %1100 }
 0x27d   : > { %v1116_v15 = vpop.permute.xlu1 %1115 }
 0x27e   : > { %v1111_v18 = vpop.permute.xlu0 %1110 }
 0x2cc   : > { %v2759_v53 = vpop.f32.mrb[2].mxu0 }
 0x2cd   : > { %v911_v55 = vpop.f32.mrb[3].mxu0 }
 0x2cf   : > { %v2787_v56 = vpop.f32.mrb[0].mxu1 }
 0x2d0   : > { %v1047_v57 = vadd.f32 %v2787_v56, %v2759_v53  ;;  %v1041_v58 = vpop.f32.mrb[1].mxu1  ;;  %v2762_v59 = vpop.f32.mrb[4].mxu0 }
 0x2d1   : > { %v1042_v60 = vadd.f32 %v1041_v58, %v911_v55  ;;  %v921_v61 = vpop.f32.mrb[5].mxu0 }
 0x2d2   : > { %v1121_v63 = vadd.f32 %v1096_v52, %v1047_v57 }
 0x2d3   : > { %v1120_v2 = vadd.f32 %v1091_v50, %v1042_v60  ;;  %v2790_v3 = vpop.f32.mrb[2].mxu1 }
 0x2d4   : > { %1129 = vst [vmem:[#allocation2 + $0x18] sm:$0xff] %v1121_v63  ;;  %v1057_v4 = vadd.f32 %v2790_v3, %v2762_v59  ;;  %v1051_v6 = vpop.f32.mrb[3].mxu1  ;;  %v2765_v7 = vpop.f32.mrb[6].mxu0 }
 0x2d5   : > { %1128 = vst [vmem:[#allocation2 + $0x10] sm:$0xff] %v1120_v2  ;;  %v1052_v8 = vadd.f32 %v1051_v6, %v921_v61  ;;  %v931_v9 = vpop.f32.mrb[7].mxu0 }
 0x2d6   : > { %v1123_v10 = vadd.f32 %v1106_v62, %v1057_v4 }
 0x2d7   : > { %v1122_v11 = vadd.f32 %v1101_v1, %v1052_v8  ;;  %v2793_v12 = vpop.f32.mrb[4].mxu1 }
 0x2d8   : > { %1131 = vst [vmem:[#allocation2 + $0x28] sm:$0xff] %v1123_v10  ;;  %v1067_v13 = vadd.f32 %v2793_v12, %v2765_v7  ;;  %v1061_v14 = vpop.f32.mrb[5].mxu1 }
 0x2d9   : > { %1130 = vst [vmem:[#allocation2 + $0x20] sm:$0xff] %v1122_v11  ;;  %v1062_v16 = vadd.f32 %v1061_v14, %v931_v9  ;;  %v2784_v17 = vpop.f32.mrb[0].mxu0 }
 0x2da   : > { %v1125_v19 = vadd.f32 %v1116_v15, %v1067_v13  ;;  %v1119_v20 = vadd.f32 %v2784_v17, %v1086_v54  ;;  %v1031_v21 = vpop.f32.mrb[1].mxu0 }
 0x2db   : > { %v1124_v22 = vadd.f32 %v1111_v18, %v1062_v16  ;;  %v1118_v23 = vadd.f32 %v1081_v51, %v1031_v21 }
 0x2dc   : > { %1133 = vst [vmem:[#allocation2 + $0x38] sm:$0xff] %v1125_v19  ;;  %1127 = vst [vmem:[#allocation2 + $0x8] sm:$0xff] %v1119_v20 }
 0x2dd   : > { %1132 = vst [vmem:[#allocation2 + $0x30] sm:$0xff] %v1124_v22  ;;  %1126 = vst [vmem:[#allocation2] sm:$0xff] %v1118_v23 }
 0x2de PF: > { %v4595_v26 = vld [vmem:[#allocation2 + $0x10] sm:$0xff]  ;;  %vm1144_vm3 = vcmask 523264   ;;  %v4599_v28 = vld [vmem:[#allocation2 + $0x18] sm:$0xff]  ;;  %v3828_v29 = vmov 0   ;;  %v3829_v30 = vmov 3   ;;  %vm1288_vm6 = vcmask 1040384  }
 0x2df   : > { %3256 = vset.pattern.permute.xlu0 %v3828_v29  ;;  %3257 = vset.pattern.permute.xlu1 %v3829_v30  ;;  %v2937_v31 = vpack.c.bf16 %v4599_v28, %v4595_v26  ;;  %v4605_v33 = vld [vmem:[#allocation2 + $0x28] sm:$0xff]  ;;  %v1142_v34 = vld [vmem:[%s4529_s26] sm:$0xff]  ;;  %vm1290_vm7 = vcmask 1041408   ;;  %vm1292_vm8 = vcmask 1042432   ;;  %s3830_s19 = smov 1   ;;  %vm1298_vm9 = vcmask 7168  }
 0x2e0   : > { %v4603_v32 = vld [vmem:[#allocation2 + $0x20] sm:$0xff]  ;;  %2810 = vmatprep.mubr.msk.f32.mxu0 %vm1144_vm3, %v1142_v34  ;;  %v4617_v37 = vld [vmem:[%s4543_s23 + $0x8] sm:$0xff]  ;;  %s3831_s25 = smov 2   ;;  %vm1305_vm10 = vcmask 15360   ;;  %s3832_s0 = smov 4   ;;  %vm1312_vm11 = vcmask 31744  }
 0x2e1   : > { %v4610_v35 = vld [vmem:[%s4543_s23] sm:$0xff]  ;;  %v2941_v36 = vpack.c.bf16 %v4605_v33, %v4603_v32  ;;  %v1143_v41 = vld [vmem:[%s4529_s26 + $0x8] sm:$0xff]  ;;  %s3833_s5 = smov 8   ;;  %vm1319_vm12 = vcmask 64512   ;;  %s3834_s2 = smov 16   ;;  %vm1326_vm13 = vcmask 130048  }
 0x2e2   : > { %1232 = vperm.xlu0 %3256, %v4610_v35   ;;  %1245 = vperm.xlu1 %3257, %v4610_v35   ;;  %s3836_s15 = smov 32   ;;  %s5075_s12 = sld [smem:[#allocation40_spill]]  ;;  %vm1333_vm14 = vcmask 261120  }
 0x2e3   : > { %v4593_v25 = vld [vmem:[#allocation2 + $0x8] sm:$0xff]  ;;  %v4621_v39 = vld [vmem:[#allocation2 + $0x38] sm:$0xff]  ;;  %s3840_s9 = smov 64  }
 0x2e4   : > { %v4591_v24 = vld [vmem:[#allocation2] sm:$0xff]  ;;  %v4619_v38 = vld [vmem:[#allocation2 + $0x30] sm:$0xff] }
 0x2e5   : > { %v2933_v27 = vpack.c.bf16 %v4593_v25, %v4591_v24  ;;  %v2945_v40 = vpack.c.bf16 %v4621_v39, %v4619_v38 }
 0x2e6   : > { %1237 = vperm.xlu0 %3256, %v4617_v37   ;;  %1249 = vperm.xlu1 %3257, %v4617_v37  }
 0x2e7   : > { %2934 = vmatprep.subr.bf16.mxu0 %v2933_v27 }
 0x2e8   : > { %2936 = vmatpush3.bf16.msra.mxu0 %v2933_v27  ;;  %s1422_s11 = ssub.s32 0, %s5075_s12  ;;  %p1421_p3 = scmp.lt.s32.totalorder %s5075_s12, 0 }
 0x2e9   : > { %2938 = vmatprep.subr.bf16.mxu0 %v2937_v31  ;;  %s2618_s14 = smin.u32 %s5075_s12, %s1422_s11 }
 0x2ea   : > { %s1424_s29 = sand.u32 3, %s2618_s14  }
 0x2eb   : > { %s1425_s10 = ssub.s32 0, %s1424_s29 }
 0x2ec   : > { %2940 = vmatpush3.bf16.msra.mxu0 %v2937_v31  ;;  %s5104_s10 = smov (!%p1421_p3, %s1425_s10), %s1424_s29 }
 0x2ed   : > { %2942 = vmatprep.subr.bf16.mxu0 %v2941_v36  ;;  %p2620_p5 = scmp.lt.s32.totalorder %s5104_s10, 0  ;;  %s1431_s4 = sadd.s32 4, %s5104_s10 }
 0x2ef   : > { %s5106_s4 = smov (!%p2620_p5, %s1431_s4), %s5104_s10 }
 0x2f0   : > { %2944 = vmatpush3.bf16.msra.mxu0 %v2941_v36  ;;  %p2621_p6 = scmp.ne.s32.totalorder %s5106_s4, 0 }
 0x2f1   : > { %2946 = vmatprep.subr.bf16.mxu0 %v2945_v40  ;;  %s3841_s6 = smov (!%p2621_p6), 2   ;;  %s3842_s26 = smov (!%p2621_p6), 1  }
 0x2f4   : > { %2948 = vmatpush3.bf16.msra.mxu0 %v2945_v40 }
 0x2f7   : > { %2811 = vmatmul.mubr.msk.f32.vlgmr.msra.gmra.mrb[0].mxu0 %vm1144_vm3, %v1143_v41 }
 0x361   : > { %v1246_v42 = vpop.permute.xlu1 %1245  ;;  %v1233_v43 = vpop.permute.xlu0 %1232 }
 0x365   : > { %v1250_v44 = vpop.permute.xlu1 %1249  ;;  %v1238_v45 = vpop.permute.xlu0 %1237 }
 0x3ca   : > { %v2812_v46 = vpop.f32.mrb[0].mxu0 }
 0x3cb   : > { %vm1229_vm4 = vcmp.ge.f32.partialorder %v2812_v46, 0.0  ;;  %v1241_v47 = vmul.f32 %v2812_v46, %v1238_v45  ;;  %v1253_v48 = vmul.f32 %v2812_v46, %v1250_v44  ;;  %v1217_v49 = vpop.f32.mrb[1].mxu0 }
 0x3cc   : > { %vm1228_vm5 = vcmp.ge.f32.partialorder %v1217_v49, 0.0  ;;  %v1240_v50 = vmul.f32 %v1233_v43, %v1217_v49  ;;  %v1252_v51 = vmul.f32 %v1246_v42, %v1217_v49 }
 0x3cd   : > { %v4629_v52 = vsel %vm1229_vm4, %v2812_v46, %v1241_v47  ;;  %v4631_v53 = vsel %vm1229_vm4, %v2812_v46, %v1253_v48 }
 0x3ce   : > { %v1264_v54 = vmul.f32 %v4629_v52, %v4629_v52  ;;  %v1280_v55 = vmul.f32 %v4631_v53, %v4631_v53  ;;  %v4637_v56 = vsel %vm1228_vm5, %v1217_v49, %v1240_v50  ;;  %v4639_v57 = vsel %vm1228_vm5, %v1217_v49, %v1252_v51 }
 0x3cf   : > { %v1256_v58 = vadd.f32 %v4629_v52, %v4637_v56  ;;  %v1263_v59 = vmul.f32 %v4637_v56, %v4637_v56  ;;  %v1272_v60 = vadd.f32 %v4631_v53, %v4639_v57  ;;  %v1279_v61 = vmul.f32 %v4639_v57, %v4639_v57 }
 0x3d0   : > { %v3835_v51 = vmov 1  }
 0x3d1   : > { %v1257_v62 = vrot.slane %v1256_v58, 4  ;;  %v1265_v63 = vadd.f32 %v1264_v54, %v1263_v59  ;;  %v1273_v1 = vrot.slane %v1272_v60, 4  ;;  %v1281_v2 = vadd.f32 %v1280_v55, %v1279_v61  ;;  %3258 = vset.pattern.permute.xlu1 %v3835_v51  ;;  %3259 = vset.pattern.permute.xlu0 %v3835_v51 }
 0x3d2   : > { %v3837_v59 = vmov 4   ;;  %v3839_v61 = vmov 5  }
 0x3d3   : > { %v1258_v3 = vadd.f32 %v1257_v62, %v1256_v58  ;;  %v1266_v4 = vrot.slane %v1265_v63, 4  ;;  %v1274_v6 = vadd.f32 %v1273_v1, %v1272_v60  ;;  %v1282_v7 = vrot.slane %v1281_v2, 4 }
 0x3d4   : > { %v3838_v60 = vmov 2  }
 0x3d5   : > { %v1259_v8 = vrot.slane %v1258_v3, 2  ;;  %v1267_v9 = vadd.f32 %v1266_v4, %v1265_v63  ;;  %v1275_v10 = vrot.slane %v1274_v6, 2  ;;  %v1283_v11 = vadd.f32 %v1282_v7, %v1281_v2 }
 0x3d7   : > { %v1260_v12 = vadd.f32 %v1259_v8, %v1258_v3  ;;  %v1268_v13 = vrot.slane %v1267_v9, 2  ;;  %v1276_v14 = vadd.f32 %v1275_v10, %v1274_v6  ;;  %v1284_v15 = vrot.slane %v1283_v11, 2 }
 0x3d9   : > { %v1261_v16 = vrot.slane %v1260_v12, 1  ;;  %v1269_v17 = vadd.f32 %v1268_v13, %v1267_v9  ;;  %v1285_v18 = vadd.f32 %v1284_v15, %v1283_v11  ;;  %v1277_v19 = vrot.slane %v1276_v14, 1 }
 0x3db   : > { %v1270_v20 = vrot.slane %v1269_v17, 1  ;;  %v1286_v21 = vrot.slane %v1285_v18, 1  ;;  %v1262_v22 = vadd.f32 %v1261_v16, %v1260_v12  ;;  %v1278_v27 = vadd.f32 %v1277_v19, %v1276_v14 }
 0x3dd   : > { %v1271_v23 = vadd.f32 %v1270_v20, %v1269_v17  ;;  %v1287_v29 = vadd.f32 %v1286_v21, %v1285_v18  ;;  %v4680_v17 = vshrl.u32 %v766_v0, 7 }
 0x3df   : > { %v1289_v30 = vsel %vm1288_vm6, %v1262_v22, %v1271_v23  ;;  %v1357_v19 = vsub.s32 0, %v4680_v17  ;;  %v1391_v20 = vsub.s32 2, %v4680_v17 }
 0x3e0   : > { %v1291_v31 = vsel %vm1290_vm7, %v1289_v30, %v1278_v27  ;;  %v1397_v30 = vsub.s32 3, %v4680_v17 }
 0x3e1   : > { %v1293_v34 = vsel %vm1292_vm8, %v1291_v31, %v1287_v29  ;;  %v1365_v29 = vsub.s32 1, %v4680_v17 }
 0x3e2   : > { %1295 = vrot.lane.b32.xlu0 %v1293_v34, %s3830_s19 }
 0x454   : > { %v1296_v36 = vpop.permute.xlu0 %1295 }
 0x455   : > { %v1299_v40 = vsel %vm1298_vm9, 0.0, %v1296_v36 }
 0x456   : > { %v1300_v41 = vadd.f32 %v1299_v40, %v1293_v34 }
 0x458   : > { %1302 = vrot.lane.b32.xlu1 %v1300_v41, %s3831_s25 }
 0x4ca   : > { %v1303_v42 = vpop.permute.xlu1 %1302 }
 0x4cb   : > { %v1306_v43 = vsel %vm1305_vm10, 0.0, %v1303_v42 }
 0x4cc   : > { %v1307_v44 = vadd.f32 %v1306_v43, %v1300_v41 }
 0x4ce   : > { %1309 = vrot.lane.b32.xlu0 %v1307_v44, %s3832_s0 }
 0x540   : > { %v1310_v45 = vpop.permute.xlu0 %1309 }
 0x541   : > { %v1313_v46 = vsel %vm1312_vm11, 0.0, %v1310_v45 }
 0x542   : > { %v1314_v47 = vadd.f32 %v1313_v46, %v1307_v44 }
 0x544   : > { %1316 = vrot.lane.b32.xlu1 %v1314_v47, %s3833_s5 }
 0x5b6   : > { %v1317_v48 = vpop.permute.xlu1 %1316 }
 0x5b7   : > { %v1320_v49 = vsel %vm1319_vm12, 0.0, %v1317_v48 }
 0x5b8   : > { %v1321_v50 = vadd.f32 %v1320_v49, %v1314_v47 }
 0x5ba   : > { %1323 = vrot.lane.b32.xlu0 %v1321_v50, %s3834_s2 }
 0x62c   : > { %v1324_v54 = vpop.permute.xlu0 %1323 }
 0x62d   : > { %v1327_v55 = vsel %vm1326_vm13, 0.0, %v1324_v54 }
 0x62e   : > { %v1328_v58 = vadd.f32 %v1327_v55, %v1321_v50 }
 0x630   : > { %1330 = vrot.lane.b32.xlu1 %v1328_v58, %s3836_s15 }
 0x634   : > { %1370 = vperm.xlu1 %3258, %v4610_v35  }
 0x638   : > { %3260 = vset.pattern.permute.xlu1 %v3837_v59 }
 0x639   : > { %1402 = vperm.xlu1 %3260, %v4610_v35  }
 0x63d   : > { %1406 = vperm.xlu1 %3260, %v4617_v37  }
 0x641   : > { %3262 = vset.pattern.permute.xlu1 %v3838_v60 }
 0x642   : > { %1384 = vperm.xlu1 %3262, %v4617_v37  }
 0x646   : > { %3263 = vset.pattern.permute.xlu1 %v3839_v61 }
 0x647   : > { %1412 = vperm.xlu1 %3263, %v4610_v35  }
 0x6a2   : > { %v1331_v62 = vpop.permute.xlu1 %1330 }
 0x6a3   : > { %v1334_v63 = vsel %vm1333_vm14, 0.0, %v1331_v62 }
 0x6a4   : > { %v1335_v1 = vadd.f32 %v1334_v63, %v1328_v58 }
 0x6a6   : > { %1337 = vrot.lane.b32.xlu0 %v1335_v1, %s3840_s9 }
 0x6aa   : > { %1374 = vperm.xlu0 %3259, %v4617_v37  }
 0x6ae   : > { %3261 = vset.pattern.permute.xlu0 %v3838_v60 }
 0x6af   : > { %1380 = vperm.xlu0 %3261, %v4610_v35  }
 0x6b3   : > { %3264 = vset.pattern.permute.xlu0 %v3839_v61  ;;  %v1371_v12 = vpop.permute.xlu1 %1370 }
 0x6b4   : > { %1416 = vperm.xlu0 %3264, %v4617_v37  }
 0x6b8   : > { %v1403_v18 = vpop.permute.xlu1 %1402 }
 0x6bc   : > { %v1407_v22 = vpop.permute.xlu1 %1406 }
 0x6c1   : > { %v1385_v34 = vpop.permute.xlu1 %1384 }
 0x6c6   : > { %v1413_v50 = vpop.permute.xlu1 %1412 }
 0x718   : > { %v1338_v2 = vpop.permute.xlu0 %1337 }
 0x719   : > { %v1340_v3 = vsel %vm1144_vm3, 0.0, %v1338_v2 }
 0x71a   : > { %v1341_v4 = vadd.f32 %v1340_v3, %v1335_v1 }
 0x71c   : > { %v1342_v6 = vmul.f32 %v4555_v5, %v1341_v4 }
 0x71e   : > { %v1343_v7 = vmul.f32 2.0, %v1342_v6  ;;  %v1350_v10 = vmul.f32 %v1342_v6, %v1342_v6  ;;  %v1358_v23 = vrot.slane %v1342_v6, %v1357_v19  ;;  %v1392_v27 = vrot.slane %v1342_v6, %v1391_v20 }
 0x720   : > { %v1344_v8 = vmul.f32 %v1343_v7, %v1341_v4  ;;  %v1352_v14 = vrot.slane %v1350_v10, 7  ;;  %v1359_v36 = vsub.f32 %v4637_v56, %v1358_v23  ;;  %v1393_v40 = vsub.f32 %v4639_v57, %v1392_v27 }
 0x721   : > { %v1394_v43 = vsub.f32 %v4631_v53, %v1392_v27  ;;  %v1360_v44 = vsub.f32 %v4629_v52, %v1358_v23 }
 0x722   : > { %v1346_v9 = vrot.slane %v1344_v8, 7 }
 0x724   : > { %v1348_v11 = vsub.f32 %v1341_v4, %v1346_v9 }
 0x726   : > { %v1349_v13 = vmul.f32 %v4555_v5, %v1348_v11 }
 0x728   : > { %v1354_v15 = vadd.f32 %v1352_v14, %v1349_v13 }
 0x729   : > { %v1375_v21 = vpop.permute.xlu0 %1374 }
 0x72a   : > { %v1361_v16 = vadd.f32 1e-05, %v1354_v15 }
 0x72c   : > { %3265 = vrsqrt.f32 %v1361_v16 }
 0x72e   : > { %v1381_v31 = vpop.permute.xlu0 %1380 }
 0x733   : > { %v1417_v49 = vpop.permute.xlu0 %1416 }
 0x736   : > { %v3266_v0 = vpop.eup %3265 }
 0x737   : > { %v1366_v41 = vrot.slane %v3266_v0, %v1365_v29  ;;  %v1398_v42 = vrot.slane %v3266_v0, %v1397_v30  ;;  %1436 = sbr.rel (%p2621_p6) target bundleno = 1984 (0x7c0), region = 132 }
 0x739   : > { %v1367_v45 = vmul.f32 %v1366_v41, %v1359_v36  ;;  %v1399_v46 = vmul.f32 %v1398_v42, %v1393_v40  ;;  %v1400_v47 = vmul.f32 %v1398_v42, %v1394_v43  ;;  %v1368_v48 = vmul.f32 %v1366_v41, %v1360_v44 }
 0x73b   : > { %v1377_v51 = vmul.f32 %v1371_v12, %v1367_v45  ;;  %v1409_v54 = vmul.f32 %v1403_v18, %v1399_v46  ;;  %v1410_v55 = vmul.f32 %v1407_v22, %v1400_v47  ;;  %v1378_v56 = vmul.f32 %v1375_v21, %v1368_v48 }
 0x73d   : > { %v4694_v58 = vadd.f32 %v1381_v31, %v1377_v51  ;;  %v4696_v57 = vadd.f32 %v1385_v34, %v1378_v56  ;;  %v4698_v59 = vadd.f32 %v1417_v49, %v1410_v55  ;;  %v4700_v60 = vadd.f32 %v1413_v50, %v1409_v54 }
 0x73f   : > { %1481 = vst [vmem:[#allocation3 + $0x40] sm:$0xff] %v4694_v58  ;;  %1482 = vst [vmem:[#allocation3 + $0x48] sm:$0xff] %v4696_v57  ;;  %1445 = vrot.lane.b32.xlu1 %v4700_v60, %s3841_s6  ;;  %1441 = vrot.lane.b32.xlu0 %v4694_v58, %s3841_s6 }
 0x740   : > { %1483 = vst [vmem:[#allocation3 + $0x50] sm:$0xff] %v4700_v60  ;;  %1484 = vst [vmem:[#allocation3 + $0x58] sm:$0xff] %v4698_v59 }
 0x743   : > { %1447 = vrot.lane.b32.xlu1 %v4698_v59, %s3841_s6  ;;  %1443 = vrot.lane.b32.xlu0 %v4696_v57, %s3841_s6 }
 0x747   : > { %1459 = vrot.lane.b32.xlu1 %v4696_v57, %s3842_s26  ;;  %1457 = vrot.lane.b32.xlu0 %v4694_v58, %s3842_s26 }
 0x74b   : > { %1463 = vrot.lane.b32.xlu1 %v4698_v59, %s3842_s26  ;;  %1461 = vrot.lane.b32.xlu0 %v4700_v60, %s3842_s26 }
 0x7b1   : > { %v1446_v52 = vpop.permute.xlu1 %1445  ;;  %v1442_v53 = vpop.permute.xlu0 %1441 }
 0x7b2   : > { %v1455_v61 = vsel %vm1305_vm10, 0.0, %v1446_v52  ;;  %v1453_v62 = vsel %vm1305_vm10, 0.0, %v1442_v53 }
 0x7b3   : > { %1475 = vst [vmem:[#allocation3 + $0x10] sm:$0xff] %v1455_v61  ;;  %1473 = vst [vmem:[#allocation3] sm:$0xff] %v1453_v62 }
 0x7b5   : > { %v1448_v63 = vpop.permute.xlu1 %1447  ;;  %v1444_v1 = vpop.permute.xlu0 %1443 }
 0x7b6   : > { %v1456_v2 = vsel %vm1305_vm10, 0.0, %v1448_v63  ;;  %v1454_v3 = vsel %vm1305_vm10, 0.0, %v1444_v1 }
 0x7b7   : > { %1476 = vst [vmem:[#allocation3 + $0x18] sm:$0xff] %v1456_v2  ;;  %1474 = vst [vmem:[#allocation3 + $0x8] sm:$0xff] %v1454_v3 }
 0x7b9   : > { %v1460_v4 = vpop.permute.xlu1 %1459  ;;  %v1458_v6 = vpop.permute.xlu0 %1457 }
 0x7ba   : > { %v1470_v7 = vsel %vm1298_vm9, 0.0, %v1460_v4  ;;  %v1469_v8 = vsel %vm1298_vm9, 0.0, %v1458_v6 }
 0x7bb   : > { %1478 = vst [vmem:[#allocation3 + $0x28] sm:$0xff] %v1470_v7  ;;  %1477 = vst [vmem:[#allocation3 + $0x20] sm:$0xff] %v1469_v8 }
 0x7bd   : > { %v1464_v9 = vpop.permute.xlu1 %1463  ;;  %v1462_v10 = vpop.permute.xlu0 %1461 }
 0x7be   : > { %v1472_v11 = vsel %vm1298_vm9, 0.0, %v1464_v9  ;;  %v1471_v12 = vsel %vm1298_vm9, 0.0, %v1462_v10 }
 0x7bf   : > { %1480 = vst [vmem:[#allocation3 + $0x38] sm:$0xff] %v1472_v11  ;;  %1479 = vst [vmem:[#allocation3 + $0x30] sm:$0xff] %v1471_v12 }
 0x7c0 PF: > { %p2622_p13 = scmp.ne.s32.totalorder %s5106_s4, 1 }
 0x7c1   : > { %1533 = vst [vmem:[#allocation3 + $0x40] sm:$0xff] (!%p2622_p13), %v4694_v58  ;;  %1534 = vst [vmem:[#allocation3 + $0x48] sm:$0xff] (!%p2622_p13), %v4696_v57  ;;  %s3843_s17 = smov (!%p2622_p13), 4   ;;  %s3844_s28 = smov (!%p2622_p13), 2  }
 0x7c2   : > { %1488 = sbr.rel (%p2622_p13) target bundleno = 2115 (0x843), region = 136  ;;  %1535 = vst [vmem:[#allocation3 + $0x50] sm:$0xff] (!%p2622_p13), %v4700_v60  ;;  %1536 = vst [vmem:[#allocation3 + $0x58] sm:$0xff] (!%p2622_p13), %v4698_v59  ;;  %1497 = vrot.lane.b32.xlu1 (!%p2622_p13), %v4700_v60, %s3843_s17  ;;  %1493 = vrot.lane.b32.xlu0 (!%p2622_p13), %v4694_v58, %s3843_s17 }
 0x7c6   : > { %1499 = vrot.lane.b32.xlu1 (!%p2622_p13), %v4698_v59, %s3843_s17  ;;  %1495 = vrot.lane.b32.xlu0 (!%p2622_p13), %v4696_v57, %s3843_s17 }
 0x7ca   : > { %1511 = vrot.lane.b32.xlu1 %v4696_v57, %s3844_s28  ;;  %1509 = vrot.lane.b32.xlu0 %v4694_v58, %s3844_s28 }
 0x7ce   : > { %1515 = vrot.lane.b32.xlu1 %v4698_v59, %s3844_s28  ;;  %1513 = vrot.lane.b32.xlu0 %v4700_v60, %s3844_s28 }
 0x834   : > { %v1498_v13 = vpop.permute.xlu1 %1497  ;;  %v1494_v14 = vpop.permute.xlu0 %1493 }
 0x835   : > { %v1507_v15 = vsel %vm1312_vm11, 0.0, %v1498_v13  ;;  %v1505_v16 = vsel %vm1312_vm11, 0.0, %v1494_v14 }
 0x836   : > { %1527 = vst [vmem:[#allocation3 + $0x10] sm:$0xff] %v1507_v15  ;;  %1525 = vst [vmem:[#allocation3] sm:$0xff] %v1505_v16 }
 0x838   : > { %v1500_v18 = vpop.permute.xlu1 %1499  ;;  %v1496_v20 = vpop.permute.xlu0 %1495 }
 0x839   : > { %v1508_v21 = vsel %vm1312_vm11, 0.0, %v1500_v18  ;;  %v1506_v22 = vsel %vm1312_vm11, 0.0, %v1496_v20 }
 0x83a   : > { %1528 = vst [vmem:[#allocation3 + $0x18] sm:$0xff] %v1508_v21  ;;  %1526 = vst [vmem:[#allocation3 + $0x8] sm:$0xff] %v1506_v22 }
 0x83c   : > { %v1512_v23 = vpop.permute.xlu1 %1511  ;;  %v1510_v27 = vpop.permute.xlu0 %1509 }
 0x83d   : > { %v1522_v30 = vsel %vm1305_vm10, 0.0, %v1512_v23  ;;  %v1521_v31 = vsel %vm1305_vm10, 0.0, %v1510_v27 }
 0x83e   : > { %1530 = vst [vmem:[#allocation3 + $0x28] sm:$0xff] %v1522_v30  ;;  %1529 = vst [vmem:[#allocation3 + $0x20] sm:$0xff] %v1521_v31 }
 0x840   : > { %v1516_v34 = vpop.permute.xlu1 %1515  ;;  %v1514_v0 = vpop.permute.xlu0 %1513 }
 0x841   : > { %v1524_v36 = vsel %vm1305_vm10, 0.0, %v1516_v34  ;;  %v1523_v40 = vsel %vm1305_vm10, 0.0, %v1514_v0 }
 0x842   : > { %1532 = vst [vmem:[#allocation3 + $0x38] sm:$0xff] %v1524_v36  ;;  %1531 = vst [vmem:[#allocation3 + $0x30] sm:$0xff] %v1523_v40 }
 0x843 PF: > { %p2623_p4 = scmp.ne.s32.totalorder %s5106_s4, 2 }
 0x844   : > { %1587 = vst [vmem:[#allocation3 + $0x40] sm:$0xff] (!%p2623_p4), %v4694_v58  ;;  %1588 = vst [vmem:[#allocation3 + $0x48] sm:$0xff] (!%p2623_p4), %v4696_v57  ;;  %s3845_s20 = smov (!%p2623_p4), 10   ;;  %s3846_s23 = smov (!%p2623_p4), 5   ;;  %vm1557_vm15 = vcmask (!%p2623_p4), 80896   ;;  %vm1574_vm0 = vcmask (!%p2623_p4), 39936  }
 0x845   : > { %1540 = sbr.rel (%p2623_p4) target bundleno = 2246 (0x8c6), region = 140  ;;  %1589 = vst [vmem:[#allocation3 + $0x50] sm:$0xff] (!%p2623_p4), %v4700_v60  ;;  %1590 = vst [vmem:[#allocation3 + $0x58] sm:$0xff] (!%p2623_p4), %v4698_v59  ;;  %1549 = vrot.lane.b32.xlu1 (!%p2623_p4), %v4700_v60, %s3845_s20  ;;  %1545 = vrot.lane.b32.xlu0 (!%p2623_p4), %v4694_v58, %s3845_s20 }
 0x849   : > { %1551 = vrot.lane.b32.xlu1 (!%p2623_p4), %v4698_v59, %s3845_s20  ;;  %1547 = vrot.lane.b32.xlu0 (!%p2623_p4), %v4696_v57, %s3845_s20 }
 0x84d   : > { %1564 = vrot.lane.b32.xlu1 %v4696_v57, %s3846_s23  ;;  %1562 = vrot.lane.b32.xlu0 %v4694_v58, %s3846_s23 }
 0x851   : > { %1568 = vrot.lane.b32.xlu1 %v4698_v59, %s3846_s23  ;;  %1566 = vrot.lane.b32.xlu0 %v4700_v60, %s3846_s23 }
 0x8b7   : > { %v1550_v41 = vpop.permute.xlu1 %1549  ;;  %v1546_v42 = vpop.permute.xlu0 %1545 }
 0x8b8   : > { %v1560_v43 = vsel %vm1557_vm15, 0.0, %v1550_v41  ;;  %v1558_v44 = vsel %vm1557_vm15, 0.0, %v1546_v42 }
 0x8b9   : > { %1581 = vst [vmem:[#allocation3 + $0x10] sm:$0xff] %v1560_v43  ;;  %1579 = vst [vmem:[#allocation3] sm:$0xff] %v1558_v44 }
 0x8bb   : > { %v1552_v45 = vpop.permute.xlu1 %1551  ;;  %v1548_v46 = vpop.permute.xlu0 %1547 }
 0x8bc   : > { %v1561_v47 = vsel %vm1557_vm15, 0.0, %v1552_v45  ;;  %v1559_v48 = vsel %vm1557_vm15, 0.0, %v1548_v46 }
 0x8bd   : > { %1582 = vst [vmem:[#allocation3 + $0x18] sm:$0xff] %v1561_v47  ;;  %1580 = vst [vmem:[#allocation3 + $0x8] sm:$0xff] %v1559_v48 }
 0x8bf   : > { %v1565_v49 = vpop.permute.xlu1 %1564  ;;  %v1563_v50 = vpop.permute.xlu0 %1562 }
 0x8c0   : > { %v1576_v51 = vsel %vm1574_vm0, 0.0, %v1565_v49  ;;  %v1575_v54 = vsel %vm1574_vm0, 0.0, %v1563_v50 }
 0x8c1   : > { %1584 = vst [vmem:[#allocation3 + $0x28] sm:$0xff] %v1576_v51  ;;  %1583 = vst [vmem:[#allocation3 + $0x20] sm:$0xff] %v1575_v54 }
 0x8c3   : > { %v1569_v55 = vpop.permute.xlu1 %1568  ;;  %v1567_v56 = vpop.permute.xlu0 %1566 }
 0x8c4   : > { %v1578_v52 = vsel %vm1574_vm0, 0.0, %v1569_v55  ;;  %v1577_v53 = vsel %vm1574_vm0, 0.0, %v1567_v56 }
 0x8c5   : > { %1586 = vst [vmem:[#allocation3 + $0x38] sm:$0xff] %v1578_v52  ;;  %1585 = vst [vmem:[#allocation3 + $0x30] sm:$0xff] %v1577_v53 }
 0x8c6 PF: > { %p2624_p0 = scmp.ne.s32.totalorder %s5106_s4, 3 }
 0x8c7   : > { %1641 = vst [vmem:[#allocation3 + $0x40] sm:$0xff] (!%p2624_p0), %v4694_v58  ;;  %1642 = vst [vmem:[#allocation3 + $0x48] sm:$0xff] (!%p2624_p0), %v4696_v57  ;;  %s3847_s30 = smov (!%p2624_p0), 18   ;;  %s3848_s24 = smov (!%p2624_p0), 9   ;;  %vm1611_vm1 = vcmask (!%p2624_p0), 146432   ;;  %vm1628_vm2 = vcmask (!%p2624_p0), 72704  }
 0x8c8   : > { %1594 = sbr.rel (%p2624_p0) target bundleno = 2377 (0x949), region = 144  ;;  %1643 = vst [vmem:[#allocation3 + $0x50] sm:$0xff] (!%p2624_p0), %v4700_v60  ;;  %1644 = vst [vmem:[#allocation3 + $0x58] sm:$0xff] (!%p2624_p0), %v4698_v59  ;;  %1603 = vrot.lane.b32.xlu1 (!%p2624_p0), %v4700_v60, %s3847_s30  ;;  %1599 = vrot.lane.b32.xlu0 (!%p2624_p0), %v4694_v58, %s3847_s30 }
 0x8cc   : > { %1605 = vrot.lane.b32.xlu1 (!%p2624_p0), %v4698_v59, %s3847_s30  ;;  %1601 = vrot.lane.b32.xlu0 (!%p2624_p0), %v4696_v57, %s3847_s30 }
 0x8d0   : > { %1618 = vrot.lane.b32.xlu1 %v4696_v57, %s3848_s24  ;;  %1616 = vrot.lane.b32.xlu0 %v4694_v58, %s3848_s24 }
 0x8d4   : > { %1622 = vrot.lane.b32.xlu1 %v4698_v59, %s3848_s24  ;;  %1620 = vrot.lane.b32.xlu0 %v4700_v60, %s3848_s24 }
 0x93a   : > { %v1604_v61 = vpop.permute.xlu1 %1603  ;;  %v1600_v62 = vpop.permute.xlu0 %1599 }
 0x93b   : > { %v1614_v63 = vsel %vm1611_vm1, 0.0, %v1604_v61  ;;  %v1612_v1 = vsel %vm1611_vm1, 0.0, %v1600_v62 }
 0x93c   : > { %1635 = vst [vmem:[#allocation3 + $0x10] sm:$0xff] %v1614_v63  ;;  %1633 = vst [vmem:[#allocation3] sm:$0xff] %v1612_v1 }
 0x93e   : > { %v1606_v2 = vpop.permute.xlu1 %1605  ;;  %v1602_v3 = vpop.permute.xlu0 %1601 }
 0x93f   : > { %v1615_v4 = vsel %vm1611_vm1, 0.0, %v1606_v2  ;;  %v1613_v6 = vsel %vm1611_vm1, 0.0, %v1602_v3 }
 0x940   : > { %1636 = vst [vmem:[#allocation3 + $0x18] sm:$0xff] %v1615_v4  ;;  %1634 = vst [vmem:[#allocation3 + $0x8] sm:$0xff] %v1613_v6 }
 0x942   : > { %v1619_v57 = vpop.permute.xlu1 %1618  ;;  %v1617_v58 = vpop.permute.xlu0 %1616 }
 0x943   : > { %v1630_v7 = vsel %vm1628_vm2, 0.0, %v1619_v57  ;;  %v1629_v59 = vsel %vm1628_vm2, 0.0, %v1617_v58 }
 0x944   : > { %1638 = vst [vmem:[#allocation3 + $0x28] sm:$0xff] %v1630_v7  ;;  %1637 = vst [vmem:[#allocation3 + $0x20] sm:$0xff] %v1629_v59 }
 0x946   : > { %v1623_v60 = vpop.permute.xlu1 %1622  ;;  %v1621_v8 = vpop.permute.xlu0 %1620 }
 0x947   : > { %v1632_v9 = vsel %vm1628_vm2, 0.0, %v1623_v60  ;;  %v1631_v10 = vsel %vm1628_vm2, 0.0, %v1621_v8 }
 0x948   : > { %1640 = vst [vmem:[#allocation3 + $0x38] sm:$0xff] %v1632_v9  ;;  %1639 = vst [vmem:[#allocation3 + $0x30] sm:$0xff] %v1631_v10 }
 0x949 PF: > { %v1649_v11 = vld [vmem:[#allocation3] sm:$0xff]  ;;  %v1650_v12 = vld [vmem:[#allocation3 + $0x8] sm:$0xff]  ;;  %v1651_v13 = vld [vmem:[#allocation3 + $0x10] sm:$0xff]  ;;  %v3849_v16 = vmov 6   ;;  %vm1661_vm4 = vcmask 785408  }
 0x94a   : > { %v2949_v14 = vpack.c.bf16 %v1650_v12, %v1649_v11  ;;  %v1652_v15 = vld [vmem:[#allocation3 + $0x18] sm:$0xff]  ;;  %3267 = vset.pattern.permute.xlu0 %v3849_v16  ;;  %v1645_v22 = vld [vmem:[%s4535_s13] sm:$0xff]  ;;  %v1657_v34 = vld [vmem:[#allocation3 + $0x40] sm:$0xff] }
 0x94b   : > { %v2953_v18 = vpack.c.bf16 %v1652_v15, %v1651_v13  ;;  %v1653_v20 = vld [vmem:[#allocation3 + $0x20] sm:$0xff]  ;;  %v1654_v21 = vld [vmem:[#allocation3 + $0x28] sm:$0xff]  ;;  %1776 = vperm.xlu0 %3267, %v4610_v35   ;;  %2837 = vmatprep.mubr.msk.f32.mxu1 %vm1661_vm4, %v1645_v22  ;;  %v1659_v40 = vld [vmem:[#allocation3 + $0x50] sm:$0xff] }
 0x94c   : > { %2950 = vmatprep.subr.bf16.mxu1 %v2949_v14  ;;  %v2957_v23 = vpack.c.bf16 %v1654_v21, %v1653_v20  ;;  %v1658_v0 = vld [vmem:[#allocation3 + $0x48] sm:$0xff]  ;;  %v1660_v41 = vld [vmem:[#allocation3 + $0x58] sm:$0xff]  ;;  %v1647_v44 = vld [vmem:[%s4535_s13 + $0x10] sm:$0xff] }
 0x94d   : > { %2952 = vmatpush3.bf16.msra.mxu1 %v2949_v14  ;;  %v2965_v36 = vpack.c.bf16 %v1658_v0, %v1657_v34  ;;  %v2969_v42 = vpack.c.bf16 %v1660_v41, %v1659_v40  ;;  %v1646_v43 = vld [vmem:[%s4535_s13 + $0x8] sm:$0xff]  ;;  %v1648_v45 = vld [vmem:[%s4535_s13 + $0x18] sm:$0xff]  ;;  %s5076_s13 = sld [smem:[#allocation40_spill]] }
 0x94e   : > { %2954 = vmatprep.subr.bf16.mxu1 %v2953_v18  ;;  %v1894_v17 = vld [vmem:[%s4537_s21 + $0x8] sm:$0xff] }
 0x94f   : > { %v1655_v27 = vld [vmem:[#allocation3 + $0x30] sm:$0xff]  ;;  %v1656_v30 = vld [vmem:[#allocation3 + $0x38] sm:$0xff]  ;;  %1780 = vperm.xlu0 %3267, %v4617_v37  }
 0x950   : > { %v2961_v31 = vpack.c.bf16 %v1656_v30, %v1655_v27 }
 0x951   : > { %2956 = vmatpush3.bf16.msra.mxu1 %v2953_v18 }
 0x952   : > { %2958 = vmatprep.subr.bf16.mxu1 %v2957_v23 }
 0x953   : > { %p2639_p7 = scmp.ne.s32.totalorder %s5076_s13, 7 }
 0x955   : > { %2960 = vmatpush3.bf16.msra.mxu1 %v2957_v23 }
 0x956   : > { %2962 = vmatprep.subr.bf16.mxu1 %v2961_v31 }
 0x959   : > { %2964 = vmatpush3.bf16.msra.mxu1 %v2961_v31 }
 0x95a   : > { %2966 = vmatprep.subr.bf16.mxu1 %v2965_v36 }
 0x95d   : > { %2968 = vmatpush3.bf16.msra.mxu1 %v2965_v36 }
 0x95e   : > { %2970 = vmatprep.subr.bf16.mxu1 %v2969_v42 }
 0x961   : > { %2972 = vmatpush3.bf16.msra.mxu1 %v2969_v42 }
 0x964   : > { %2838 = vmatmul.mubr.msk.f32.vlgmr.msra.gmra.mrb[0].mxu1 %vm1661_vm4, %v1646_v43 }
 0x965   : > { %2840 = vmatprep.mubr.msk.f32.mxu1 %vm1661_vm4, %v1647_v44 }
 0x968   : > { %2841 = vmatmul.mubr.msk.f32.gmra.mrb[2].mxu1 %vm1661_vm4, %v1648_v45  ;;  %v3850_v45 = vmov 7  }
 0x969   : > { %3268 = vset.pattern.permute.xlu1 %v3850_v45  ;;  %3269 = vset.pattern.permute.xlu0 %v3850_v45 }
 0x9ca   : > { %v1777_v53 = vpop.permute.xlu0 %1776 }
 0x9ce   : > { %v1781_v2 = vpop.permute.xlu0 %1780 }
 0xa37   : > { %v2839_v46 = vpop.f32.mrb[0].mxu1 }
 0xa38   : > { %v1740_v47 = vpop.f32.mrb[1].mxu1 }
 0xa3b   : > { %v2842_v48 = vpop.f32.mrb[2].mxu1 }
 0xa3c   : > { %v2630_v49 = vmul.f32 -1.442695, %v2842_v48  ;;  %v1750_v50 = vpop.f32.mrb[3].mxu1 }
 0xa3d   : > { %v2629_v51 = vmul.f32 -1.442695, %v1750_v50 }
 0xa3e   : > { %3272 = vpow2.f32 %v2630_v49  ;;  %v3851_v49 = vmov 8  }
 0xa3f   : > { %3274 = vpow2.f32 %v2629_v51 }
 0xa48   : > { %v3273_v54 = vpop.eup %3272 }
 0xa49   : > { %v3275_v55 = vpop.eup %3274  ;;  %v1766_v56 = vadd.f32 1.0, %v3273_v54 }
 0xa4a   : > { %v1765_v52 = vadd.f32 1.0, %v3275_v55  ;;  %v1893_v55 = vld [vmem:[%s4537_s21] sm:$0xff] }
 0xa4b   : > { %3276 = vrcp.f32 %v1766_v56  ;;  %2847 = vmatprep.mubr.msk.f32.mxu0 %vm1326_vm13, %v1893_v55  ;;  %v3855_v55 = vmov (!%p2639_p7), 0  }
 0xa4c   : > { %3278 = vrcp.f32 %v1765_v52 }
 0xa55   : > { %v3277_v61 = vpop.eup %3276 }
 0xa56   : > { %v3279_v62 = vpop.eup %3278  ;;  %v1772_v63 = vmul.f32 %v3277_v61, %v2839_v46 }
 0xa57   : > { %v1771_v1 = vmul.f32 %v3279_v62, %v1740_v47 }
 0xa58   : > { %vm1774_vm5 = vcmp.ge.f32.partialorder %v1772_v63, 0.0  ;;  %v1784_v3 = vmul.f32 %v1781_v2, %v1772_v63 }
 0xa59   : > { %vm1773_vm7 = vcmp.ge.f32.partialorder %v1771_v1, 0.0  ;;  %v1783_v4 = vmul.f32 %v1777_v53, %v1771_v1 }
 0xa5a   : > { %v4780_v6 = vsel %vm1774_vm5, %v1772_v63, %v1784_v3 }
 0xa5b   : > { %v4782_v57 = vsel %vm1773_vm7, %v1771_v1, %v1783_v4  ;;  %v1795_v58 = vmul.f32 %v4780_v6, %v4780_v6 }
 0xa5c   : > { %v1794_v7 = vmul.f32 %v4782_v57, %v4782_v57  ;;  %v1787_v59 = vadd.f32 %v4780_v6, %v4782_v57 }
 0xa5e   : > { %v1788_v60 = vrot.slane %v1787_v59, 4  ;;  %v1796_v8 = vadd.f32 %v1795_v58, %v1794_v7 }
 0xa60   : > { %v1789_v9 = vadd.f32 %v1788_v60, %v1787_v59  ;;  %v1797_v10 = vrot.slane %v1796_v8, 4 }
 0xa62   : > { %v1790_v11 = vrot.slane %v1789_v9, 2  ;;  %v1798_v12 = vadd.f32 %v1797_v10, %v1796_v8 }
 0xa64   : > { %v1791_v13 = vadd.f32 %v1790_v11, %v1789_v9  ;;  %v1799_v14 = vrot.slane %v1798_v12, 2 }
 0xa66   : > { %v1792_v15 = vrot.slane %v1791_v13, 1  ;;  %v1800_v16 = vadd.f32 %v1799_v14, %v1798_v12 }
 0xa68   : > { %v1801_v18 = vrot.slane %v1800_v16, 1  ;;  %v1793_v20 = vadd.f32 %v1792_v15, %v1791_v13 }
 0xa6a   : > { %v1802_v21 = vadd.f32 %v1801_v18, %v1800_v16 }
 0xa6c   : > { %v1803_v22 = vsel %vm1288_vm6, %v1793_v20, %v1802_v21  ;;  %v1898_v21 = vld [vmem:[%s4537_s21 + $0x28] sm:$0xff]  ;;  %vm3853_vm6 = vmmov (!%p2639_p7), 0  }
 0xa6d   : > { %1805 = vrot.lane.b32.xlu1 %v1803_v22, %s3830_s19 }
 0xadf   : > { %v1806_v23 = vpop.permute.xlu1 %1805 }
 0xae0   : > { %v1808_v27 = vsel %vm1298_vm9, 0.0, %v1806_v23  ;;  %v1900_v23 = vld [vmem:[%s4537_s21 + $0x38] sm:$0xff] }
 0xae1   : > { %v1809_v30 = vadd.f32 %v1808_v27, %v1803_v22  ;;  %v1899_v22 = vld [vmem:[%s4537_s21 + $0x30] sm:$0xff] }
 0xae3   : > { %1811 = vrot.lane.b32.xlu1 %v1809_v30, %s3831_s25 }
 0xb55   : > { %v1812_v31 = vpop.permute.xlu1 %1811 }
 0xb56   : > { %v1814_v34 = vsel %vm1305_vm10, 0.0, %v1812_v31 }
 0xb57   : > { %v1815_v0 = vadd.f32 %v1814_v34, %v1809_v30 }
 0xb59   : > { %1817 = vrot.lane.b32.xlu0 %v1815_v0, %s3832_s0 }
 0xbcb   : > { %v1818_v36 = vpop.permute.xlu0 %1817 }
 0xbcc   : > { %v1820_v40 = vsel %vm1312_vm11, 0.0, %v1818_v36 }
 0xbcd   : > { %v1821_v41 = vadd.f32 %v1820_v40, %v1815_v0 }
 0xbcf   : > { %1823 = vrot.lane.b32.xlu1 %v1821_v41, %s3833_s5 }
 0xc41   : > { %v1824_v42 = vpop.permute.xlu1 %1823 }
 0xc42   : > { %v1826_v43 = vsel %vm1319_vm12, 0.0, %v1824_v42 }
 0xc43   : > { %v1827_v44 = vadd.f32 %v1826_v43, %v1821_v41 }
 0xc45   : > { %1829 = vrot.lane.b32.xlu0 %v1827_v44, %s3834_s2 }
 0xcb7   : > { %v1830_v46 = vpop.permute.xlu0 %1829 }
 0xcb8   : > { %v1832_v47 = vsel %vm1326_vm13, 0.0, %v1830_v46 }
 0xcb9   : > { %v1833_v48 = vadd.f32 %v1832_v47, %v1827_v44 }
 0xcbb   : > { %1835 = vrot.lane.b32.xlu1 %v1833_v48, %s3836_s15 }
 0xcbf   : > { %1874 = vperm.xlu1 %3268, %v4610_v35  }
 0xcc3   : > { %3270 = vset.pattern.permute.xlu1 %v3851_v49 }
 0xcc4   : > { %1884 = vperm.xlu1 %3270, %v4610_v35  }
 0xcc8   : > { %1888 = vperm.xlu1 %3270, %v4617_v37  }
 0xccc   : > { %3283 = vset.pattern.permute.xlu1 (!%p2639_p7), %v3855_v55 }
 0xd2d   : > { %v1836_v50 = vpop.permute.xlu1 %1835 }
 0xd2e   : > { %v1838_v51 = vsel %vm1333_vm14, 0.0, %v1836_v50  ;;  %v3854_v50 = vmov (!%p2639_p7), 0.0  }
 0xd2f   : > { %v1839_v54 = vadd.f32 %v1838_v51, %v1833_v48  ;;  %2900 = vmatprep.mubr.msk.f32.mxu1 (!%p2639_p7), %vm3853_vm6, %v3854_v50 }
 0xd31   : > { %1841 = vrot.lane.b32.xlu0 %v1839_v54, %s3840_s9 }
 0xd35   : > { %1878 = vperm.xlu0 %3269, %v4617_v37  }
 0xd39   : > { %3271 = vset.pattern.permute.xlu0 %v3851_v49 }
 0xd3a   : > { %3282 = vset.pattern.permute.xlu0 (!%p2639_p7), %v3855_v55 }
 0xd3e   : > { %v1875_v7 = vpop.permute.xlu1 %1874 }
 0xd43   : > { %v1885_v8 = vpop.permute.xlu1 %1884 }
 0xda3   : > { %v1842_v56 = vpop.permute.xlu0 %1841 }
 0xda4   : > { %v1844_v52 = vsel %vm1144_vm3, 0.0, %v1842_v56  ;;  %v2061_v56 = vld [vmem:[#allocation21] sm:$0xff] (!%p2639_p7) }
 0xda5   : > { %v1845_v53 = vadd.f32 %v1844_v52, %v1839_v54  ;;  %v2063_v54 = vld [vmem:[#allocation21 + $0x10] sm:$0x1] (!%p2639_p7)  ;;  %2066 = vperm.xlu0 (!%p2639_p7), %3282, %v2061_v56  }
 0xda6   : > { %2076 = vperm.xlu1 (!%p2639_p7), %3283, %v2063_v54  }
 0xda7   : > { %v1846_v35 = vmul.f32 %v4555_v5, %v1845_v53 }
 0xda9   : > { %v1847_v61 = vmul.f32 2.0, %v1846_v35  ;;  %v1854_v1 = vmul.f32 %v1846_v35, %v1846_v35  ;;  %v1862_v59 = vrot.slane %v1846_v35, %v1357_v19  ;;  %v1889_v19 = vpop.permute.xlu1 %1888  ;;  %v2062_v35 = vld [vmem:[#allocation21 + $0x8] sm:$0xff] (!%p2639_p7) }
 0xdaa   : > { %2071 = vperm.xlu0 (!%p2639_p7), %3282, %v2062_v35  }
 0xdab   : > { %v1848_v62 = vmul.f32 %v1847_v61, %v1845_v53  ;;  %v1856_v4 = vrot.slane %v1854_v1, 7  ;;  %v1863_v9 = vsub.f32 %v4782_v57, %v1862_v59  ;;  %v1864_v11 = vsub.f32 %v4780_v6, %v1862_v59  ;;  %v1896_v6 = vld [vmem:[%s4537_s21 + $0x18] sm:$0xff]  ;;  %v1897_v57 = vld [vmem:[%s4537_s21 + $0x20] sm:$0xff] }
 0xdac   : > { %v2176_v1 = vld [vmem:[#allocation24 + $0x10] sm:$0x1] (!%p2639_p7)  ;;  %v2173_v59 = vld [vmem:[#allocation22 + $0x10] sm:$0x1] (!%p2639_p7) }
 0xdad   : > { %v1850_v63 = vrot.slane %v1848_v62, 7 }
 0xdaf   : > { %v1852_v2 = vsub.f32 %v1845_v53, %v1850_v63  ;;  %v2174_v53 = vld [vmem:[#allocation24] sm:$0xff] (!%p2639_p7) }
 0xdb0   : > { %2179 = vperm.xlu1 (!%p2639_p7), %3283, %v2174_v53  }
 0xdb1   : > { %v1853_v3 = vmul.f32 %v4555_v5, %v1852_v2  ;;  %v2175_v2 = vld [vmem:[#allocation24 + $0x8] sm:$0xff] (!%p2639_p7) }
 0xdb2   : > { %2184 = vperm.xlu0 (!%p2639_p7), %3282, %v2175_v2  }
 0xdb3   : > { %v1858_v58 = vadd.f32 %v1856_v4, %v1853_v3  ;;  %v2058_v3 = vld [vmem:[#allocation19] sm:$0xff] (!%p2639_p7)  ;;  %v2171_v4 = vld [vmem:[#allocation22] sm:$0xff] (!%p2639_p7) }
 0xdb4   : > { %v1879_v5 = vpop.permute.xlu0 %1878  ;;  %2189 = vperm.xlu1 (!%p2639_p7), %3283, %v2176_v1  }
 0xdb5   : > { %v1865_v37 = vadd.f32 1e-05, %v1858_v58  ;;  %v2059_v58 = vld [vmem:[#allocation19 + $0x8] sm:$0xff] (!%p2639_p7) }
 0xdb7   : > { %3280 = vrsqrt.f32 %v1865_v37  ;;  %v2172_v37 = vld [vmem:[#allocation22 + $0x8] sm:$0xff] (!%p2639_p7) }
 0xdc1   : > { %v3281_v60 = vpop.eup %3280 }
 0xdc2   : > { %v1870_v10 = vrot.slane %v3281_v60, %v1365_v29  ;;  %v1895_v29 = vld [vmem:[%s4537_s21 + $0x10] sm:$0xff] }
 0xdc4   : > { %v1871_v12 = vmul.f32 %v1870_v10, %v1863_v9  ;;  %v1872_v13 = vmul.f32 %v1870_v10, %v1864_v11 }
 0xdc6   : > { %v1881_v14 = vmul.f32 %v1875_v7, %v1871_v12  ;;  %v1882_v15 = vmul.f32 %v1879_v5, %v1872_v13  ;;  %v2060_v7 = vld [vmem:[#allocation19 + $0x10] sm:$0x1] (!%p2639_p7) }
 0xdc8   : > { %v1891_v16 = vadd.f32 %v1885_v8, %v1881_v14  ;;  %v1892_v18 = vadd.f32 %v1889_v19, %v1882_v15 }
 0xdca   : > { %v2973_v20 = vpack.c.bf16 %v1892_v18, %v1891_v16 }
 0xdcc   : > { %2974 = vmatprep.subr.bf16.mxu0 %v2973_v20 }
 0xdcd   : > { %2976 = vmatpush3.bf16.msra.mxu0 %v2973_v20 }
 0xdd0   : > { %2848 = vmatmul.mubr.msk.f32.vlgmr.msra.gmra.mrb[2].mxu0 %vm1326_vm13, %v1894_v17 }
 0xdd1   : > { %2850 = vmatprep.mubr.msk.f32.mxu0 %vm1326_vm13, %v1895_v29 }
 0xdd4   : > { %2851 = vmatmul.mubr.msk.f32.gmra.mrb[4].mxu0 %vm1326_vm13, %v1896_v6 }
 0xdd5   : > { %2853 = vmatprep.mubr.msk.f32.mxu0 %vm1326_vm13, %v1897_v57 }
 0xdd8   : > { %2854 = vmatmul.mubr.msk.f32.gmra.mrb[6].mxu0 %vm1326_vm13, %v1898_v21 }
 0xdd9   : > { %2856 = vmatprep.mubr.msk.f32.mxu0 %vm1326_vm13, %v1899_v22 }
 0xddc   : > { %2857 = vmatmul.mubr.msk.f32.gmra.mrb[8].mxu0 %vm1326_vm13, %v1900_v23 }
 0xddd   : > { %2875 = vmatprep.mubr.msk.f32.mxu0 (!%p2639_p7), %vm3853_vm6, %v3854_v50 }
 0xe24   : > { %v2067_v60 = vpop.permute.xlu0 (!%p2639_p7), %2066 }
 0xe25   : > { %v2077_v8 = vpop.permute.xlu1 (!%p2639_p7), %2076 }
 0xe29   : > { %v2072_v9 = vpop.permute.xlu0 (!%p2639_p7), %2071 }
 0xe2f   : > { %v2180_v10 = vpop.permute.xlu1 (!%p2639_p7), %2179 }
 0xe31   : > { %v2185_v19 = vpop.permute.xlu0 (!%p2639_p7), %2184 }
 0xe33   : > { %v2190_v57 = vpop.permute.xlu1 (!%p2639_p7), %2189 }
 0xea3   : > { %v2849_v27 = vpop.f32.mrb[2].mxu0 }
 0xea4   : > { %v2031_v30 = vadd.f32 %v2849_v27, %v4593_v25  ;;  %v1991_v31 = vpop.f32.mrb[3].mxu0 }
 0xea5   : > { %v2030_v34 = vadd.f32 %v1991_v31, %v4591_v24 }
 0xea6   : > { %2039 = vst [vmem:[#allocation2 + $0x8] sm:$0xff] %v2031_v30 }
 0xea7   : > { %2038 = vst [vmem:[#allocation2] sm:$0xff] %v2030_v34  ;;  %v2852_v0 = vpop.f32.mrb[4].mxu0 }
 0xea8   : > { %v2033_v36 = vadd.f32 %v2852_v0, %v4599_v28  ;;  %v2001_v40 = vpop.f32.mrb[5].mxu0 }
 0xea9   : > { %v2032_v41 = vadd.f32 %v2001_v40, %v4595_v26 }
 0xeaa   : > { %2041 = vst [vmem:[#allocation2 + $0x18] sm:$0xff] %v2033_v36 }
 0xeab   : > { %2040 = vst [vmem:[#allocation2 + $0x10] sm:$0xff] %v2032_v41  ;;  %v2855_v42 = vpop.f32.mrb[6].mxu0 }
 0xeac   : > { %v2035_v43 = vadd.f32 %v2855_v42, %v4605_v33  ;;  %v2011_v44 = vpop.f32.mrb[7].mxu0  ;;  %v3852_v33 = vmov (!%p2639_p7), 0.0|0.0  }
 0xead   : > { %v2034_v45 = vadd.f32 %v2011_v44, %v4603_v32  ;;  %2049 = sbr.rel (%p2639_p7) target bundleno = 3999 (0xf9f), region = 148  ;;  %v2051_v28 = vld [vmem:[#allocation2 + $0x8] sm:$0xff] (!%p2639_p7)  ;;  %2977 = vmatprep.subr.bf16.mxu0 (!%p2639_p7), %v3852_v33  ;;  %2989 = vmatprep.subr.bf16.mxu1 (!%p2639_p7), %v3852_v33 }
 0xeae   : > { %2043 = vst [vmem:[#allocation2 + $0x28] sm:$0xff] %v2035_v43  ;;  %v2050_v26 = vld [vmem:[#allocation2] sm:$0xff] (!%p2639_p7) }
 0xeaf   : > { %2042 = vst [vmem:[#allocation2 + $0x20] sm:$0xff] %v2034_v45  ;;  %v2858_v25 = vpop.f32.mrb[8].mxu0  ;;  %v2978_v32 = vpack.c.bf16 (!%p2639_p7), %v2051_v28, %v2050_v26 }
 0xeb0   : > { %v2037_v24 = vadd.f32 %v2858_v25, %v4621_v39  ;;  %v2021_v46 = vpop.f32.mrb[9].mxu0 }
 0xeb1   : > { %v2036_v47 = vadd.f32 %v2021_v46, %v4619_v38  ;;  %v2053_v49 = vld [vmem:[#allocation2 + $0x18] sm:$0xff] (!%p2639_p7)  ;;  %2979 = vmatpush3.bf16.msra.mxu0 (!%p2639_p7), %v2978_v32  ;;  %2991 = vmatpush3.bf16.msra.mxu1 (!%p2639_p7), %v2978_v32 }
 0xeb2   : > { %2045 = vst [vmem:[#allocation2 + $0x38] sm:$0xff] %v2037_v24  ;;  %v2052_v48 = vld [vmem:[#allocation2 + $0x10] sm:$0xff] (!%p2639_p7)  ;;  %2980 = vmatprep.subr.bf16.mxu0 (!%p2639_p7), %v3852_v33  ;;  %2992 = vmatprep.subr.bf16.mxu1 (!%p2639_p7), %v3852_v33 }
 0xeb3   : > { %2044 = vst [vmem:[#allocation2 + $0x30] sm:$0xff] %v2036_v47  ;;  %v2981_v38 = vpack.c.bf16 (!%p2639_p7), %v2053_v49, %v2052_v48 }
 0xeb5   : > { %v2055_v51 = vld [vmem:[#allocation2 + $0x28] sm:$0xff]  ;;  %2982 = vmatpush3.bf16.msra.mxu0 %v2981_v38  ;;  %2994 = vmatpush3.bf16.msra.mxu1 %v2981_v38 }
 0xeb6   : > { %v2054_v39 = vld [vmem:[#allocation2 + $0x20] sm:$0xff]  ;;  %2983 = vmatprep.subr.bf16.mxu0 %v3852_v33  ;;  %2995 = vmatprep.subr.bf16.mxu1 %v3852_v33 }
 0xeb7   : > { %v2984_v52 = vpack.c.bf16 %v2055_v51, %v2054_v39 }
 0xeb9   : > { %v2057_v62 = vld [vmem:[#allocation2 + $0x38] sm:$0xff]  ;;  %2985 = vmatpush3.bf16.msra.mxu0 %v2984_v52  ;;  %2997 = vmatpush3.bf16.msra.mxu1 %v2984_v52 }
 0xeba   : > { %v2056_v61 = vld [vmem:[#allocation2 + $0x30] sm:$0xff]  ;;  %2986 = vmatprep.subr.bf16.mxu0 %v3852_v33  ;;  %2998 = vmatprep.subr.bf16.mxu1 %v3852_v33 }
 0xebb   : > { %v2987_v63 = vpack.c.bf16 %v2057_v62, %v2056_v61 }
 0xebd   : > { %2988 = vmatpush3.bf16.msra.mxu0 %v2987_v63  ;;  %3000 = vmatpush3.bf16.msra.mxu1 %v2987_v63 }
 0xec0   : > { %2876 = vmatmul.mubr.msk.f32.vlgmr.msra.gmra.mrb[0].mxu0 %vm1144_vm3, %v2058_v3  ;;  %2901 = vmatmul.mubr.msk.f32.vlgmr.msra.gmra.mrb[0].mxu1 %vm1144_vm3, %v2171_v4 }
 0xec1   : > { %2878 = vmatprep.mubr.msk.f32.mxu0 %vm3853_vm6, %v3854_v50  ;;  %2903 = vmatprep.mubr.msk.f32.mxu1 %vm3853_vm6, %v3854_v50 }
 0xec4   : > { %2879 = vmatmul.mubr.msk.f32.gmra.mrb[2].mxu0 %vm1144_vm3, %v2059_v58  ;;  %2904 = vmatmul.mubr.msk.f32.gmra.mrb[2].mxu1 %vm1144_vm3, %v2172_v37 }
 0xec5   : > { %2881 = vmatprep.mubr.msk.f32.mxu0 %vm3853_vm6, %v3854_v50  ;;  %2906 = vmatprep.mubr.msk.f32.mxu1 %vm3853_vm6, %v3854_v50 }
 0xec8   : > { %2882 = vmatmul.mubr.msk.f32.gmra.mrb[4].mxu0 %vm1144_vm3, %v2060_v7  ;;  %2907 = vmatmul.mubr.msk.f32.gmra.mrb[4].mxu1 %vm1144_vm3, %v2173_v59 }
 0xf93   : > { %v2154_v11 = vpop.f32.mrb[0].mxu0  ;;  %v2267_v5 = vpop.f32.mrb[0].mxu1 }
 0xf94   : > { %v2155_v12 = vadd.f32 %v2154_v11, %v2067_v60  ;;  %v2268_v13 = vadd.f32 %v2267_v5, %v2180_v10  ;;  %v2877_v14 = vpop.f32.mrb[1].mxu0  ;;  %v2902_v15 = vpop.f32.mrb[1].mxu1 }
 0xf96   : > { %2168 = vst [vmem:[%s4557_s27] sm:$0xff] %v2155_v12  ;;  %2646 = vst [vmem:[%s4557_s27 + $0x18] sm:$0xff] %v2268_v13 }
 0xf97   : > { %v2159_v16 = vpop.f32.mrb[2].mxu0  ;;  %v2272_v18 = vpop.f32.mrb[2].mxu1 }
 0xf98   : > { %v2160_v20 = vadd.f32 %v2159_v16, %v2072_v9  ;;  %v2273_v17 = vadd.f32 %v2272_v18, %v2185_v19  ;;  %v2880_v29 = vpop.f32.mrb[3].mxu0  ;;  %v2905_v6 = vpop.f32.mrb[3].mxu1 }
 0xf9a   : > { %2169 = vst [vmem:[%s4557_s27 + $0x8] sm:$0xff] %v2160_v20  ;;  %2647 = vst [vmem:[%s4557_s27 + $0x20] sm:$0xff] %v2273_v17 }
 0xf9b   : > { %v2164_v21 = vpop.f32.mrb[4].mxu0  ;;  %v2277_v22 = vpop.f32.mrb[4].mxu1 }
 0xf9c   : > { %v2165_v23 = vadd.f32 %v2164_v21, %v2077_v8  ;;  %v2278_v27 = vadd.f32 %v2277_v22, %v2190_v57  ;;  %v2883_v30 = vpop.f32.mrb[5].mxu0  ;;  %v2908_v31 = vpop.f32.mrb[5].mxu1 }
 0xf9e   : > { %2170 = vst [vmem:[%s4557_s27 + $0x10] sm:$0x1] %v2165_v23  ;;  %2648 = vst [vmem:[%s4557_s27 + $0x28] sm:$0x1] %v2278_v27 }
 0xf9f PF: > { %s5077_s21 = sld [smem:[#allocation41_spill]]  ;;  %s2299_s25 = sshll.u32 %s4557_s27, 4  ;;  %s4867_s25 = int_to_ptr.vmem [resolvable:$true] %s2299_s25 }
 0xfa0   : > { %s5078_s15 = sld [smem:[#allocation62_spill]]  ;;  %s2286_s11 = scalar_lea.sflag [#allocation6], %s4502_s22 }
 0xfa1   : > { %s3660_s14 = scalar_lea.vmem %s4867_s25, 768  ;;  %p5080_p12 = scmp.ne.s32.totalorder %s5045_s7, 0 }
 0xfa2   : > { %p3661_p2 = scmp.ne.s32.totalorder %s4867_s25, %s3660_s14  ;;  %s3856_s29 = smov [#allocation25]  }
 0xfa3   : > { %s3664_s10 = sshll.u32 %s3856_s29, 4  ;;  %s3665_s10 = int_to_ptr.vmem [resolvable:$false] %s3664_s10 }
 0xfa4   : > { %p3662_p10 = pnand %p3661_p2, %p5080_p12  ;;  %s3666_s27 = scalar_lea.vmem %s3665_s10, 1536 }
 0xfa5   : > { %s3021_s19 = smul.u32 768, %s5077_s21  ;;  %p3667_p9 = scmp.lt.s32.totalorder %s4867_s25, %s3665_s10 }
 0xfa6   : > { %s5079_s12 = smov %s5078_s15  ;;  %p3663_p8 = pneg %p3662_p10 }
 0xfa7   : > { %s4865_s9 = scalar_lea.hbm %s5078_s15, %s3021_s19  ;;  %p3668_p11 = scmp.lt.s32.totalorder %s3666_s27, %s3660_s14 }
 0xfa9   : > { %p3669_p1 = por %p3668_p11, %p3667_p9 }
 0xfab   : > { %p3670_p3 = pnand %p3669_p1, %p3663_p8 }
 0xfad   : > { %3673 = shalt.err (!%p3670_p3)
}
 0xfae   : > { %s3674_s4 = scalar_lea.hbm %s4865_s9, 768  ;;  %s3678_s17 = scalar_lea.hbm %s5079_s12, 1536 }
 0xfaf   : > { %p3675_p5 = scmp.ne.s32.totalorder %s4865_s9, %s3674_s4  ;;  %p3679_p4 = scmp.lt.u32.totalorder %s4865_s9, %s5079_s12 }
 0xfb0   : > { %p3680_p0 = scmp.lt.u32.totalorder %s3678_s17, %s3674_s4  ;;  %p3682_p2 = scmp.lt.u32.totalorder %s3674_s4, %s4865_s9 }
 0xfb1   : > { %p3676_p6 = pnand %p3675_p5, %p5080_p12 }
 0xfb2   : > { %p3681_p7 = por %p3680_p0, %p3679_p4 }
 0xfb3   : > { %p3677_p13 = pneg %p3676_p6 }
 0xfb4   : > { %p3683_p10 = por %p3682_p2, %p3681_p7 }
 0xfb6   : > { %p3684_p8 = pnand %p3683_p10, %p3677_p13 }
 0xfb8   : > { %3687 = shalt.err (!%p3684_p8)
}
 0xfb9   : > { %s3857_s23 = smov 128  }
 0xfba   : > { %3062 = dma.vmem_to_hbm [thread:$0]  (%p5080_p12), %s4867_s25, 768, %s4865_s9, %s2286_s11, %s3857_s23, %s3857_s23, %s3833_s5  }
 0xfbb PF: > { %s5081_s30 = sld [smem:[#allocation37_spill]]  ;;  %s5082_s24 = sld [smem:[#allocation48_spill]] }
 0xfbc   : > { %p3124_p9 = scmp.ge.s32.totalorder %s3810_s18, 2 }
 0xfc1   : > { %s2314_s13 = sand.u32 1, %s5081_s30   ;;  %p5083_p11 = scmp.ne.s32.totalorder %s5082_s24, 0 }
 0xfc2   : > { %s2315_s21 = scalar_lea.sflag [#allocation6], %s2314_s13 }
 0xfc3   : > { %p3106_p1 = pnand %p3124_p9, %p5083_p11 }
 0xfc5   : > { %3765 = dma.done.wait (!%p3106_p1), %s2315_s21, 768  }
 0xfc6   : > { %3767 = vsyncadd (!%p3106_p1), %s2315_s21, 4294966528  ;;  %s41_s18 = sadd.s32 1, %s3810_s18   ;;  %s5084_s25 = sld [smem:[#allocation35_spill]] }
 0xfc7   : > { %p38_p3 = scmp.ge.s32.totalorder %s41_s18, 18   ;;  %s5085_s26 = sld [smem:[#allocation36_spill]] }
 0xfc8   : > { %s5086_s27 = sld [smem:[#allocation46_spill]]  ;;  %s5087_s28 = sld [smem:[#allocation38_spill]] }
 0xfc9   : > { %s5088_s29 = sld [smem:[#allocation39_spill]]  ;;  %s5089_s30 = sld [smem:[#allocation49_spill]] }
 0xfca   : > { %s5090_s15 = sld [smem:[#allocation42_spill]]  ;;  %s5091_s7 = sld [smem:[#allocation44_spill]] }
 0xfcb   : > { %s5092_s17 = sld [smem:[#allocation47_spill]]  ;;  %s5093_s14 = smov %s3802_s16 }
 0xfcc   :  { %40 = sbr.rel (!%p38_p3) target bundleno = 32 (0x20), region = 231 }
 0xfd0   : > { %s5094_s16 = smov %s5091_s7 }
 0xfd3   :  { %2320 = vsyncpa [#allocation5], 1 }
 0xfd4   :  { %2322 = vsyncpa [#allocation5 + $0x1], 1 }
 0xfd5   :  { %2323 = vsyncpa [#allocation8], 1 }
 0xfd6   :  { %2325 = vsyncpa [#allocation8 + $0x1], 1 }
 0xfd7   :  { %2326 = vsyncpa [#allocation11], 1 }
 0xfd8   :  { %2327 = vsyncpa [#allocation14], 1 }
 0xfd9   :  { %2329 = vsyncpa [#allocation14 + $0x1], 1 }
 0xfda   :  { %2330 = vsyncpa [#allocation17], 1 }
 0xfdb   :  { %2332 = vsyncpa [#allocation17 + $0x1], 1 }
 0xfdc   :  { %2333 = vsyncpa [#allocation20], 1 }
 0xfdd   :  { %2334 = vsyncpa [#allocation23], 1 }
 0xfde   :  { %2335 = vsyncpa [#allocation6], 1 }
 0xfdf   :  { %2337 = vsyncpa [#allocation6 + $0x1], 1 }

</bundles_post_ra>
